<compile_context>
chip_gen: v7x
topology: tpu7x:2x2x1
jax: 0.10.0
libtpu: 0.0.40
codegen_flags: <defaults>
</compile_context>

<pallas_src>
import functools

import jax
import jax.numpy as jnp
from jax import lax
from jax.experimental import pallas as pl
from jax.experimental.pallas import tpu as pltpu

HIDDEN = 64          # per-branch hidden width fixed by the module
FUSED = 2 * HIDDEN   # fused actor+critic hidden -> 128 lanes (full vreg lane dim)
LANES = 128          # lane-dense padded width for layer-3 output
OUT_ROWS = 8         # output slab rows (0=logp, 1=value, 2=entropy, rest pad)


def _round_up(x, m):
    return (x + m - 1) // m * m


def actor_critic_kernel(state_ref, action_ref, bits_ref,
                        w1_ref, b1_ref, w2_ref, b2_ref, w3_ref, b3_ref,
                        out_ref, *, action_dim):
    """Fused evaluate for one batch tile.

    out_ref is a transposed lane-dense (8, block_b) slab:
      row 0 = log_prob(action), row 1 = state value, row 2 = entropy, rest = 0.
    """
    x = state_ref[...]                                               # (Bt, S)

    # layer 1: fused actor|critic weights (S, 128)
    h = jnp.tanh(jnp.dot(x, w1_ref[...],
                         preferred_element_type=jnp.float32) + b1_ref[...])
    # layer 2: block-diagonal (128, 128)
    h = jnp.tanh(jnp.dot(h, w2_ref[...],
                         preferred_element_type=jnp.float32) + b2_ref[...])
    # layer 3: block-diagonal, zero-padded to 128 lanes: [logits | value | 0...]
    y = jnp.dot(h, w3_ref[...],
                preferred_element_type=jnp.float32) + b3_ref[...]    # (Bt, 128)

    col = lax.broadcasted_iota(jnp.int32, y.shape, 1)

    # critic value lives in lane `action_dim` (select+reduce kept rather than a
    # width-1 lane slice for lowering safety; the extra XLU reduce is negligible
    # in this DMA-bound regime).
    value = jnp.sum(jnp.where(col == action_dim, y, 0.0), axis=-1, keepdims=True)

    # Rebuild the one-hot action and valid-action mask from the compact int32
    # per-row inputs (saves ~1 KiB/row of HBM traffic vs. f32 onehot/mask tensors).
    is_act = col == action_ref[...]                                  # (Bt, 128) bool
    bits = bits_ref[...]                                             # (Bt, 1) int32
    bit = jnp.right_shift(bits, jnp.minimum(col, 31)) & 1
    valid = (bit != 0) & (col < action_dim)     # padding lanes & value lane excluded

    # masked logits: finite sentinel (NOT -inf) so exp underflows to exactly 0
    # and the ez*z entropy term stays NaN-free (matches reference within 1e-4).
    logits = jnp.where(valid, y, -1e10)

    # Categorical log_prob / entropy without materializing probs or logp_all.
    m = jnp.max(logits, axis=-1, keepdims=True)
    z = logits - m
    ez = jnp.exp(z)
    denom = jnp.sum(ez, axis=-1, keepdims=True)
    log_denom = jnp.log(denom)
    # approx=True would route this divide to the EUP, but its ~bf16-grade
    # precision can break the 1e-4 parity check; keep the exact reciprocal.
    inv_denom = pl.reciprocal(denom, approx=False)

    logp = jnp.sum(jnp.where(is_act, z, 0.0), axis=-1, keepdims=True) - log_denom
    ent = log_denom - jnp.sum(ez * z, axis=-1, keepdims=True) * inv_denom

    # Transposed lane-dense output slab: batch along lanes -> unmasked vst and
    # 16x less writeback than a (Bt, 128) slab.
    slab = jnp.where(col == 0, logp, 0.0)
    slab = jnp.where(col == 1, value, slab)
    slab = jnp.where(col == 2, ent, slab)
    out_ref[...] = jnp.transpose(slab)[:OUT_ROWS, :]


# ----------------------------------------------------------------------------
# parameter construction / fusion (host side)
# ----------------------------------------------------------------------------

def init_linear(key, fan_in, fan_out):
    # PyTorch nn.Linear default: U(-1/sqrt(fan_in), 1/sqrt(fan_in))
    kw, kb = jax.random.split(key)
    bound = 1.0 / jnp.sqrt(jnp.float32(fan_in))
    w = jax.random.uniform(kw, (fan_in, fan_out), jnp.float32, -bound, bound)
    b = jax.random.uniform(kb, (1, fan_out), jnp.float32, -bound, bound)
    return w, b


def make_params(key, state_dim, action_dim, hidden=HIDDEN):
    keys = jax.random.split(key, 6)
    aw1, ab1 = init_linear(keys[0], state_dim, hidden)
    aw2, ab2 = init_linear(keys[1], hidden, hidden)
    aw3, ab3 = init_linear(keys[2], hidden, action_dim)
    cw1, cb1 = init_linear(keys[3], state_dim, hidden)
    cw2, cb2 = init_linear(keys[4], hidden, hidden)
    cw3, cb3 = init_linear(keys[5], hidden, 1)
    return (aw1, ab1, aw2, ab2, aw3, ab3, cw1, cb1, cw2, cb2, cw3, cb3)


def fuse_params(params, action_dim):
    """Build the fused / block-diagonal weights used by the kernel."""
    (aw1, ab1, aw2, ab2, aw3, ab3, cw1, cb1, cw2, cb2, cw3, cb3) = params
    assert action_dim + 1 <= LANES, "action_dim too large for padded layer-3 output"
    w1 = jnp.concatenate([aw1, cw1], axis=1)                         # (S, 128)
    b1 = jnp.concatenate([ab1, cb1], axis=1)                         # (1, 128)
    w2 = jnp.zeros((FUSED, FUSED), jnp.float32)
    w2 = w2.at[:HIDDEN, :HIDDEN].set(aw2).at[HIDDEN:, HIDDEN:].set(cw2)
    b2 = jnp.concatenate([ab2, cb2], axis=1)                         # (1, 128)
    w3 = jnp.zeros((FUSED, LANES), jnp.float32)
    w3 = w3.at[:HIDDEN, :action_dim].set(aw3)
    w3 = w3.at[HIDDEN:, action_dim:action_dim + 1].set(cw3)
    b3 = jnp.zeros((1, LANES), jnp.float32)
    b3 = b3.at[:, :action_dim].set(ab3)
    b3 = b3.at[:, action_dim:action_dim + 1].set(cb3)
    return w1, b1, w2, b2, w3, b3


# ----------------------------------------------------------------------------
# wrapper
# ----------------------------------------------------------------------------

def actor_critic_evaluate(state, action, action_mask, params, *, block_b=1024):
    """Discrete ActorCritic.evaluate -> (log_probs (B,), state_values (B,1), entropy (B,))."""
    B, S = state.shape
    action_dim = params[4].shape[-1]          # aw3: (HIDDEN, action_dim)
    assert action_dim <= 32, "int32 bitmask packing only covers action_dim <= 32"

    fused = fuse_params(params, action_dim)

    # compact per-row inputs: action index + valid-action bitmask (int32 each)
    action_i = action.astype(jnp.int32).reshape(B, 1)
    if action_mask is None:
        full = (1 << action_dim) - 1 if action_dim < 32 else -1
        bits = jnp.full((B, 1), full, jnp.int32)
    else:
        weights = (jnp.int32(1) << jnp.arange(action_dim, dtype=jnp.int32))[None, :]
        bits = jnp.sum((action_mask != 0).astype(jnp.int32) * weights,
                       axis=1, keepdims=True).astype(jnp.int32)

    # batch tiling: tile rows multiple of 128 so the transposed (8, bb) output
    # block stays lane-dense (unmasked stores).
    bb = min(_round_up(block_b, LANES), _round_up(B, LANES))
    # keep the grid length >= 2 when possible so v7x's two TensorCores both get tiles
    if _round_up(B, bb) // bb < 2 and bb > LANES:
        bb = _round_up(bb // 2, LANES)
    B_pad = _round_up(B, bb)
    if B_pad != B:
        pad = B_pad - B
        state = jnp.pad(state, ((0, pad), (0, 0)))
        action_i = jnp.pad(action_i, ((0, pad), (0, 0)))
        bits = jnp.pad(bits, ((0, pad), (0, 0)))   # all-invalid rows -> finite, sliced off

    grid = (B_pad // bb,)

    def row_spec(shape):
        return pl.BlockSpec(shape, lambda i: (i, 0))

    def weight_spec(shape):
        return pl.BlockSpec(shape, lambda i: (0, 0))

    out = pl.pallas_call(
        functools.partial(actor_critic_kernel, action_dim=action_dim),
        out_shape=jax.ShapeDtypeStruct((OUT_ROWS, B_pad), jnp.float32),
        grid=grid,
        in_specs=[
            row_spec((bb, S)),            # state
            row_spec((bb, 1)),            # action index (int32)
            row_spec((bb, 1)),            # valid-action bitmask (int32)
            weight_spec((S, FUSED)),      # w1
            weight_spec((1, FUSED)),      # b1
            weight_spec((FUSED, FUSED)),  # w2 (block-diag)
            weight_spec((1, FUSED)),      # b2
            weight_spec((FUSED, LANES)),  # w3 (block-diag, padded)
            weight_spec((1, LANES)),      # b3
        ],
        out_specs=pl.BlockSpec((OUT_ROWS, bb), lambda i: (0, i)),
        compiler_params=pltpu.CompilerParams(
            # batch tiles are independent -> sharded across TCs on v7x; no-op on v5e/v6e
            dimension_semantics=("parallel",),
        ),
    )(state, action_i, bits, *fused)

    logp = out[0, :B]
    value = out[1, :B][:, None]
    ent = out[2, :B]
    return logp, value, ent


# ----------------------------------------------------------------------------
# pure-JAX reference (mirrors the PyTorch module)
# ----------------------------------------------------------------------------

def reference_evaluate(state, action, action_mask, params):
    (aw1, ab1, aw2, ab2, aw3, ab3, cw1, cb1, cw2, cb2, cw3, cb3) = params
    h = jnp.tanh(state @ aw1 + ab1)
    h = jnp.tanh(h @ aw2 + ab2)
    logits = h @ aw3 + ab3
    logits = logits + (action_mask == 0.0).astype(jnp.float32) * -1e10
    logp_all = jax.nn.log_softmax(logits, axis=-1)
    probs = jax.nn.softmax(logits, axis=-1)
    logp = jnp.take_along_axis(logp_all, action[:, None], axis=-1)[:, 0]
    ent = -jnp.sum(probs * logp_all, axis=-1)
    c = jnp.tanh(state @ cw1 + cb1)
    c = jnp.tanh(c @ cw2 + cb2)
    value = c @ cw3 + cb3
    return logp, value, ent


if __name__ == "__main__":
    # PPO-minibatch-sized batch (two 256-row tiles); state/action dims stay small.
    B, STATE_DIM, ACTION_DIM = 512, 32, 8

    key = jax.random.PRNGKey(0)
    k_state, k_act, k_mask, k_params = jax.random.split(key, 4)

    state = jax.random.normal(k_state, (B, STATE_DIM), dtype=jnp.float32)
    action = jax.random.randint(k_act, (B,), 0, ACTION_DIM)
    # mask out a few actions per row but always keep the sampled action valid
    action_mask = (jax.random.uniform(k_mask, (B, ACTION_DIM)) > 0.25).astype(jnp.float32)
    action_mask = jnp.maximum(action_mask,
                              jax.nn.one_hot(action, ACTION_DIM, dtype=jnp.float32))

    params = make_params(k_params, STATE_DIM, ACTION_DIM)

    logp, value, ent = actor_critic_evaluate(state, action, action_mask, params)
    jax.block_until_ready((logp, value, ent))

    logp_ref, value_ref, ent_ref = reference_evaluate(state, action, action_mask, params)
    assert jnp.allclose(logp, logp_ref, atol=1e-4), "log_prob mismatch"
    assert jnp.allclose(value, value_ref, atol=1e-4), "state_value mismatch"
    assert jnp.allclose(ent, ent_ref, atol=1e-4), "entropy mismatch"

    print("KERNEL_OK")
</pallas_src>

<mosaic_0001>
module attributes {stable_mosaic.version = 11 : i64} {
  func.func @actor_critic_kernel(%arg0: i32, %arg1: memref<256x32xf32, #tpu.memory_space<vmem>>, %arg2: memref<256x1xi32, #tpu.memory_space<vmem>>, %arg3: memref<256x1xi32, #tpu.memory_space<vmem>>, %arg4: memref<32x128xf32, #tpu.memory_space<vmem>>, %arg5: memref<1x128xf32, #tpu.memory_space<vmem>>, %arg6: memref<128x128xf32, #tpu.memory_space<vmem>>, %arg7: memref<1x128xf32, #tpu.memory_space<vmem>>, %arg8: memref<128x128xf32, #tpu.memory_space<vmem>>, %arg9: memref<1x128xf32, #tpu.memory_space<vmem>>, %arg10: memref<8x256xf32, #tpu.memory_space<vmem>>) attributes {dimension_semantics = [#tpu.dimension_semantics<parallel>], iteration_bounds = array<i64: 2>, scalar_prefetch = 0 : i64, scratch_operands = 0 : i64, tpu.core_type = #tpu.core_type<tc>, window_params = [{transform_indices = @transform_0, window_bounds = array<i64: 256, 32>}, {transform_indices = @transform_1, window_bounds = array<i64: 256, 1>}, {transform_indices = @transform_2, window_bounds = array<i64: 256, 1>}, {pipeline_mode = #tpu.pipeline_mode<synchronous>, transform_indices = @transform_3, window_bounds = array<i64: 32, 128>}, {pipeline_mode = #tpu.pipeline_mode<synchronous>, transform_indices = @transform_4, window_bounds = array<i64: 1, 128>}, {pipeline_mode = #tpu.pipeline_mode<synchronous>, transform_indices = @transform_5, window_bounds = array<i64: 128, 128>}, {pipeline_mode = #tpu.pipeline_mode<synchronous>, transform_indices = @transform_6, window_bounds = array<i64: 1, 128>}, {pipeline_mode = #tpu.pipeline_mode<synchronous>, transform_indices = @transform_7, window_bounds = array<i64: 128, 128>}, {pipeline_mode = #tpu.pipeline_mode<synchronous>, transform_indices = @transform_8, window_bounds = array<i64: 1, 128>}, {transform_indices = @transform_9, window_bounds = array<i64: 8, 256>}]} {
    %c0 = arith.constant 0 : index
    %c0_0 = arith.constant 0 : index
    %0 = vector.load %arg1[%c0, %c0_0] : memref<256x32xf32, #tpu.memory_space<vmem>>, vector<256x32xf32>
    %c0_1 = arith.constant 0 : index
    %c0_2 = arith.constant 0 : index
    %1 = vector.load %arg4[%c0_1, %c0_2] : memref<32x128xf32, #tpu.memory_space<vmem>>, vector<32x128xf32>
    %cst = arith.constant dense<0.000000e+00> : vector<256x128xf32>
    %2 = tpu.matmul %0, %1, %cst {dimension_numbers = #tpu.dot_dimension_numbers<[1], [0], [0], [1], [0, 0, 1, 1], [], []>} : vector<256x32xf32>, vector<32x128xf32>, vector<256x128xf32> -> vector<256x128xf32>
    %c0_3 = arith.constant 0 : index
    %c0_4 = arith.constant 0 : index
    %3 = vector.load %arg5[%c0_3, %c0_4] : memref<1x128xf32, #tpu.memory_space<vmem>>, vector<1x128xf32>
    %4 = vector.broadcast %3 : vector<1x128xf32> to vector<256x128xf32>
    %5 = arith.addf %2, %4 : vector<256x128xf32>
    %6 = math.tanh %5 : vector<256x128xf32>
    %c0_5 = arith.constant 0 : index
    %c0_6 = arith.constant 0 : index
    %7 = vector.load %arg6[%c0_5, %c0_6] : memref<128x128xf32, #tpu.memory_space<vmem>>, vector<128x128xf32>
    %cst_7 = arith.constant dense<0.000000e+00> : vector<256x128xf32>
    %8 = tpu.matmul %6, %7, %cst_7 {dimension_numbers = #tpu.dot_dimension_numbers<[1], [0], [0], [1], [0, 0, 1, 1], [], []>} : vector<256x128xf32>, vector<128x128xf32>, vector<256x128xf32> -> vector<256x128xf32>
    %c0_8 = arith.constant 0 : index
    %c0_9 = arith.constant 0 : index
    %9 = vector.load %arg7[%c0_8, %c0_9] : memref<1x128xf32, #tpu.memory_space<vmem>>, vector<1x128xf32>
    %10 = vector.broadcast %9 : vector<1x128xf32> to vector<256x128xf32>
    %11 = arith.addf %8, %10 : vector<256x128xf32>
    %12 = math.tanh %11 : vector<256x128xf32>
    %c0_10 = arith.constant 0 : index
    %c0_11 = arith.constant 0 : index
    %13 = vector.load %arg8[%c0_10, %c0_11] : memref<128x128xf32, #tpu.memory_space<vmem>>, vector<128x128xf32>
    %cst_12 = arith.constant dense<0.000000e+00> : vector<256x128xf32>
    %14 = tpu.matmul %12, %13, %cst_12 {dimension_numbers = #tpu.dot_dimension_numbers<[1], [0], [0], [1], [0, 0, 1, 1], [], []>} : vector<256x128xf32>, vector<128x128xf32>, vector<256x128xf32> -> vector<256x128xf32>
    %c0_13 = arith.constant 0 : index
    %c0_14 = arith.constant 0 : index
    %15 = vector.load %arg9[%c0_13, %c0_14] : memref<1x128xf32, #tpu.memory_space<vmem>>, vector<1x128xf32>
    %16 = vector.broadcast %15 : vector<1x128xf32> to vector<256x128xf32>
    %17 = arith.addf %14, %16 : vector<256x128xf32>
    %18 = tpu.iota {dimensions = array<i32: 1>} : vector<256x128xi32>
    %c8_i32 = arith.constant 8 : i32
    %19 = vector.broadcast %c8_i32 : i32 to vector<256x128xi32>
    %20 = arith.cmpi eq, %18, %19 : vector<256x128xi32>
    %cst_15 = arith.constant 0.000000e+00 : f32
    %21 = vector.broadcast %cst_15 : f32 to vector<256x128xf32>
    %22 = arith.select %20, %17, %21 : vector<256x128xi1>, vector<256x128xf32>
    %cst_16 = arith.constant dense<0.000000e+00> : vector<256xf32>
    %23 = vector.multi_reduction <add>, %22, %cst_16 [1] : vector<256x128xf32> to vector<256xf32>
    %24 = vector.shape_cast %23 : vector<256xf32> to vector<256x1xf32>
    %c0_17 = arith.constant 0 : index
    %c0_18 = arith.constant 0 : index
    %25 = vector.load %arg2[%c0_17, %c0_18] : memref<256x1xi32, #tpu.memory_space<vmem>>, vector<256x1xi32>
    %26 = vector.broadcast %25 : vector<256x1xi32> to vector<256x128xi32>
    %27 = arith.cmpi eq, %18, %26 : vector<256x128xi32>
    %c0_19 = arith.constant 0 : index
    %c0_20 = arith.constant 0 : index
    %28 = vector.load %arg3[%c0_19, %c0_20] : memref<256x1xi32, #tpu.memory_space<vmem>>, vector<256x1xi32>
    %c31_i32 = arith.constant 31 : i32
    %29 = vector.broadcast %c31_i32 : i32 to vector<256x128xi32>
    %30 = arith.minsi %18, %29 : vector<256x128xi32>
    %31 = vector.broadcast %28 : vector<256x1xi32> to vector<256x128xi32>
    %32 = arith.shrsi %31, %30 : vector<256x128xi32>
    %c1_i32 = arith.constant 1 : i32
    %33 = vector.broadcast %c1_i32 : i32 to vector<256x128xi32>
    %34 = arith.andi %32, %33 : vector<256x128xi32>
    %c0_i32 = arith.constant 0 : i32
    %35 = vector.broadcast %c0_i32 : i32 to vector<256x128xi32>
    %36 = arith.cmpi ne, %34, %35 : vector<256x128xi32>
    %c8_i32_21 = arith.constant 8 : i32
    %37 = vector.broadcast %c8_i32_21 : i32 to vector<256x128xi32>
    %38 = arith.cmpi slt, %18, %37 : vector<256x128xi32>
    %39 = arith.andi %36, %38 : vector<256x128xi1>
    %cst_22 = arith.constant -1.000000e+10 : f32
    %40 = vector.broadcast %cst_22 : f32 to vector<256x128xf32>
    %41 = arith.select %39, %17, %40 : vector<256x128xi1>, vector<256x128xf32>
    %cst_23 = arith.constant dense<0xFF800000> : vector<256xf32>
    %42 = vector.multi_reduction <maximumf>, %41, %cst_23 [1] : vector<256x128xf32> to vector<256xf32>
    %43 = vector.shape_cast %42 : vector<256xf32> to vector<256x1xf32>
    %44 = vector.broadcast %43 : vector<256x1xf32> to vector<256x128xf32>
    %45 = arith.subf %41, %44 : vector<256x128xf32>
    %46 = math.exp %45 : vector<256x128xf32>
    %cst_24 = arith.constant dense<0.000000e+00> : vector<256xf32>
    %47 = vector.multi_reduction <add>, %46, %cst_24 [1] : vector<256x128xf32> to vector<256xf32>
    %48 = vector.shape_cast %47 : vector<256xf32> to vector<256x1xf32>
    %49 = math.log %48 : vector<256x1xf32>
    %50 = tpu.reciprocal %48 : vector<256x1xf32> -> vector<256x1xf32>
    %cst_25 = arith.constant 0.000000e+00 : f32
    %51 = vector.broadcast %cst_25 : f32 to vector<256x128xf32>
    %52 = arith.select %27, %45, %51 : vector<256x128xi1>, vector<256x128xf32>
    %cst_26 = arith.constant dense<0.000000e+00> : vector<256xf32>
    %53 = vector.multi_reduction <add>, %52, %cst_26 [1] : vector<256x128xf32> to vector<256xf32>
    %54 = vector.shape_cast %53 : vector<256xf32> to vector<256x1xf32>
    %55 = arith.subf %54, %49 : vector<256x1xf32>
    %56 = arith.mulf %46, %45 : vector<256x128xf32>
    %cst_27 = arith.constant dense<0.000000e+00> : vector<256xf32>
    %57 = vector.multi_reduction <add>, %56, %cst_27 [1] : vector<256x128xf32> to vector<256xf32>
    %58 = vector.shape_cast %57 : vector<256xf32> to vector<256x1xf32>
    %59 = arith.mulf %58, %50 : vector<256x1xf32>
    %60 = arith.subf %49, %59 : vector<256x1xf32>
    %c0_i32_28 = arith.constant 0 : i32
    %61 = vector.broadcast %c0_i32_28 : i32 to vector<256x128xi32>
    %62 = arith.cmpi eq, %18, %61 : vector<256x128xi32>
    %cst_29 = arith.constant 0.000000e+00 : f32
    %63 = vector.shape_cast %55 : vector<256x1xf32> to vector<256x1xf32>
    %64 = vector.broadcast %63 : vector<256x1xf32> to vector<256x128xf32>
    %65 = vector.broadcast %cst_29 : f32 to vector<256x128xf32>
    %66 = arith.select %62, %64, %65 : vector<256x128xi1>, vector<256x128xf32>
    %c1_i32_30 = arith.constant 1 : i32
    %67 = vector.broadcast %c1_i32_30 : i32 to vector<256x128xi32>
    %68 = arith.cmpi eq, %18, %67 : vector<256x128xi32>
    %69 = vector.shape_cast %24 : vector<256x1xf32> to vector<256x1xf32>
    %70 = vector.broadcast %69 : vector<256x1xf32> to vector<256x128xf32>
    %71 = arith.select %68, %70, %66 : vector<256x128xi1>, vector<256x128xf32>
    %c2_i32 = arith.constant 2 : i32
    %72 = vector.broadcast %c2_i32 : i32 to vector<256x128xi32>
    %73 = arith.cmpi eq, %18, %72 : vector<256x128xi32>
    %74 = vector.shape_cast %60 : vector<256x1xf32> to vector<256x1xf32>
    %75 = vector.broadcast %74 : vector<256x1xf32> to vector<256x128xf32>
    %76 = arith.select %73, %75, %71 : vector<256x128xi1>, vector<256x128xf32>
    %77 = tpu.transpose %76, [1, 0] : vector<256x128xf32> -> vector<128x256xf32>
    %78 = vector.extract_strided_slice %77 {offsets = [0, 0], sizes = [8, 256], strides = [1, 1]} : vector<128x256xf32> to vector<8x256xf32>
    %c0_31 = arith.constant 0 : index
    %c0_32 = arith.constant 0 : index
    %79 = vector.load %arg10[%c0_31, %c0_32] : memref<8x256xf32, #tpu.memory_space<vmem>>, vector<8x256xf32>
    tpu.vector_store %arg10[%c0_31, %c0_32], %78 {strides = array<i32>} : memref<8x256xf32, #tpu.memory_space<vmem>>, vector<8x256xf32>,
    return
  }
  func.func @transform_0(%arg0: i32) -> (i32, i32) {
    %c0_i32 = arith.constant 0 : i32
    %c0_i32_0 = arith.constant 0 : i32
    return %arg0, %c0_i32 : i32, i32
  }
  func.func @transform_1(%arg0: i32) -> (i32, i32) {
    %c0_i32 = arith.constant 0 : i32
    %c0_i32_0 = arith.constant 0 : i32
    return %arg0, %c0_i32 : i32, i32
  }
  func.func @transform_2(%arg0: i32) -> (i32, i32) {
    %c0_i32 = arith.constant 0 : i32
    %c0_i32_0 = arith.constant 0 : i32
    return %arg0, %c0_i32 : i32, i32
  }
  func.func @transform_3(%arg0: i32) -> (i32, i32) {
    %c0_i32 = arith.constant 0 : i32
    %c0_i32_0 = arith.constant 0 : i32
    %c0_i32_1 = arith.constant 0 : i32
    return %c0_i32, %c0_i32_0 : i32, i32
  }
  func.func @transform_4(%arg0: i32) -> (i32, i32) {
    %c0_i32 = arith.constant 0 : i32
    %c0_i32_0 = arith.constant 0 : i32
    %c0_i32_1 = arith.constant 0 : i32
    return %c0_i32, %c0_i32_0 : i32, i32
  }
  func.func @transform_5(%arg0: i32) -> (i32, i32) {
    %c0_i32 = arith.constant 0 : i32
    %c0_i32_0 = arith.constant 0 : i32
    %c0_i32_1 = arith.constant 0 : i32
    return %c0_i32, %c0_i32_0 : i32, i32
  }
  func.func @transform_6(%arg0: i32) -> (i32, i32) {
    %c0_i32 = arith.constant 0 : i32
    %c0_i32_0 = arith.constant 0 : i32
    %c0_i32_1 = arith.constant 0 : i32
    return %c0_i32, %c0_i32_0 : i32, i32
  }
  func.func @transform_7(%arg0: i32) -> (i32, i32) {
    %c0_i32 = arith.constant 0 : i32
    %c0_i32_0 = arith.constant 0 : i32
    %c0_i32_1 = arith.constant 0 : i32
    return %c0_i32, %c0_i32_0 : i32, i32
  }
  func.func @transform_8(%arg0: i32) -> (i32, i32) {
    %c0_i32 = arith.constant 0 : i32
    %c0_i32_0 = arith.constant 0 : i32
    %c0_i32_1 = arith.constant 0 : i32
    return %c0_i32, %c0_i32_0 : i32, i32
  }
  func.func @transform_9(%arg0: i32) -> (i32, i32) {
    %c0_i32 = arith.constant 0 : i32
    %c0_i32_0 = arith.constant 0 : i32
    return %c0_i32, %arg0 : i32, i32
  }
}

</mosaic_0001>

<bundles_post_ra>
// kernel: tpu_custom_call.1
= control target key start
LH: loop header
LB: loop body
LE: loop exit
PB: predicated region body
PF: predicated region fallthrough
CT: control target
= control target key end

     0   :  { %14 = vsyncpa [#allocation3], 0  ;;  %s5499_s0 = inlined_call_operand.vmem [shape: f32[512,32], index: 0, kind: input, shape index: {}]   ;;  %s5500_s1 = inlined_call_operand.vmem [shape: s32[512,1], index: 1, kind: input, shape index: {}]   ;;  %s5501_s2 = inlined_call_operand.vmem [shape: s32[512,1], index: 2, kind: input, shape index: {}]   ;;  %s5502_s3 = inlined_call_operand.vmem [shape: f32[32,128], index: 3, kind: input, shape index: {}]   ;;  %s5503_s4 = inlined_call_operand.vmem [shape: f32[1,128], index: 4, kind: input, shape index: {}]   ;;  %s5504_s5 = inlined_call_operand.vmem [shape: f32[128,128], index: 5, kind: input, shape index: {}]   ;;  %s5505_s6 = inlined_call_operand.vmem [shape: f32[1,128], index: 6, kind: input, shape index: {}]   ;;  %s5506_s7 = inlined_call_operand.vmem [shape: f32[128,128], index: 7, kind: input, shape index: {}]   ;;  %s5507_s8 = inlined_call_operand.vmem [shape: f32[1,128], index: 8, kind: input, shape index: {}]   ;;  %s5508_s9 = inlined_call_operand.hbm [shape: f32[8,512], index: 9, kind: output, shape index: {}]  }
   0x1   :  { %16 = vsyncpa [#allocation3 + $0x1], 0  ;;  %s3678_s30 = smov 0   ;;  %s3680_s10 = smov 0  }
   0x2   :  { %s3682_s11 = smov 0   ;;  %s3684_s12 = smov 0  }
   0x3 LB: > { %s3699_s13 = sadd.s32 4294967295, %s3624_s12   ;;  %s2724_s14 = sadd.s32 4294967294, %s3624_s12   ;;  %s3624_s12 = sphi %s3684_s12, %s5620_s12   ;;  %s3620_s11 = sphi %s3682_s11, %s5619_s11   ;;  %s3616_s10 = sphi %s3680_s10, %s5618_s10   ;;  %s3612_s30 = sphi %s3678_s30, %s5617_s30  }
   0x4   : > { %s3703_s15 = sadd.s32 1, %s3624_s12   ;;  %s233_s16 = sadd.s32 1, %s3620_s11 }
   0x5   : > { %s230_s17 = ssub.s32 %s3624_s12, %s3703_s15  ;;  %p243_p0 = scmp.ne.s32.totalorder %s3620_s11, %s3616_s10 }
   0x6   : > { %p231_p1 = scmp.eq.s32.totalorder %s230_s17, 0  ;;  %p244_p2 = scmp.eq.s32.totalorder %s3699_s13, 1 }
   0x7   : > { %p249_p3 = scmp.ne.s32.totalorder %s3616_s10, %s3612_s30  ;;  %p250_p4 = scmp.eq.s32.totalorder %s2724_s14, 1 }
   0x8   : > { %s3714_s18 = scalar_select %p231_p1, %s3620_s11, %s233_s16  }
   0x9   : > { %p3716_p5 = por %p244_p2, %p243_p0  ;;  %p3720_p6 = por %p250_p4, %p249_p3 }
   0xa   : > { %p2727_p7 = scmp.ge.s32.totalorder %s3624_s12, 1  ;;  %p313_p8 = scmp.lt.s32.totalorder %s3624_s12, 3 }
   0xc   : > { %p314_p9 = pnand %p2727_p7, %p313_p8 }
   0xe   : > { %317 = sbr.rel (%p314_p9) target bundleno = 1301 (0x515), region = 56 }
  0x15   : > { %v410_v0 = vld [vmem:[%s5502_s3] sm:$0xff]  ;;  %v411_v1 = vld [vmem:[%s5502_s3 + $0x8] sm:$0xff]  ;;  %v412_v2 = vld [vmem:[%s5502_s3 + $0x10] sm:$0xff]  ;;  %s2729_s27 = sshll.u32 %s3699_s13, 5  ;;  %vm421_vm0 = vcmask 261120   ;;  %s356_s17 = sand.u32 1, %s3616_s10  }
  0x16   : > { %v3124_v3 = vpack.c.bf16 %v411_v1, %v410_v0  ;;  %v413_v4 = vld [vmem:[%s5502_s3 + $0x18] sm:$0xff]  ;;  %p360_p10 = scmp.lt.s32.totalorder %s2729_s27, 63  ;;  %v775_v6 = vld [vmem:[%s5504_s5] sm:$0xff]  ;;  %v776_v7 = vld [vmem:[%s5504_s5 + $0x8] sm:$0xff]  ;;  %v3626_v0 = vmov 0   ;;  %s2728_s21 = sshll.u32 %s356_s17, 4 }
  0x17   : > { %v3128_v5 = vpack.c.bf16 %v413_v4, %v412_v2  ;;  %v3132_v8 = vpack.c.bf16 %v776_v7, %v775_v6  ;;  %v777_v12 = vld [vmem:[%s5504_s5 + $0x10] sm:$0xff]  ;;  %v778_v13 = vld [vmem:[%s5504_s5 + $0x18] sm:$0xff]  ;;  %v779_v20 = vld [vmem:[%s5504_s5 + $0x20] sm:$0xff]  ;;  %3241 = vset.pattern.permute.xlu1 %v3626_v0  ;;  %3240 = vset.pattern.permute.xlu0 %v3626_v0  ;;  %s358_s23 = scalar_lea.vmem [#allocation2], %s2728_s21 }
  0x18   : > { %3125 = vmatprep.subr.bf16.mxu0 %v3124_v3  ;;  %s5622_s27 = smov (!%p360_p10, %s2729_s27), 63  ;;  %3196 = vmatprep.subr.bf16.mxu1 %v3124_v3  ;;  %v3136_v19 = vpack.c.bf16 %v778_v13, %v777_v12  ;;  %v780_v21 = vld [vmem:[%s5504_s5 + $0x28] sm:$0xff]  ;;  %v781_v27 = vld [vmem:[%s5504_s5 + $0x30] sm:$0xff]  ;;  %v782_v28 = vld [vmem:[%s5504_s5 + $0x38] sm:$0xff]  ;;  %s2641_s26 = sshll.u32 %s358_s23, 4  ;;  %s5454_s26 = int_to_ptr.vmem [resolvable:$true] %s2641_s26 }
  0x19   : > { %3127 = vmatpush3.bf16.msra.mxu0 %v3124_v3  ;;  %3198 = vmatpush3.bf16.msra.mxu1 %v3124_v3  ;;  %s3745_s22 = sshll.u32 %s5622_s27, 3  ;;  %v3140_v26 = vpack.c.bf16 %v780_v21, %v779_v20  ;;  %v3144_v33 = vpack.c.bf16 %v782_v28, %v781_v27  ;;  %v783_v34 = vld [vmem:[%s5504_s5 + $0x40] sm:$0xff]  ;;  %v784_v35 = vld [vmem:[%s5504_s5 + $0x48] sm:$0xff]  ;;  %v785_v53 = vld [vmem:[%s5504_s5 + $0x50] sm:$0xff]  ;;  %s2775_s27 = sshll.u32 %s3699_s13, 8 }
  0x1a   : > { %3129 = vmatprep.subr.bf16.mxu0 %v3128_v5  ;;  %3197 = vmatprep.subr.bf16.mxu1 %v3128_v5  ;;  %s3751_s25 = scalar_lea.vmem %s5499_s0, %s3745_s22  ;;  %v3148_v40 = vpack.c.bf16 %v784_v35, %v783_v34  ;;  %v786_v54 = vld [vmem:[%s5504_s5 + $0x58] sm:$0xff]  ;;  %v787_v56 = vld [vmem:[%s5504_s5 + $0x60] sm:$0xff]  ;;  %v788_v57 = vld [vmem:[%s5504_s5 + $0x68] sm:$0xff]  ;;  %s3863_s24 = scalar_lea.vmem %s5500_s1, %s3745_s22 }
  0x1b   : > { %v378_v9 = vld [vmem:[%s3751_s25] sm:$0xff]  ;;  %v379_v10 = vld [vmem:[%s3751_s25 + $0x8] sm:$0xff]  ;;  %v380_v11 = vld [vmem:[%s3751_s25 + $0x10] sm:$0xff]  ;;  %v3152_v55 = vpack.c.bf16 %v786_v54, %v785_v53  ;;  %v3156_v58 = vpack.c.bf16 %v788_v57, %v787_v56  ;;  %s3933_s29 = scalar_lea.vmem %s5501_s2, %s3745_s22  ;;  %s5459_s22 = scalar_lea.hbm %s5508_s9, %s2775_s27 }
  0x1c   : > { %2916 = vmatprep.mubr.msk.f32.mxu0 %vm421_vm0, %v378_v9  ;;  %v381_v14 = vld [vmem:[%s3751_s25 + $0x18] sm:$0xff]  ;;  %v394_v15 = vld [vmem:[%s3751_s25 + $0x80] sm:$0xff]  ;;  %v395_v16 = vld [vmem:[%s3751_s25 + $0x88] sm:$0xff]  ;;  %s3562_s14 = scalar_lea.vmem %s5454_s26, 256 }
  0x1d   : > { %3131 = vmatpush3.bf16.msra.mxu0 %v3128_v5  ;;  %3199 = vmatpush3.bf16.msra.mxu1 %v3128_v5  ;;  %v382_v17 = vld [vmem:[%s3751_s25 + $0x20] sm:$0xff]  ;;  %v396_v18 = vld [vmem:[%s3751_s25 + $0x90] sm:$0xff]  ;;  %v397_v22 = vld [vmem:[%s3751_s25 + $0x98] sm:$0xff]  ;;  %p3563_p11 = scmp.ne.s32.totalorder %s5454_s26, %s3562_s14 }
  0x1e   : > { %3133 = vmatprep.subr.bf16.mxu1 %v3132_v8  ;;  %2940 = vmatprep.mubr.msk.f32.mxu1 %vm421_vm0, %v394_v15  ;;  %v383_v23 = vld [vmem:[%s3751_s25 + $0x28] sm:$0xff]  ;;  %v398_v24 = vld [vmem:[%s3751_s25 + $0xa0] sm:$0xff]  ;;  %v384_v25 = vld [vmem:[%s3751_s25 + $0x30] sm:$0xff] }
  0x1f   : > { %v399_v29 = vld [vmem:[%s3751_s25 + $0xa8] sm:$0xff]  ;;  %v385_v30 = vld [vmem:[%s3751_s25 + $0x38] sm:$0xff]  ;;  %v400_v31 = vld [vmem:[%s3751_s25 + $0xb0] sm:$0xff]  ;;  %p3564_p12 = pnand %p3563_p11, %p3716_p5 }
  0x20   : > { %2917 = vmatmul.mubr.msk.f32.vlgmr.msra.gmra.mrb[0].mxu0 %vm421_vm0, %v379_v10  ;;  %2941 = vmatmul.mubr.msk.f32.vlgmr.msra.gmra.mrb[0].mxu1 %vm421_vm0, %v395_v16  ;;  %v386_v32 = vld [vmem:[%s3751_s25 + $0x40] sm:$0xff]  ;;  %v401_v36 = vld [vmem:[%s3751_s25 + $0xb8] sm:$0xff]  ;;  %v387_v37 = vld [vmem:[%s3751_s25 + $0x48] sm:$0xff] }
  0x21   : > { %2919 = vmatprep.mubr.msk.f32.mxu0 %vm421_vm0, %v380_v11  ;;  %2943 = vmatprep.mubr.msk.f32.mxu1 %vm421_vm0, %v396_v18  ;;  %v402_v38 = vld [vmem:[%s3751_s25 + $0xc0] sm:$0xff]  ;;  %v388_v39 = vld [vmem:[%s3751_s25 + $0x50] sm:$0xff]  ;;  %v403_v41 = vld [vmem:[%s3751_s25 + $0xc8] sm:$0xff]  ;;  %p3565_p13 = pneg %p3564_p12 }
  0x22   : > { %3135 = vmatpush3.bf16.msra.mxu1 %v3132_v8  ;;  %v389_v42 = vld [vmem:[%s3751_s25 + $0x58] sm:$0xff]  ;;  %v404_v43 = vld [vmem:[%s3751_s25 + $0xd0] sm:$0xff]  ;;  %v390_v44 = vld [vmem:[%s3751_s25 + $0x60] sm:$0xff] }
  0x23   : > { %3137 = vmatprep.subr.bf16.mxu1 %v3136_v19  ;;  %v405_v45 = vld [vmem:[%s3751_s25 + $0xd8] sm:$0xff]  ;;  %v391_v46 = vld [vmem:[%s3751_s25 + $0x68] sm:$0xff]  ;;  %v406_v47 = vld [vmem:[%s3751_s25 + $0xe0] sm:$0xff] }
  0x24   : > { %2920 = vmatmul.mubr.msk.f32.gmra.mrb[2].mxu0 %vm421_vm0, %v381_v14  ;;  %2944 = vmatmul.mubr.msk.f32.gmra.mrb[2].mxu1 %vm421_vm0, %v397_v22  ;;  %v392_v48 = vld [vmem:[%s3751_s25 + $0x70] sm:$0xff]  ;;  %v407_v49 = vld [vmem:[%s3751_s25 + $0xe8] sm:$0xff]  ;;  %v393_v50 = vld [vmem:[%s3751_s25 + $0x78] sm:$0xff] }
  0x25   : > { %2922 = vmatprep.mubr.msk.f32.mxu0 %vm421_vm0, %v382_v17  ;;  %2946 = vmatprep.mubr.msk.f32.mxu1 %vm421_vm0, %v398_v24  ;;  %v408_v51 = vld [vmem:[%s3751_s25 + $0xf0] sm:$0xff]  ;;  %v409_v52 = vld [vmem:[%s3751_s25 + $0xf8] sm:$0xff]  ;;  %v1055_v62 = vld [vmem:[%s5506_s7] sm:$0xff] }
  0x26   : > { %3139 = vmatpush3.bf16.msra.mxu1 %v3136_v19  ;;  %v789_v59 = vld [vmem:[%s5504_s5 + $0x70] sm:$0xff]  ;;  %v790_v60 = vld [vmem:[%s5504_s5 + $0x78] sm:$0xff]  ;;  %v1056_v63 = vld [vmem:[%s5506_s7 + $0x8] sm:$0xff] }
  0x27   : > { %3141 = vmatprep.subr.bf16.mxu1 %v3140_v26  ;;  %v3160_v61 = vpack.c.bf16 %v790_v60, %v789_v59  ;;  %v1403_v1 = vld [vmem:[%s3863_s24 + $0x8] sm:$0xff]  ;;  %v3164_v2 = vpack.c.bf16 %v1056_v63, %v1055_v62  ;;  %v1404_v3 = vld [vmem:[%s3863_s24 + $0x10] sm:$0xff]  ;;  %v1402_v4 = vld [vmem:[%s3863_s24] sm:$0xff] }
  0x28   : > { %2923 = vmatmul.mubr.msk.f32.gmra.mrb[4].mxu0 %vm421_vm0, %v383_v23  ;;  %2947 = vmatmul.mubr.msk.f32.gmra.mrb[4].mxu1 %vm421_vm0, %v399_v29  ;;  %v1405_v5 = vld [vmem:[%s3863_s24 + $0x18] sm:$0xff]  ;;  %v1411_v6 = vld [vmem:[%s3863_s24 + $0x48] sm:$0xff]  ;;  %v1406_v7 = vld [vmem:[%s3863_s24 + $0x20] sm:$0xff] }
  0x29   : > { %2925 = vmatprep.mubr.msk.f32.mxu0 %vm421_vm0, %v384_v25  ;;  %2949 = vmatprep.mubr.msk.f32.mxu1 %vm421_vm0, %v400_v31  ;;  %v1413_v8 = vld [vmem:[%s3863_s24 + $0x58] sm:$0xff]  ;;  %v1057_v9 = vld [vmem:[%s5506_s7 + $0x10] sm:$0xff]  ;;  %v1059_v12 = vld [vmem:[%s5506_s7 + $0x20] sm:$0xff] }
  0x2a   : > { %3143 = vmatpush3.bf16.msra.mxu1 %v3140_v26  ;;  %1438 = vperm.xlu1 %3241, %v1403_v1   ;;  %v1058_v10 = vld [vmem:[%s5506_s7 + $0x18] sm:$0xff]  ;;  %v1060_v13 = vld [vmem:[%s5506_s7 + $0x28] sm:$0xff]  ;;  %v1061_v17 = vld [vmem:[%s5506_s7 + $0x30] sm:$0xff] }
  0x2b   : > { %3145 = vmatprep.subr.bf16.mxu1 %v3144_v33  ;;  %3165 = vmatprep.subr.bf16.mxu0 %v3164_v2  ;;  %v3168_v11 = vpack.c.bf16 %v1058_v10, %v1057_v9  ;;  %v1407_v14 = vld [vmem:[%s3863_s24 + $0x28] sm:$0xff]  ;;  %v3172_v16 = vpack.c.bf16 %v1060_v13, %v1059_v12  ;;  %v1062_v18 = vld [vmem:[%s5506_s7 + $0x38] sm:$0xff]  ;;  %v1408_v19 = vld [vmem:[%s3863_s24 + $0x30] sm:$0xff] }
  0x2c   : > { %2926 = vmatmul.mubr.msk.f32.gmra.mrb[6].mxu0 %vm421_vm0, %v385_v30  ;;  %2950 = vmatmul.mubr.msk.f32.gmra.mrb[6].mxu1 %vm421_vm0, %v401_v36  ;;  %v1415_v15 = vld [vmem:[%s3863_s24 + $0x68] sm:$0xff]  ;;  %v1417_v20 = vld [vmem:[%s3863_s24 + $0x78] sm:$0xff]  ;;  %v3176_v21 = vpack.c.bf16 %v1062_v18, %v1061_v17  ;;  %v1063_v22 = vld [vmem:[%s5506_s7 + $0x40] sm:$0xff] }
  0x2d   : > { %2928 = vmatprep.mubr.msk.f32.mxu0 %vm421_vm0, %v386_v32  ;;  %2952 = vmatprep.mubr.msk.f32.mxu1 %vm421_vm0, %v402_v38  ;;  %v1064_v23 = vld [vmem:[%s5506_s7 + $0x48] sm:$0xff]  ;;  %v1409_v24 = vld [vmem:[%s3863_s24 + $0x38] sm:$0xff]  ;;  %v1410_v27 = vld [vmem:[%s3863_s24 + $0x40] sm:$0xff] }
  0x2e   : > { %3147 = vmatpush3.bf16.msra.mxu1 %v3144_v33  ;;  %3167 = vmatpush3.bf16.msra.mxu0 %v3164_v2  ;;  %v1419_v25 = vld [vmem:[%s3863_s24 + $0x88] sm:$0xff]  ;;  %v3180_v26 = vpack.c.bf16 %v1064_v23, %v1063_v22  ;;  %v1421_v28 = vld [vmem:[%s3863_s24 + $0x98] sm:$0xff]  ;;  %v1412_v29 = vld [vmem:[%s3863_s24 + $0x50] sm:$0xff] }
  0x2f   : > { %3149 = vmatprep.subr.bf16.mxu1 %v3148_v40  ;;  %1441 = vperm.xlu1 %3241, %v1404_v3   ;;  %v1423_v30 = vld [vmem:[%s3863_s24 + $0xa8] sm:$0xff]  ;;  %v1414_v31 = vld [vmem:[%s3863_s24 + $0x60] sm:$0xff]  ;;  %v1425_v32 = vld [vmem:[%s3863_s24 + $0xb8] sm:$0xff] }
  0x30   : > { %2929 = vmatmul.mubr.msk.f32.gmra.mrb[8].mxu0 %vm421_vm0, %v387_v37  ;;  %2953 = vmatmul.mubr.msk.f32.gmra.mrb[8].mxu1 %vm421_vm0, %v403_v41  ;;  %v1416_v33 = vld [vmem:[%s3863_s24 + $0x70] sm:$0xff]  ;;  %v1427_v34 = vld [vmem:[%s3863_s24 + $0xc8] sm:$0xff]  ;;  %v1418_v35 = vld [vmem:[%s3863_s24 + $0x80] sm:$0xff] }
  0x31   : > { %2931 = vmatprep.mubr.msk.f32.mxu0 %vm421_vm0, %v388_v39  ;;  %2955 = vmatprep.mubr.msk.f32.mxu1 %vm421_vm0, %v404_v43  ;;  %v1429_v36 = vld [vmem:[%s3863_s24 + $0xd8] sm:$0xff]  ;;  %v1420_v37 = vld [vmem:[%s3863_s24 + $0x90] sm:$0xff]  ;;  %v1431_v38 = vld [vmem:[%s3863_s24 + $0xe8] sm:$0xff] }
  0x32   : > { %3151 = vmatpush3.bf16.msra.mxu1 %v3148_v40  ;;  %1435 = vperm.xlu0 %3240, %v1402_v4   ;;  %v3923_v39 = vld [vmem:[%s5503_s4] ss:$0 sm:$0xff]  ;;  %v1433_v41 = vld [vmem:[%s3863_s24 + $0xf8] sm:$0xff]  ;;  %v1428_v63 = vld [vmem:[%s3863_s24 + $0xd0] sm:$0xff] }
  0x33   : > { %3153 = vmatprep.subr.bf16.mxu1 %v3152_v55  ;;  %1444 = vperm.xlu1 %3241, %v1405_v5   ;;  %v1422_v40 = vld [vmem:[%s3863_s24 + $0xa0] sm:$0xff]  ;;  %v1565_v56 = vld [vmem:[%s3933_s29 + $0x18] sm:$0xff]  ;;  %v1567_v0 = vld [vmem:[%s3933_s29 + $0x28] sm:$0xff] }
  0x34   : > { %2932 = vmatmul.mubr.msk.f32.gmra.mrb[10].mxu0 %vm421_vm0, %v389_v42  ;;  %2956 = vmatmul.mubr.msk.f32.gmra.mrb[10].mxu1 %vm421_vm0, %v405_v45  ;;  %v1430_v9 = vld [vmem:[%s3863_s24 + $0xe0] sm:$0xff]  ;;  %v1569_v10 = vld [vmem:[%s3933_s29 + $0x38] sm:$0xff] }
  0x35   : > { %2934 = vmatprep.mubr.msk.f32.mxu0 %vm421_vm0, %v390_v44  ;;  %2958 = vmatprep.mubr.msk.f32.mxu1 %vm421_vm0, %v406_v47  ;;  %v1424_v47 = vld [vmem:[%s3863_s24 + $0xb0] sm:$0xff] }
  0x36   : > { %3155 = vmatpush3.bf16.msra.mxu1 %v3152_v55  ;;  %1462 = vperm.xlu0 %3240, %v1411_v6   ;;  %v1426_v55 = vld [vmem:[%s3863_s24 + $0xc0] sm:$0xff] }
  0x37   : > { %3157 = vmatprep.subr.bf16.mxu1 %v3156_v58  ;;  %1447 = vperm.xlu1 %3241, %v1406_v7  }
  0x38   : > { %2935 = vmatmul.mubr.msk.f32.gmra.mrb[12].mxu0 %vm421_vm0, %v391_v46  ;;  %2959 = vmatmul.mubr.msk.f32.gmra.mrb[12].mxu1 %vm421_vm0, %v407_v49 }
  0x39   : > { %2937 = vmatprep.mubr.msk.f32.mxu0 %vm421_vm0, %v392_v48  ;;  %2961 = vmatprep.mubr.msk.f32.mxu1 %vm421_vm0, %v408_v51  ;;  %v1563_v48 = vld [vmem:[%s3933_s29 + $0x8] sm:$0xff] }
  0x3a   : > { %3159 = vmatpush3.bf16.msra.mxu1 %v3156_v58  ;;  %1468 = vperm.xlu0 %3240, %v1413_v8  }
  0x3b   : > { %3161 = vmatprep.subr.bf16.mxu1 %v3160_v61  ;;  %3169 = vmatprep.subr.bf16.mxu0 %v3168_v11 }
  0x3c   : > { %2938 = vmatmul.mubr.msk.f32.gmra.mrb[14].mxu0 %vm421_vm0, %v393_v50  ;;  %2962 = vmatmul.mubr.msk.f32.gmra.mrb[14].mxu1 %vm421_vm0, %v409_v52 }
  0x3d   : > { %3171 = vmatpush3.bf16.msra.mxu0 %v3168_v11  ;;  %1450 = vperm.xlu1 %3241, %v1407_v14  }
  0x3e   : > { %3163 = vmatpush3.bf16.msra.mxu1 %v3160_v61  ;;  %1474 = vperm.xlu0 %3240, %v1415_v15  }
  0x3f   : > { %3173 = vmatprep.subr.bf16.mxu0 %v3172_v16 }
  0x41   : > { %3175 = vmatpush3.bf16.msra.mxu0 %v3172_v16  ;;  %1453 = vperm.xlu1 %3241, %v1408_v19   ;;  %v1432_v19 = vld [vmem:[%s3863_s24 + $0xf0] sm:$0xff]  ;;  %s2627_s24 = scalar_lea.sflag [#allocation3], %s356_s17 }
  0x42   : > { %1480 = vperm.xlu0 %3240, %v1417_v20   ;;  %3177 = vmatprep.subr.bf16.mxu0 %v3176_v21 }
  0x45   : > { %3179 = vmatpush3.bf16.msra.mxu0 %v3176_v21  ;;  %1456 = vperm.xlu1 %3241, %v1409_v24  }
  0x46   : > { %1486 = vperm.xlu0 %3240, %v1419_v25   ;;  %3181 = vmatprep.subr.bf16.mxu0 %v3180_v26 }
  0x49   : > { %3183 = vmatpush3.bf16.msra.mxu0 %v3180_v26  ;;  %1459 = vperm.xlu1 %3241, %v1410_v27  }
  0x4a   : > { %1492 = vperm.xlu0 %3240, %v1421_v28   ;;  %v1562_v28 = vld [vmem:[%s3933_s29] sm:$0xff] }
  0x4d   : > { %1465 = vperm.xlu1 %3241, %v1412_v29  }
  0x4e   : > { %1498 = vperm.xlu0 %3240, %v1423_v30  }
  0x51   : > { %1471 = vperm.xlu1 %3241, %v1414_v31  }
  0x52   : > { %1504 = vperm.xlu0 %3240, %v1425_v32  }
  0x55   : > { %1477 = vperm.xlu1 %3241, %v1416_v33  }
  0x56   : > { %1510 = vperm.xlu0 %3240, %v1427_v34  }
  0x59   : > { %1483 = vperm.xlu1 %3241, %v1418_v35  }
  0x5a   : > { %1516 = vperm.xlu0 %3240, %v1429_v36  }
  0x5d   : > { %1489 = vperm.xlu1 %3241, %v1420_v37  }
  0x5e   : > { %1522 = vperm.xlu0 %3240, %v1431_v38   ;;  %v1564_v38 = vld [vmem:[%s3933_s29 + $0x10] sm:$0xff] }
  0x61   : > { %1495 = vperm.xlu1 %3241, %v1422_v40  }
  0x62   : > { %1528 = vperm.xlu0 %3240, %v1433_v41  }
  0x65   : > { %1501 = vperm.xlu1 %3241, %v1424_v47  }
  0x66   : > { %1600 = vperm.xlu0 %3240, %v1563_v48  }
  0x69   : > { %1507 = vperm.xlu1 %3241, %v1426_v55  }
  0x6a   : > { %1606 = vperm.xlu0 %3240, %v1565_v56  }
  0x6d   : > { %1513 = vperm.xlu1 %3241, %v1428_v63  }
  0x6e   : > { %1612 = vperm.xlu0 %3240, %v1567_v0  }
  0x71   : > { %1519 = vperm.xlu1 %3241, %v1430_v9  }
  0x72   : > { %1618 = vperm.xlu0 %3240, %v1569_v10  }
  0x75   : > { %1525 = vperm.xlu1 %3241, %v1432_v19  }
  0x79   : > { %1597 = vperm.xlu1 %3241, %v1562_v28  }
  0x7d   : > { %1603 = vperm.xlu1 %3241, %v1564_v38   ;;  %v1069_v38 = vld [vmem:[%s5506_s7 + $0x70] sm:$0xff] }
  0xf3   : > { %v2918_v42 = vpop.f32.mrb[0].mxu0  ;;  %v3935_v46 = vpop.f32.mrb[0].mxu1 }
  0xf4   : > { %v590_v43 = vadd.f32 %v2918_v42, %v3923_v39  ;;  %v584_v44 = vpop.f32.mrb[1].mxu0  ;;  %v3939_v50 = vpop.f32.mrb[1].mxu1  ;;  %v670_v48 = vadd.f32 %v3935_v46, %v3923_v39 }
  0xf5   : > { %v585_v45 = vadd.f32 %v3923_v39, %v584_v44  ;;  %v665_v36 = vadd.f32 %v3923_v39, %v3939_v50  ;;  %v1566_v50 = vld [vmem:[%s3933_s29 + $0x20] sm:$0xff] }
  0xf6   : > { %1609 = vperm.xlu1 %3241, %v1566_v50   ;;  %v1581_v50 = vld [vmem:[%s3933_s29 + $0x98] sm:$0xff] }
  0xf7   : > { %3242 = vtanh.f32 %v585_v45  ;;  %v2921_v49 = vpop.f32.mrb[2].mxu0  ;;  %v3943_v54 = vpop.f32.mrb[2].mxu1 }
  0xf8   : > { %3244 = vtanh.f32 %v590_v43  ;;  %v600_v51 = vadd.f32 %v2921_v49, %v3923_v39  ;;  %v594_v52 = vpop.f32.mrb[3].mxu0  ;;  %v3947_v58 = vpop.f32.mrb[3].mxu1  ;;  %v680_v56 = vadd.f32 %v3943_v54, %v3923_v39 }
  0xf9   : > { %v595_v53 = vadd.f32 %v3923_v39, %v594_v52 }
  0xfa   : > { %3246 = vtanh.f32 %v600_v51  ;;  %v675_v51 = vadd.f32 %v3923_v39, %v3947_v58 }
  0xfb   : > { %3248 = vtanh.f32 %v595_v53  ;;  %v2924_v57 = vpop.f32.mrb[4].mxu0  ;;  %v3951_v62 = vpop.f32.mrb[4].mxu1 }
  0xfc   : > { %v610_v59 = vadd.f32 %v2924_v57, %v3923_v39  ;;  %v604_v60 = vpop.f32.mrb[5].mxu0  ;;  %v3955_v2 = vpop.f32.mrb[5].mxu1  ;;  %v1568_v57 = vld [vmem:[%s3933_s29 + $0x30] sm:$0xff]  ;;  %v690_v58 = vadd.f32 %v3951_v62, %v3923_v39 }
  0xfd   : > { %v605_v61 = vadd.f32 %v3923_v39, %v604_v60  ;;  %v685_v46 = vadd.f32 %v3923_v39, %v3955_v2  ;;  %1615 = vperm.xlu1 %3241, %v1568_v57   ;;  %v1591_v57 = vld [vmem:[%s3933_s29 + $0xe8] sm:$0xff] }
  0xfe   : > { %3250 = vtanh.f32 %v610_v59 }
  0xff   : > { %3252 = vtanh.f32 %v605_v61  ;;  %v2927_v1 = vpop.f32.mrb[6].mxu0  ;;  %v3959_v8 = vpop.f32.mrb[6].mxu1  ;;  %v1570_v61 = vld [vmem:[%s3933_s29 + $0x40] sm:$0xff] }
 0x100   : > { %v620_v3 = vadd.f32 %v2927_v1, %v3923_v39  ;;  %v614_v4 = vpop.f32.mrb[7].mxu0  ;;  %v3963_v12 = vpop.f32.mrb[7].mxu1  ;;  %v700_v2 = vadd.f32 %v3959_v8, %v3923_v39 }
 0x101   : > { %v3243_v5 = vpop.eup %3242  ;;  %v615_v6 = vadd.f32 %v3923_v39, %v614_v4  ;;  %v695_v54 = vadd.f32 %v3923_v39, %v3963_v12  ;;  %1621 = vperm.xlu1 %3241, %v1570_v61   ;;  %v1576_v12 = vld [vmem:[%s3933_s29 + $0x70] sm:$0xff] }
 0x102   : > { %v3245_v7 = vpop.eup %3244  ;;  %3254 = vtanh.f32 %v620_v3  ;;  %2996 = vmatprep.mubr.f32.mxu1 %v3243_v5  ;;  %v1572_v3 = vld [vmem:[%s3933_s29 + $0x50] sm:$0xff] }
 0x103   : > { %3256 = vtanh.f32 %v615_v6  ;;  %v2930_v11 = vpop.f32.mrb[8].mxu0  ;;  %2997 = vmatmul.mubr.f32.vlgmr.msra.gmra.mrb[16].mxu1 %v3245_v7  ;;  %v3967_v18 = vpop.f32.mrb[8].mxu1  ;;  %v1574_v7 = vld [vmem:[%s3933_s29 + $0x60] sm:$0xff] }
 0x104   : > { %v3247_v13 = vpop.eup %3246  ;;  %v630_v14 = vadd.f32 %v2930_v11, %v3923_v39  ;;  %v624_v15 = vpop.f32.mrb[9].mxu0  ;;  %v710_v6 = vadd.f32 %v3967_v18, %v3923_v39 }
 0x105   : > { %v3249_v16 = vpop.eup %3248  ;;  %v625_v17 = vadd.f32 %v3923_v39, %v624_v15  ;;  %v3970_v21 = vpop.f32.mrb[9].mxu1  ;;  %1627 = vperm.xlu1 %3241, %v1572_v3  }
 0x106   : > { %3258 = vtanh.f32 %v630_v14  ;;  %2999 = vmatprep.mubr.f32.mxu1 %v3249_v16  ;;  %v705_v62 = vadd.f32 %v3923_v39, %v3970_v21 }
 0x107   : > { %3260 = vtanh.f32 %v625_v17  ;;  %v2933_v20 = vpop.f32.mrb[10].mxu0  ;;  %3000 = vmatmul.mubr.f32.gmra.mrb[18].mxu1 %v3247_v13  ;;  %v3974_v27 = vpop.f32.mrb[10].mxu1  ;;  %v1578_v17 = vld [vmem:[%s3933_s29 + $0x80] sm:$0xff] }
 0x108   : > { %v3251_v22 = vpop.eup %3250  ;;  %v640_v23 = vadd.f32 %v2933_v20, %v3923_v39  ;;  %v634_v24 = vpop.f32.mrb[11].mxu0  ;;  %v720_v11 = vadd.f32 %v3974_v27, %v3923_v39 }
 0x109   : > { %v3253_v25 = vpop.eup %3252  ;;  %v635_v26 = vadd.f32 %v3923_v39, %v634_v24  ;;  %v3977_v30 = vpop.f32.mrb[11].mxu1  ;;  %1633 = vperm.xlu1 %3241, %v1574_v7  }
 0x10a   : > { %3262 = vtanh.f32 %v640_v23  ;;  %3002 = vmatprep.mubr.f32.mxu1 %v3253_v25  ;;  %v715_v8 = vadd.f32 %v3923_v39, %v3977_v30 }
 0x10b   : > { %3264 = vtanh.f32 %v635_v26  ;;  %v2936_v29 = vpop.f32.mrb[12].mxu0  ;;  %3003 = vmatmul.mubr.f32.gmra.mrb[20].mxu1 %v3251_v22  ;;  %v3983_v37 = vpop.f32.mrb[12].mxu1 }
 0x10c   : > { %v3255_v31 = vpop.eup %3254  ;;  %v650_v32 = vadd.f32 %v2936_v29, %v3923_v39  ;;  %v644_v33 = vpop.f32.mrb[13].mxu0  ;;  %v730_v16 = vadd.f32 %v3983_v37, %v3923_v39  ;;  %v1066_v29 = vld [vmem:[%s5506_s7 + $0x58] sm:$0xff] }
 0x10d   : > { %v3257_v34 = vpop.eup %3256  ;;  %v645_v35 = vadd.f32 %v3923_v39, %v644_v33  ;;  %v3986_v41 = vpop.f32.mrb[13].mxu1  ;;  %1639 = vperm.xlu1 %3241, %v1576_v12   ;;  %v1067_v33 = vld [vmem:[%s5506_s7 + $0x60] sm:$0xff]  ;;  %v1573_v37 = vld [vmem:[%s3933_s29 + $0x58] sm:$0xff] }
 0x10e   : > { %3266 = vtanh.f32 %v650_v32  ;;  %3005 = vmatprep.mubr.f32.mxu1 %v3257_v34  ;;  %v725_v13 = vadd.f32 %v3923_v39, %v3986_v41  ;;  %v1571_v32 = vld [vmem:[%s3933_s29 + $0x48] sm:$0xff] }
 0x10f   : > { %3268 = vtanh.f32 %v645_v35  ;;  %v2939_v40 = vpop.f32.mrb[14].mxu0  ;;  %3006 = vmatmul.mubr.f32.gmra.mrb[22].mxu1 %v3255_v31  ;;  %v3992_v49 = vpop.f32.mrb[14].mxu1  ;;  %v1580_v31 = vld [vmem:[%s3933_s29 + $0x90] sm:$0xff]  ;;  %1624 = vperm.xlu0 %3240, %v1571_v32   ;;  %v1068_v34 = vld [vmem:[%s5506_s7 + $0x68] sm:$0xff] }
 0x110   : > { %v3259_v42 = vpop.eup %3258  ;;  %v660_v43 = vadd.f32 %v2939_v40, %v3923_v39  ;;  %v654_v44 = vpop.f32.mrb[15].mxu0  ;;  %3270 = vtanh.f32 %v665_v36  ;;  %v740_v21 = vadd.f32 %v3992_v49, %v3923_v39  ;;  %v3188_v35 = vpack.c.bf16 %v1068_v34, %v1067_v33  ;;  %v1582_v36 = vld [vmem:[%s3933_s29 + $0xa0] sm:$0xff]  ;;  %v1070_v40 = vld [vmem:[%s5506_s7 + $0x78] sm:$0xff] }
 0x111   : > { %v3261_v45 = vpop.eup %3260  ;;  %v655_v47 = vadd.f32 %v3923_v39, %v654_v44  ;;  %v734_v52 = vpop.f32.mrb[15].mxu1  ;;  %1645 = vperm.xlu1 %3241, %v1578_v17   ;;  %v3192_v41 = vpack.c.bf16 %v1070_v40, %v1069_v38  ;;  %v1586_v44 = vld [vmem:[%s3933_s29 + $0xc0] sm:$0xff] }
 0x112   : > { %3272 = vtanh.f32 %v660_v43  ;;  %3008 = vmatprep.mubr.f32.mxu1 %v3261_v45  ;;  %v735_v18 = vadd.f32 %v3923_v39, %v734_v52  ;;  %v1065_v39 = vld [vmem:[%s5506_s7 + $0x50] sm:$0xff]  ;;  %v1575_v43 = vld [vmem:[%s3933_s29 + $0x68] sm:$0xff]  ;;  %v1577_v45 = vld [vmem:[%s3933_s29 + $0x78] sm:$0xff] }
 0x113   : > { %3274 = vtanh.f32 %v655_v47  ;;  %3009 = vmatmul.mubr.f32.gmra.mrb[24].mxu1 %v3259_v42  ;;  %v3184_v30 = vpack.c.bf16 %v1066_v29, %v1065_v39  ;;  %1630 = vperm.xlu0 %3240, %v1573_v37   ;;  %v1584_v42 = vld [vmem:[%s3933_s29 + $0xb0] sm:$0xff]  ;;  %v1590_v49 = vld [vmem:[%s3933_s29 + $0xe0] sm:$0xff]  ;;  %v1583_v52 = vld [vmem:[%s3933_s29 + $0xa8] sm:$0xff] }
 0x114   : > { %v3263_v53 = vpop.eup %3262  ;;  %3276 = vtanh.f32 %v670_v48  ;;  %v1588_v47 = vld [vmem:[%s3933_s29 + $0xd0] sm:$0xff]  ;;  %v1579_v48 = vld [vmem:[%s3933_s29 + $0x88] sm:$0xff] }
 0x115   : > { %v3265_v55 = vpop.eup %3264  ;;  %3278 = vtanh.f32 %v675_v51  ;;  %3185 = vmatprep.subr.bf16.mxu0 %v3184_v30  ;;  %1651 = vperm.xlu1 %3241, %v1580_v31   ;;  %v1592_v51 = vld [vmem:[%s3933_s29 + $0xf0] sm:$0xff] }
 0x116   : > { %3011 = vmatprep.mubr.f32.mxu1 %v3265_v55  ;;  %3280 = vtanh.f32 %v680_v56  ;;  %3187 = vmatpush3.bf16.msra.mxu0 %v3184_v30  ;;  %v1587_v55 = vld [vmem:[%s3933_s29 + $0xc8] sm:$0xff]  ;;  %v1589_v56 = vld [vmem:[%s3933_s29 + $0xd8] sm:$0xff] }
 0x117   : > { %3012 = vmatmul.mubr.f32.gmra.mrb[26].mxu1 %v3263_v53  ;;  %3282 = vtanh.f32 %v685_v46  ;;  %3189 = vmatprep.subr.bf16.mxu0 %v3188_v35  ;;  %v1585_v53 = vld [vmem:[%s3933_s29 + $0xb8] sm:$0xff] }
 0x118   : > { %v3267_v59 = vpop.eup %3266  ;;  %3284 = vtanh.f32 %v690_v58  ;;  %1636 = vperm.xlu0 %3240, %v1575_v43   ;;  %v1593_v46 = vld [vmem:[%s3933_s29 + $0xf8] sm:$0xff]  ;;  %s3627_s29 = smov [#allocation2]  }
 0x119   : > { %v3269_v60 = vpop.eup %3268  ;;  %3286 = vtanh.f32 %v695_v54  ;;  %1657 = vperm.xlu1 %3241, %v1582_v36   ;;  %s3566_s13 = sshll.u32 %s3627_s29, 4  ;;  %s3567_s13 = int_to_ptr.vmem [resolvable:$false] %s3566_s13 }
 0x11a   : > { %3014 = vmatprep.mubr.f32.mxu1 %v3269_v60  ;;  %v3271_v63 = vpop.eup %3270  ;;  %3288 = vtanh.f32 %v700_v2  ;;  %3191 = vmatpush3.bf16.msra.mxu0 %v3188_v35  ;;  %s3568_s16 = scalar_lea.vmem %s3567_s13, 512  ;;  %p3569_p0 = scmp.lt.s32.totalorder %s5454_s26, %s3567_s13 }
 0x11b   : > { %3015 = vmatmul.mubr.f32.gmra.mrb[28].mxu1 %v3267_v59  ;;  %3290 = vtanh.f32 %v705_v62  ;;  %3193 = vmatprep.subr.bf16.mxu0 %v3192_v41  ;;  %v4068_v59 = vld [vmem:[%s5505_s6] ss:$0 sm:$0xff]  ;;  %p3570_p1 = scmp.lt.s32.totalorder %s3568_s16, %s3562_s14 }
 0x11c   : > { %v3273_v0 = vpop.eup %3272  ;;  %3292 = vtanh.f32 %v710_v6  ;;  %1642 = vperm.xlu0 %3240, %v1577_v45  }
 0x11d   : > { %v3275_v1 = vpop.eup %3274  ;;  %3294 = vtanh.f32 %v715_v8  ;;  %1663 = vperm.xlu1 %3241, %v1584_v42   ;;  %p3571_p2 = por %p3570_p1, %p3569_p0 }
 0x11e   : > { %3017 = vmatprep.mubr.f32.mxu1 %v3275_v1  ;;  %v3277_v4 = vpop.eup %3276  ;;  %3296 = vtanh.f32 %v720_v11  ;;  %3195 = vmatpush3.bf16.msra.mxu0 %v3192_v41 }
 0x11f   : > { %3018 = vmatmul.mubr.f32.gmra.mrb[30].mxu1 %v3273_v0  ;;  %v3279_v5 = vpop.eup %3278  ;;  %3298 = vtanh.f32 %v725_v13  ;;  %p3572_p3 = pnand %p3571_p2, %p3565_p13 }
 0x120   : > { %3020 = vmatprep.mubr.f32.mxu1 %v3271_v63  ;;  %v3281_v9 = vpop.eup %3280  ;;  %3300 = vtanh.f32 %v730_v16  ;;  %1648 = vperm.xlu0 %3240, %v1579_v48  }
 0x121   : > { %v3283_v10 = vpop.eup %3282  ;;  %3302 = vtanh.f32 %v735_v18  ;;  %1669 = vperm.xlu1 %3241, %v1586_v44  }
 0x122   : > { %v3285_v14 = vpop.eup %3284  ;;  %3304 = vtanh.f32 %v740_v21 }
 0x123   : > { %3021 = vmatmul.mubr.f32.gmra.mrb[32].mxu1 %v3277_v4  ;;  %v3287_v15 = vpop.eup %3286 }
 0x124   : > { %3023 = vmatprep.mubr.f32.mxu1 %v3279_v5  ;;  %v3289_v19 = vpop.eup %3288  ;;  %1654 = vperm.xlu0 %3240, %v1581_v50  }
 0x125   : > { %v3291_v20 = vpop.eup %3290  ;;  %1675 = vperm.xlu1 %3241, %v1588_v47  }
 0x126   : > { %v3293_v22 = vpop.eup %3292 }
 0x127   : > { %3024 = vmatmul.mubr.f32.gmra.mrb[34].mxu1 %v3281_v9  ;;  %v3295_v23 = vpop.eup %3294 }
 0x128   : > { %3026 = vmatprep.mubr.f32.mxu1 %v3283_v10  ;;  %v3297_v24 = vpop.eup %3296  ;;  %1660 = vperm.xlu0 %3240, %v1583_v52  }
 0x129   : > { %v3299_v25 = vpop.eup %3298  ;;  %1681 = vperm.xlu1 %3241, %v1590_v49  }
 0x12a   : > { %v3301_v26 = vpop.eup %3300 }
 0x12b   : > { %3027 = vmatmul.mubr.f32.gmra.mrb[36].mxu1 %v3285_v14  ;;  %v3303_v27 = vpop.eup %3302 }
 0x12c   : > { %3029 = vmatprep.mubr.f32.mxu1 %v3287_v15  ;;  %v3305_v28 = vpop.eup %3304  ;;  %1666 = vperm.xlu0 %3240, %v1585_v53  }
 0x12d   : > { %1687 = vperm.xlu1 %3241, %v1592_v51  }
 0x12f   : > { %3030 = vmatmul.mubr.f32.gmra.mrb[38].mxu1 %v3289_v19 }
 0x130   : > { %3032 = vmatprep.mubr.f32.mxu1 %v3291_v20  ;;  %1672 = vperm.xlu0 %3240, %v1587_v55  }
 0x133   : > { %3033 = vmatmul.mubr.f32.gmra.mrb[40].mxu1 %v3293_v22 }
 0x134   : > { %3035 = vmatprep.mubr.f32.mxu1 %v3295_v23  ;;  %1678 = vperm.xlu0 %3240, %v1589_v56  }
 0x137   : > { %3036 = vmatmul.mubr.f32.gmra.mrb[42].mxu1 %v3297_v24 }
 0x138   : > { %3038 = vmatprep.mubr.f32.mxu1 %v3299_v25  ;;  %1684 = vperm.xlu0 %3240, %v1591_v57  }
 0x13b   : > { %3039 = vmatmul.mubr.f32.gmra.mrb[44].mxu1 %v3301_v26 }
 0x13c   : > { %3041 = vmatprep.mubr.f32.mxu1 %v3303_v27  ;;  %1690 = vperm.xlu0 %3240, %v1593_v46  }
 0x13f   : > { %3042 = vmatmul.mubr.f32.gmra.mrb[46].mxu1 %v3305_v28 }
 0x1d6   : > { %v2998_v60 = vpop.f32.mrb[16].mxu1 }
 0x1d7   : > { %v870_v58 = vadd.f32 %v2998_v60, %v4068_v59  ;;  %v864_v61 = vpop.f32.mrb[17].mxu1 }
 0x1d8   : > { %v865_v63 = vadd.f32 %v4068_v59, %v864_v61 }
 0x1da   : > { %3306 = vtanh.f32 %v865_v63  ;;  %v3001_v54 = vpop.f32.mrb[18].mxu1 }
 0x1db   : > { %3308 = vtanh.f32 %v870_v58  ;;  %v880_v0 = vadd.f32 %v3001_v54, %v4068_v59  ;;  %v874_v1 = vpop.f32.mrb[19].mxu1 }
 0x1dc   : > { %v875_v2 = vadd.f32 %v4068_v59, %v874_v1 }
 0x1dd   : > { %3310 = vtanh.f32 %v880_v0 }
 0x1de   : > { %3312 = vtanh.f32 %v875_v2  ;;  %v3004_v3 = vpop.f32.mrb[20].mxu1 }
 0x1df   : > { %v890_v62 = vadd.f32 %v3004_v3, %v4068_v59  ;;  %v884_v4 = vpop.f32.mrb[21].mxu1 }
 0x1e0   : > { %v885_v5 = vadd.f32 %v4068_v59, %v884_v4 }
 0x1e1   : > { %3314 = vtanh.f32 %v890_v62 }
 0x1e2   : > { %3316 = vtanh.f32 %v885_v5  ;;  %v3007_v6 = vpop.f32.mrb[22].mxu1 }
 0x1e3   : > { %v900_v7 = vadd.f32 %v3007_v6, %v4068_v59  ;;  %v894_v8 = vpop.f32.mrb[23].mxu1 }
 0x1e4   : > { %v3307_v9 = vpop.eup %3306  ;;  %v895_v10 = vadd.f32 %v4068_v59, %v894_v8 }
 0x1e5   : > { %v3309_v11 = vpop.eup %3308  ;;  %3318 = vtanh.f32 %v900_v7  ;;  %3076 = vmatprep.mubr.f32.mxu0 %v3307_v9 }
 0x1e6   : > { %3320 = vtanh.f32 %v895_v10  ;;  %v3010_v12 = vpop.f32.mrb[24].mxu1  ;;  %3077 = vmatmul.mubr.f32.vlgmr.msra.gmra.mrb[16].mxu0 %v3309_v11 }
 0x1e7   : > { %v3311_v13 = vpop.eup %3310  ;;  %v910_v14 = vadd.f32 %v3010_v12, %v4068_v59  ;;  %v904_v15 = vpop.f32.mrb[25].mxu1 }
 0x1e8   : > { %v3313_v16 = vpop.eup %3312  ;;  %v905_v17 = vadd.f32 %v4068_v59, %v904_v15 }
 0x1e9   : > { %3322 = vtanh.f32 %v910_v14  ;;  %3079 = vmatprep.mubr.f32.mxu0 %v3313_v16 }
 0x1ea   : > { %3324 = vtanh.f32 %v905_v17  ;;  %v3013_v18 = vpop.f32.mrb[26].mxu1  ;;  %3080 = vmatmul.mubr.f32.gmra.mrb[18].mxu0 %v3311_v13 }
 0x1eb   : > { %v3315_v19 = vpop.eup %3314  ;;  %v920_v20 = vadd.f32 %v3013_v18, %v4068_v59  ;;  %v914_v21 = vpop.f32.mrb[27].mxu1 }
 0x1ec   : > { %v3317_v22 = vpop.eup %3316  ;;  %v915_v23 = vadd.f32 %v4068_v59, %v914_v21 }
 0x1ed   : > { %3326 = vtanh.f32 %v920_v20  ;;  %3082 = vmatprep.mubr.f32.mxu0 %v3317_v22 }
 0x1ee   : > { %3328 = vtanh.f32 %v915_v23  ;;  %v3016_v24 = vpop.f32.mrb[28].mxu1  ;;  %3083 = vmatmul.mubr.f32.gmra.mrb[20].mxu0 %v3315_v19  ;;  %v4102_v23 = vpop.permute.xlu1 %1438 }
 0x1ef   : > { %v3319_v25 = vpop.eup %3318  ;;  %v930_v26 = vadd.f32 %v3016_v24, %v4068_v59  ;;  %v924_v27 = vpop.f32.mrb[29].mxu1 }
 0x1f0   : > { %v3321_v28 = vpop.eup %3320  ;;  %v925_v39 = vadd.f32 %v4068_v59, %v924_v27 }
 0x1f1   : > { %3330 = vtanh.f32 %v930_v26  ;;  %3085 = vmatprep.mubr.f32.mxu0 %v3321_v28 }
 0x1f2   : > { %3332 = vtanh.f32 %v925_v39  ;;  %v3019_v29 = vpop.f32.mrb[30].mxu1  ;;  %3086 = vmatmul.mubr.f32.gmra.mrb[22].mxu0 %v3319_v25  ;;  %v4104_v26 = vpop.permute.xlu1 %1441 }
 0x1f3   : > { %v3323_v30 = vpop.eup %3322  ;;  %v940_v31 = vadd.f32 %v3019_v29, %v4068_v59  ;;  %v934_v32 = vpop.f32.mrb[31].mxu1 }
 0x1f4   : > { %v3325_v33 = vpop.eup %3324  ;;  %v935_v34 = vadd.f32 %v4068_v59, %v934_v32  ;;  %v4116_v32 = vpop.permute.xlu0 %1435 }
 0x1f5   : > { %3334 = vtanh.f32 %v940_v31  ;;  %3088 = vmatprep.mubr.f32.mxu0 %v3325_v33 }
 0x1f6   : > { %3336 = vtanh.f32 %v935_v34  ;;  %v3022_v35 = vpop.f32.mrb[32].mxu1  ;;  %3089 = vmatmul.mubr.f32.gmra.mrb[24].mxu0 %v3323_v30 }
 0x1f7   : > { %v3327_v36 = vpop.eup %3326  ;;  %v950_v37 = vadd.f32 %v3022_v35, %v4068_v59  ;;  %v944_v38 = vpop.f32.mrb[33].mxu1 }
 0x1f8   : > { %v3329_v40 = vpop.eup %3328  ;;  %v945_v41 = vadd.f32 %v4068_v59, %v944_v38  ;;  %v4120_v34 = vpop.permute.xlu0 %1462 }
 0x1f9   : > { %3338 = vtanh.f32 %v950_v37  ;;  %3091 = vmatprep.mubr.f32.mxu0 %v3329_v40  ;;  %5515 = vst [vmem:[#allocation6_spill] sm:$0xff] %v4120_v34 }
 0x1fa   : > { %3340 = vtanh.f32 %v945_v41  ;;  %v3025_v42 = vpop.f32.mrb[34].mxu1  ;;  %3092 = vmatmul.mubr.f32.gmra.mrb[26].mxu0 %v3327_v36 }
 0x1fb   : > { %v3331_v43 = vpop.eup %3330  ;;  %v960_v44 = vadd.f32 %v3025_v42, %v4068_v59  ;;  %v954_v45 = vpop.f32.mrb[35].mxu1 }
 0x1fc   : > { %v3333_v47 = vpop.eup %3332  ;;  %v955_v48 = vadd.f32 %v4068_v59, %v954_v45  ;;  %v4124_v36 = vpop.permute.xlu0 %1468 }
 0x1fd   : > { %3342 = vtanh.f32 %v960_v44  ;;  %3094 = vmatprep.mubr.f32.mxu0 %v3333_v47  ;;  %5517 = vst [vmem:[#allocation8_spill] sm:$0xff] %v4124_v36 }
 0x1fe   : > { %3344 = vtanh.f32 %v955_v48  ;;  %v3028_v49 = vpop.f32.mrb[36].mxu1  ;;  %3095 = vmatmul.mubr.f32.gmra.mrb[28].mxu0 %v3331_v43 }
 0x1ff   : > { %v3335_v50 = vpop.eup %3334  ;;  %v970_v51 = vadd.f32 %v3028_v49, %v4068_v59  ;;  %v964_v52 = vpop.f32.mrb[37].mxu1 }
 0x200   : > { %v3337_v53 = vpop.eup %3336  ;;  %v965_v55 = vadd.f32 %v4068_v59, %v964_v52  ;;  %v4128_v38 = vpop.permute.xlu0 %1474 }
 0x201   : > { %3346 = vtanh.f32 %v970_v51  ;;  %3097 = vmatprep.mubr.f32.mxu0 %v3337_v53  ;;  %5519 = vst [vmem:[#allocation10_spill] sm:$0xff] %v4128_v38 }
 0x202   : > { %3348 = vtanh.f32 %v965_v55  ;;  %v3031_v56 = vpop.f32.mrb[38].mxu1  ;;  %3098 = vmatmul.mubr.f32.gmra.mrb[30].mxu0 %v3335_v50 }
 0x203   : > { %v3339_v57 = vpop.eup %3338  ;;  %v980_v46 = vadd.f32 %v3031_v56, %v4068_v59  ;;  %v974_v60 = vpop.f32.mrb[39].mxu1 }
 0x204   : > { %v3341_v58 = vpop.eup %3340  ;;  %v975_v61 = vadd.f32 %v4068_v59, %v974_v60  ;;  %v4132_v41 = vpop.permute.xlu0 %1480 }
 0x205   : > { %3350 = vtanh.f32 %v980_v46  ;;  %3100 = vmatprep.mubr.f32.mxu0 %v3341_v58  ;;  %5521 = vst [vmem:[#allocation12_spill] sm:$0xff] %v4132_v41 }
 0x206   : > { %3352 = vtanh.f32 %v975_v61  ;;  %v3034_v63 = vpop.f32.mrb[40].mxu1  ;;  %3101 = vmatmul.mubr.f32.gmra.mrb[32].mxu0 %v3339_v57 }
 0x207   : > { %v3343_v54 = vpop.eup %3342  ;;  %v990_v0 = vadd.f32 %v3034_v63, %v4068_v59  ;;  %v984_v1 = vpop.f32.mrb[41].mxu1 }
 0x208   : > { %v3345_v2 = vpop.eup %3344  ;;  %v985_v3 = vadd.f32 %v4068_v59, %v984_v1  ;;  %v4136_v43 = vpop.permute.xlu0 %1486 }
 0x209   : > { %3354 = vtanh.f32 %v990_v0  ;;  %3103 = vmatprep.mubr.f32.mxu0 %v3345_v2  ;;  %5523 = vst [vmem:[#allocation14_spill] sm:$0xff] %v4136_v43 }
 0x20a   : > { %3356 = vtanh.f32 %v985_v3  ;;  %v3037_v62 = vpop.f32.mrb[42].mxu1  ;;  %3104 = vmatmul.mubr.f32.gmra.mrb[34].mxu0 %v3343_v54 }
 0x20b   : > { %v3347_v4 = vpop.eup %3346  ;;  %v1000_v5 = vadd.f32 %v3037_v62, %v4068_v59  ;;  %v994_v6 = vpop.f32.mrb[43].mxu1 }
 0x20c   : > { %v3349_v7 = vpop.eup %3348  ;;  %v995_v8 = vadd.f32 %v4068_v59, %v994_v6  ;;  %v4140_v45 = vpop.permute.xlu0 %1492 }
 0x20d   : > { %3358 = vtanh.f32 %v1000_v5  ;;  %3106 = vmatprep.mubr.f32.mxu0 %v3349_v7  ;;  %5525 = vst [vmem:[#allocation16_spill] sm:$0xff] %v4140_v45 }
 0x20e   : > { %3360 = vtanh.f32 %v995_v8  ;;  %v3040_v9 = vpop.f32.mrb[44].mxu1  ;;  %3107 = vmatmul.mubr.f32.gmra.mrb[36].mxu0 %v3347_v4  ;;  %v1303_v4 = vlaneseq }
 0x20f   : > { %v3351_v10 = vpop.eup %3350  ;;  %v1010_v11 = vadd.f32 %v3040_v9, %v4068_v59  ;;  %v1004_v12 = vpop.f32.mrb[45].mxu1 }
 0x210   : > { %v3353_v13 = vpop.eup %3352  ;;  %v1005_v14 = vadd.f32 %v4068_v59, %v1004_v12  ;;  %v4144_v48 = vpop.permute.xlu0 %1498  ;;  %v4178_v6 = vand.u32 127, %v1303_v4 }
 0x211   : > { %3362 = vtanh.f32 %v1010_v11  ;;  %3109 = vmatprep.mubr.f32.mxu0 %v3353_v13  ;;  %5527 = vst [vmem:[#allocation18_spill] sm:$0xff] %v4144_v48 }
 0x212   : > { %3364 = vtanh.f32 %v1005_v14  ;;  %v3043_v15 = vpop.f32.mrb[46].mxu1  ;;  %3110 = vmatmul.mubr.f32.gmra.mrb[38].mxu0 %v3351_v10  ;;  %vm1594_vm1 = vcmp.lt.s32.totalorder %v4178_v6, 31  ;;  %vm1305_vm2 = vcmp.eq.s32.totalorder %v4178_v6, 8  ;;  %vm1788_vm4 = vcmp.lt.s32.totalorder %v4178_v6, 8 }
 0x213   : > { %v3355_v16 = vpop.eup %3354  ;;  %v1020_v17 = vadd.f32 %v3043_v15, %v4068_v59  ;;  %v1014_v18 = vpop.f32.mrb[47].mxu1  ;;  %v4186_v9 = vsel %vm1594_vm1, %v4178_v6, 31 }
 0x214   : > { %v3357_v19 = vpop.eup %3356  ;;  %v1015_v20 = vadd.f32 %v4068_v59, %v1014_v18  ;;  %v4106_v59 = vpop.permute.xlu1 %1444 }
 0x215   : > { %3366 = vtanh.f32 %v1020_v17  ;;  %3112 = vmatprep.mubr.f32.mxu0 %v3357_v19  ;;  %v4148_v50 = vpop.permute.xlu0 %1504 }
 0x216   : > { %3368 = vtanh.f32 %v1015_v20  ;;  %3113 = vmatmul.mubr.f32.gmra.mrb[40].mxu0 %v3355_v16  ;;  %5529 = vst [vmem:[#allocation20_spill] sm:$0xff] %v4148_v50  ;;  %v4199_v16 = vld [vmem:[%s5507_s8] ss:$0 sm:$0xff] }
 0x217   : > { %v3359_v21 = vpop.eup %3358 }
 0x218   : > { %v3361_v22 = vpop.eup %3360  ;;  %v4108_v39 = vpop.permute.xlu1 %1447 }
 0x219   : > { %3115 = vmatprep.mubr.f32.mxu0 %v3361_v22  ;;  %v4152_v52 = vpop.permute.xlu0 %1510 }
 0x21a   : > { %3116 = vmatmul.mubr.f32.gmra.mrb[42].mxu0 %v3359_v21  ;;  %5531 = vst [vmem:[#allocation22_spill] sm:$0xff] %v4152_v52 }
 0x21b   : > { %v3363_v24 = vpop.eup %3362 }
 0x21c   : > { %v3365_v25 = vpop.eup %3364  ;;  %v4110_v29 = vpop.permute.xlu1 %1450 }
 0x21d   : > { %3118 = vmatprep.mubr.f32.mxu0 %v3365_v25  ;;  %v4156_v55 = vpop.permute.xlu0 %1516 }
 0x21e   : > { %3119 = vmatmul.mubr.f32.gmra.mrb[44].mxu0 %v3363_v24  ;;  %5533 = vst [vmem:[#allocation24_spill] sm:$0xff] %v4156_v55 }
 0x21f   : > { %v3367_v27 = vpop.eup %3366 }
 0x220   : > { %v3369_v28 = vpop.eup %3368  ;;  %v4112_v30 = vpop.permute.xlu1 %1453 }
 0x221   : > { %3121 = vmatprep.mubr.f32.mxu0 %v3369_v28  ;;  %v4160_v57 = vpop.permute.xlu0 %1522 }
 0x222   : > { %3122 = vmatmul.mubr.f32.gmra.mrb[46].mxu0 %v3367_v27  ;;  %5535 = vst [vmem:[#allocation26_spill] sm:$0xff] %v4160_v57 }
 0x224   : > { %v4114_v31 = vpop.permute.xlu1 %1456 }
 0x225   : > { %v4164_v60 = vpop.permute.xlu0 %1528 }
 0x226   : > { %5537 = vst [vmem:[#allocation28_spill] sm:$0xff] %v4164_v60 }
 0x228   : > { %v4118_v33 = vpop.permute.xlu1 %1459 }
 0x229   : > { %5514 = vst [vmem:[#allocation5_spill] sm:$0xff] %v4118_v33  ;;  %v1601_v61 = vpop.permute.xlu0 %1600 }
 0x22a   : > { %v1693_v13 = vshra.s32 %v1601_v61, %v4186_v9 }
 0x22c   : > { %v4122_v35 = vpop.permute.xlu1 %1465  ;;  %v1725_v17 = vand.u32 1, %v1693_v13 }
 0x22d   : > { %5516 = vst [vmem:[#allocation7_spill] sm:$0xff] %v4122_v35  ;;  %v1607_v54 = vpop.permute.xlu0 %1606 }
 0x22e   : > { %v1695_v19 = vshra.s32 %v1607_v54, %v4186_v9  ;;  %vm1757_vm6 = vcmp.ne.s32.totalorder %v1725_v17, 0 }
 0x22f   : > { %vm1790_vm7 = vmand %vm1757_vm6, %vm1788_vm4 }
 0x230   : > { %v4126_v37 = vpop.permute.xlu1 %1471 }
 0x231   : > { %5518 = vst [vmem:[#allocation9_spill] sm:$0xff] %v4126_v37  ;;  %v4168_v1 = vpop.permute.xlu0 %1612 }
 0x234   : > { %v4130_v40 = vpop.permute.xlu1 %1477 }
 0x235   : > { %5520 = vst [vmem:[#allocation11_spill] sm:$0xff] %v4130_v40  ;;  %v4172_v3 = vpop.permute.xlu0 %1618 }
 0x238   : > { %v4134_v42 = vpop.permute.xlu1 %1483 }
 0x239   : > { %5522 = vst [vmem:[#allocation13_spill] sm:$0xff] %v4134_v42  ;;  %v4176_v5 = vpop.permute.xlu0 %1624 }
 0x23c   : > { %v4138_v44 = vpop.permute.xlu1 %1489 }
 0x23d   : > { %5524 = vst [vmem:[#allocation15_spill] sm:$0xff] %v4138_v44  ;;  %v4183_v8 = vpop.permute.xlu0 %1630 }
 0x240   : > { %v4142_v47 = vpop.permute.xlu1 %1495 }
 0x241   : > { %5526 = vst [vmem:[#allocation17_spill] sm:$0xff] %v4142_v47  ;;  %v4191_v12 = vpop.permute.xlu0 %1636 }
 0x244   : > { %v4146_v49 = vpop.permute.xlu1 %1501 }
 0x245   : > { %5528 = vst [vmem:[#allocation19_spill] sm:$0xff] %v4146_v49  ;;  %v4201_v18 = vpop.permute.xlu0 %1642 }
 0x248   : > { %v4150_v51 = vpop.permute.xlu1 %1507 }
 0x249   : > { %5530 = vst [vmem:[#allocation21_spill] sm:$0xff] %v4150_v51  ;;  %v4217_v4 = vpop.permute.xlu0 %1648 }
 0x24c   : > { %v4154_v53 = vpop.permute.xlu1 %1513 }
 0x24d   : > { %5532 = vst [vmem:[#allocation23_spill] sm:$0xff] %v4154_v53 }
 0x250   : > { %v4158_v56 = vpop.permute.xlu1 %1519 }
 0x251   : > { %5534 = vst [vmem:[#allocation25_spill] sm:$0xff] %v4158_v56 }
 0x254   : > { %v4162_v46 = vpop.permute.xlu1 %1525 }
 0x255   : > { %5536 = vst [vmem:[#allocation27_spill] sm:$0xff] %v4162_v46  ;;  %v1697_v46 = vshra.s32 %v4168_v1, %v4186_v9 }
 0x257   : > { %v1729_v53 = vand.u32 1, %v1697_v46 }
 0x258   : > { %v1598_v58 = vpop.permute.xlu1 %1597 }
 0x259   : > { %v1692_v11 = vshra.s32 %v1598_v58, %v4186_v9  ;;  %v1727_v58 = vand.u32 1, %v1695_v19  ;;  %vm1761_vm13 = vcmp.ne.s32.totalorder %v1729_v53, 0 }
 0x25a   : > { %vm1794_vm15 = vmand %vm1761_vm13, %vm1788_vm4 }
 0x25b   : > { %v1724_v15 = vand.u32 1, %v1692_v11  ;;  %vm1759_vm8 = vcmp.ne.s32.totalorder %v1727_v58, 0 }
 0x25c   : > { %v1604_v63 = vpop.permute.xlu1 %1603  ;;  %vm1792_vm9 = vmand %vm1759_vm8, %vm1788_vm4 }
 0x25d   : > { %vm1756_vm3 = vcmp.ne.s32.totalorder %v1724_v15, 0  ;;  %v1694_v27 = vshra.s32 %v1604_v63, %v4186_v9 }
 0x25e   : > { %vm1789_vm5 = vmand %vm1756_vm3, %vm1788_vm4 }
 0x25f   : > { %v1726_v63 = vand.u32 1, %v1694_v27 }
 0x260   : > { %v4166_v0 = vpop.permute.xlu1 %1609 }
 0x261   : > { %vm1758_vm10 = vcmp.ne.s32.totalorder %v1726_v63, 0 }
 0x262   : > { %vm1791_vm11 = vmand %vm1758_vm10, %vm1788_vm4 }
 0x264   : > { %v4170_v2 = vpop.permute.xlu1 %1615 }
 0x268   : > { %v4174_v62 = vpop.permute.xlu1 %1621 }
 0x269   : > { %v1700_v46 = vshra.s32 %v4174_v62, %v4186_v9 }
 0x26b   : > { %v4275_v62 = vand.u32 1, %v1700_v46 }
 0x26c   : > { %v4180_v7 = vpop.permute.xlu1 %1627 }
 0x270   : > { %v4188_v10 = vpop.permute.xlu1 %1633 }
 0x274   : > { %v4194_v14 = vpop.permute.xlu1 %1639 }
 0x278   : > { %v4206_v21 = vpop.permute.xlu1 %1645 }
 0x279   : > { %v1708_v53 = vshra.s32 %v4206_v21, %v4186_v9 }
 0x27b   : > { %v1740_v42 = vand.u32 1, %v1708_v53 }
 0x27c   : > { %v4223_v15 = vpop.permute.xlu1 %1651 }
 0x27d   : > { %v1710_v46 = vshra.s32 %v4223_v15, %v4186_v9  ;;  %vm1772_vm8 = vcmp.ne.s32.totalorder %v1740_v42, 0 }
 0x27e   : > { %vm1805_vm13 = vmand %vm1772_vm8, %vm1788_vm4 }
 0x280   : > { %v1658_v56 = vpop.permute.xlu1 %1657 }
 0x284   : > { %v1664_v49 = vpop.permute.xlu1 %1663 }
 0x288   : > { %v4299_v44 = vpop.permute.xlu1 %1669 }
 0x2b9   : > { %v3078_v20 = vpop.f32.mrb[16].mxu0 }
 0x2ba   : > { %v1150_v22 = vadd.f32 %v3078_v20, %v4199_v16  ;;  %v1144_v24 = vpop.f32.mrb[17].mxu0 }
 0x2bb   : > { %v1145_v25 = vadd.f32 %v4199_v16, %v1144_v24 }
 0x2bc   : > { %v1307_v28 = vsel %vm1305_vm2, %v1150_v22, 0.0  ;;  %v4225_v20 = vsel %vm1790_vm7, %v1150_v22, -1e+10 }
 0x2bd   : > { %1340 = vadd.xlane.f32.xlu0 %v1307_v28  ;;  %v3081_v61 = vpop.f32.mrb[18].mxu0  ;;  %v4215_v54 = vsel %vm1789_vm5, %v1145_v25, -1e+10  ;;  %v1696_v28 = vshra.s32 %v4166_v0, %v4186_v9  ;;  %v1306_v22 = vsel %vm1305_vm2, %v1145_v25, 0.0 }
 0x2be   : > { %v1160_v11 = vadd.f32 %v3081_v61, %v4199_v16  ;;  %v1154_v13 = vpop.f32.mrb[19].mxu0  ;;  %1853 = vmax.xlane.f32.xlu1 %v4215_v54  ;;  %v4232_v61 = vpop.permute.xlu0 %1654 }
 0x2bf   : > { %v1155_v27 = vadd.f32 %v4199_v16, %v1154_v13  ;;  %v1728_v13 = vand.u32 1, %v1696_v28  ;;  %v1698_v28 = vshra.s32 %v4170_v2, %v4186_v9  ;;  %v1711_v15 = vshra.s32 %v4232_v61, %v4186_v9 }
 0x2c0   : > { %v1309_v17 = vsel %vm1305_vm2, %v1160_v11, 0.0 }
 0x2c1   : > { %1855 = vmax.xlane.f32.xlu0 %v4225_v20  ;;  %v3084_v19 = vpop.f32.mrb[20].mxu0  ;;  %v4246_v25 = vsel %vm1791_vm11, %v1155_v27, -1e+10  ;;  %v1308_v1 = vsel %vm1305_vm2, %v1155_v27, 0.0  ;;  %vm1760_vm12 = vcmp.ne.s32.totalorder %v1728_v13, 0  ;;  %v1699_v27 = vshra.s32 %v4172_v3, %v4186_v9 }
 0x2c2   : > { %v1164_v24 = vpop.f32.mrb[21].mxu0  ;;  %1344 = vadd.xlane.f32.xlu1 %v1309_v17  ;;  %v4241_v17 = vsel %vm1792_vm9, %v1160_v11, -1e+10  ;;  %v4253_v11 = vpop.permute.xlu0 %1660  ;;  %v1170_v60 = vadd.f32 %v3084_v19, %v4199_v16  ;;  %vm1793_vm14 = vmand %vm1760_vm12, %vm1788_vm4  ;;  %v1730_v2 = vand.u32 1, %v1698_v28  ;;  %v1709_v13 = vshra.s32 %v4217_v4, %v4186_v9 }
 0x2c3   : > { %v1165_v63 = vadd.f32 %v4199_v16, %v1164_v24  ;;  %v1702_v4 = vshra.s32 %v4180_v7, %v4186_v9  ;;  %v1703_v7 = vshra.s32 %v4183_v8, %v4186_v9  ;;  %vm1764_vm9 = vcmp.ne.s32.totalorder %v4275_v62, 0 }
 0x2c4   : > { %v1311_v19 = vsel %vm1305_vm2, %v1170_v60, 0.0  ;;  %v4291_v28 = vsel %vm1794_vm15, %v1170_v60, -1e+10  ;;  %v1701_v60 = vshra.s32 %v4176_v5, %v4186_v9  ;;  %v1741_v52 = vand.u32 1, %v1709_v13 }
 0x2c5   : > { %v3087_v58 = vpop.f32.mrb[22].mxu0  ;;  %1338 = vadd.xlane.f32.xlu0 %v1306_v22  ;;  %v1310_v57 = vsel %vm1305_vm2, %v1165_v63, 0.0  ;;  %v4281_v47 = vsel %vm1793_vm14, %v1165_v63, -1e+10  ;;  %v1704_v63 = vshra.s32 %v4188_v10, %v4186_v9  ;;  %vm1762_vm0 = vcmp.ne.s32.totalorder %v1730_v2, 0  ;;  %vm4386_vm14 = vmand %vm1764_vm9, %vm1788_vm4 }
 0x2c6   : > { %v1174_v0 = vpop.f32.mrb[23].mxu0  ;;  %1859 = vmax.xlane.f32.xlu1 %v4241_v17  ;;  %v4279_v3 = vpop.permute.xlu0 %1666  ;;  %v1180_v10 = vadd.f32 %v3087_v58, %v4199_v16  ;;  %v1713_v58 = vshra.s32 %v4253_v11, %v4186_v9  ;;  %v4333_v40 = vand.u32 1, %v1703_v7  ;;  %vm1795_vm3 = vmand %vm1762_vm0, %vm1788_vm4  ;;  %vm1773_vm5 = vcmp.ne.s32.totalorder %v1741_v52, 0 }
 0x2c7   : > { %v1175_v21 = vadd.f32 %v4199_v16, %v1174_v0  ;;  %v4323_v8 = vand.u32 1, %v1704_v63  ;;  %v1743_v63 = vand.u32 1, %v1711_v15  ;;  %vm1806_vm10 = vmand %vm1773_vm5, %vm1788_vm4 }
 0x2c8   : > { %v1313_v5 = vsel %vm1305_vm2, %v1180_v10, 0.0 }
 0x2c9   : > { %v4248_v51 = vpop.f32.mrb[24].mxu0  ;;  %1857 = vmax.xlane.f32.xlu0 %v4246_v25  ;;  %v1312_v0 = vsel %vm1305_vm2, %v1175_v21, 0.0  ;;  %v4342_v61 = vsel %vm1795_vm3, %v1175_v21, -1e+10  ;;  %vm1775_vm12 = vcmp.ne.s32.totalorder %v1743_v63, 0 }
 0x2ca   : > { %v4256_v22 = vpop.f32.mrb[25].mxu0  ;;  %1342 = vadd.xlane.f32.xlu1 %v1308_v1  ;;  %v4329_v13 = vpop.permute.xlu0 %1672  ;;  %v1190_v15 = vadd.f32 %v4248_v51, %v4199_v16  ;;  %vm1808_vm5 = vmand %vm1775_vm12, %vm1788_vm4 }
 0x2cb   : > { %v1185_v11 = vadd.f32 %v4199_v16, %v4256_v22  ;;  %v1745_v22 = vand.u32 1, %v1713_v58  ;;  %v1717_v37 = vshra.s32 %v4329_v13, %v4186_v9 }
 0x2cc   : > { %v1315_v52 = vsel %vm1305_vm2, %v1190_v15, 0.0 }
 0x2cd   : > { %v4267_v24 = vpop.f32.mrb[26].mxu0  ;;  %1346 = vadd.xlane.f32.xlu0 %v1310_v57  ;;  %v1731_v57 = vand.u32 1, %v1699_v27  ;;  %v1714_v27 = vshra.s32 %v1664_v49, %v4186_v9  ;;  %v4321_v49 = vand.u32 1, %v1702_v4  ;;  %v1676_v4 = vpop.permute.xlu1 %1675  ;;  %vm1777_vm3 = vcmp.ne.s32.totalorder %v1745_v22, 0 }
 0x2ce   : > { %v4271_v1 = vpop.f32.mrb[27].mxu0  ;;  %1348 = vadd.xlane.f32.xlu1 %v1311_v19  ;;  %v1712_v19 = vshra.s32 %v1658_v56, %v4186_v9  ;;  %v1718_v2 = vshra.s32 %v1676_v4, %v4186_v9  ;;  %v4369_v58 = vpop.permute.xlu0 %1678  ;;  %v1200_v63 = vadd.f32 %v4267_v24, %v4199_v16  ;;  %vm1810_vm9 = vmand %vm1777_vm3, %vm1788_vm4 }
 0x2cf   : > { %vm1763_vm1 = vcmp.ne.s32.totalorder %v1731_v57, 0  ;;  %v4335_v45 = vand.u32 1, %v1714_v27  ;;  %v1314_v57 = vsel %vm1305_vm2, %v1185_v11, 0.0  ;;  %vm1766_vm8 = vcmp.ne.s32.totalorder %v4321_v49, 0 }
 0x2d0   : > { %v4315_v50 = vand.u32 1, %v1712_v19  ;;  %v1742_v19 = vand.u32 1, %v1710_v46  ;;  %vm1796_vm6 = vmand %vm1763_vm1, %vm1788_vm4  ;;  %v1716_v46 = vshra.s32 %v4299_v44, %v4186_v9  ;;  %v1715_v44 = vshra.s32 %v4279_v3, %v4186_v9 }
 0x2d1   : > { %v4288_v55 = vpop.f32.mrb[28].mxu0  ;;  %1861 = vmax.xlane.f32.xlu0 %v4281_v47  ;;  %v4352_v7 = vsel %vm1796_vm6, %v1180_v10, -1e+10  ;;  %vm1778_vm0 = vcmp.ne.s32.totalorder %v4335_v45, 0  ;;  %v1719_v38 = vshra.s32 %v4369_v58, %v4186_v9  ;;  %vm4473_vm12 = vmand %vm1766_vm8, %vm1788_vm4 }
 0x2d2   : > { %v4302_v56 = vpop.f32.mrb[29].mxu0  ;;  %1863 = vmax.xlane.f32.xlu1 %v4291_v28  ;;  %vm1776_vm7 = vcmp.ne.s32.totalorder %v4315_v50, 0  ;;  %vm1774_vm11 = vcmp.ne.s32.totalorder %v1742_v19, 0  ;;  %v4419_v19 = vsel %vm4386_vm14, %v1185_v11, -1e+10 }
 0x2d3   : > { %vm4405_vm1 = vmand %vm1774_vm11, %vm1788_vm4  ;;  %v1751_v35 = vand.u32 1, %v1719_v38 }
 0x2d4   : > { %vm1809_vm11 = vmand %vm1776_vm7, %vm1788_vm4 }
 0x2d5   : > { %v4317_v48 = vpop.f32.mrb[30].mxu0  ;;  %1350 = vadd.xlane.f32.xlu0 %v1312_v0  ;;  %v1733_v0 = vand.u32 1, %v1701_v60  ;;  %vm1783_vm8 = vcmp.ne.s32.totalorder %v1751_v35, 0 }
 0x2d6   : > { %v4331_v53 = vpop.f32.mrb[31].mxu0  ;;  %1352 = vadd.xlane.f32.xlu1 %v1313_v5  ;;  %v1705_v5 = vshra.s32 %v4191_v12, %v4186_v9  ;;  %v1220_v35 = vadd.f32 %v4317_v48, %v4199_v16 }
 0x2d7   : > { %vm1765_vm15 = vcmp.ne.s32.totalorder %v1733_v0, 0 }
 0x2d8   : > { %vm1798_vm6 = vmand %vm1765_vm15, %vm1788_vm4 }
 0x2d9   : > { %v3102_v60 = vpop.f32.mrb[32].mxu0  ;;  %1865 = vmax.xlane.f32.xlu0 %v4342_v61  ;;  %vm4493_vm15 = vmand %vm1778_vm0, %vm1788_vm4 }
 0x2da   : > { %v1230_v21 = vadd.f32 %v3102_v60, %v4199_v16  ;;  %v1224_v27 = vpop.f32.mrb[33].mxu0  ;;  %1867 = vmax.xlane.f32.xlu1 %v4352_v7 }
 0x2db   : > { %v1225_v10 = vadd.f32 %v4199_v16, %v1224_v27  ;;  %v4399_v27 = vand.u32 1, %v1718_v2  ;;  %v1195_v2 = vadd.f32 %v4199_v16, %v4271_v1  ;;  %v4433_v1 = vsel %vm1798_vm6, %v1190_v15, -1e+10 }
 0x2dc   : > { %v4373_v4 = vsel %vm1305_vm2, %v1230_v21, 0.0  ;;  %v4378_v51 = vsel %vm1806_vm10, %v1230_v21, -1e+10  ;;  %v4397_v21 = vand.u32 1, %v1716_v46  ;;  %5542 = vst [vmem:[#allocation29_spill] sm:$0xff] %v4433_v1  ;;  %v1749_v15 = vand.u32 1, %v1717_v37 }
 0x2dd   : > { %v3105_v3 = vpop.f32.mrb[34].mxu0  ;;  %1354 = vadd.xlane.f32.xlu0 %v1314_v57  ;;  %v4392_v42 = vsel %vm1305_vm2, %v1225_v10, 0.0  ;;  %v4394_v60 = vsel %vm1805_vm13, %v1225_v10, -1e+10  ;;  %v1747_v10 = vand.u32 1, %v1715_v44  ;;  %v1316_v24 = vsel %vm1305_vm2, %v1195_v2, 0.0 }
 0x2de   : > { %v1240_v57 = vadd.f32 %v3105_v3, %v4199_v16  ;;  %v1234_v62 = vpop.f32.mrb[35].mxu0  ;;  %1356 = vadd.xlane.f32.xlu1 %v1315_v52  ;;  %v1682_v3 = vpop.permute.xlu1 %1681  ;;  %vm1767_vm13 = vcmp.ne.s32.totalorder %v4333_v40, 0  ;;  %vm1780_vm7 = vcmp.ne.s32.totalorder %v4397_v21, 0  ;;  %vm1782_vm14 = vcmp.ne.s32.totalorder %v4399_v27, 0 }
 0x2df   : > { %v1235_v46 = vadd.f32 %v4199_v16, %v1234_v62  ;;  %v1720_v12 = vshra.s32 %v1682_v3, %v4186_v9  ;;  %v4457_v3 = vand.u32 1, %v1705_v5  ;;  %vm1779_vm10 = vcmp.ne.s32.totalorder %v1747_v10, 0  ;;  %vm1800_vm0 = vmand %vm1767_vm13, %vm1788_vm4 }
 0x2e0   : > { %v4426_v13 = vsel %vm1305_vm2, %v1240_v57, 0.0  ;;  %v4428_v44 = vsel %vm1808_vm5, %v1240_v57, -1e+10  ;;  %v1685_v57 = vpop.permute.xlu0 %1684  ;;  %vm1812_vm3 = vmand %vm1779_vm10, %vm1788_vm4  ;;  %v4506_v45 = vsel %vm4473_vm12, %v1195_v2, -1e+10  ;;  %v1210_v10 = vadd.f32 %v4288_v55, %v4199_v16 }
 0x2e1   : > { %v3108_v52 = vpop.f32.mrb[36].mxu0  ;;  %1869 = vmax.xlane.f32.xlu0 %v4419_v19  ;;  %v4437_v11 = vsel %vm1305_vm2, %v1235_v46, 0.0  ;;  %v4441_v0 = vsel %vm4405_vm1, %v1235_v46, -1e+10  ;;  %v1317_v46 = vsel %vm1305_vm2, %v1200_v63, 0.0  ;;  %vm1781_vm1 = vcmp.ne.s32.totalorder %v1749_v15, 0  ;;  %vm4576_vm13 = vmand %vm1782_vm14, %vm1788_vm4 }
 0x2e2   : > { %v1250_v62 = vadd.f32 %v3108_v52, %v4199_v16  ;;  %v1244_v41 = vpop.f32.mrb[37].mxu0  ;;  %1871 = vmax.xlane.f32.xlu1 %v4433_v1  ;;  %v1721_v36 = vshra.s32 %v1685_v57, %v4186_v9  ;;  %5547 = vst [vmem:[#allocation30_spill] sm:$0xff] %v4506_v45  ;;  %vm1768_vm5 = vcmp.ne.s32.totalorder %v4323_v8, 0  ;;  %vm1814_vm6 = vmand %vm1781_vm1, %vm1788_vm4  ;;  %v5551_v21 = vshra.s32 %v4194_v14, %v4186_v9 }
 0x2e3   : > { %v1245_v43 = vadd.f32 %v4199_v16, %v1244_v41  ;;  %v1707_v41 = vshra.s32 %v4201_v18, %v4186_v9  ;;  %v4486_v18 = vand.u32 1, %v1720_v12  ;;  %vm4556_vm10 = vmand %vm1768_vm5, %vm1788_vm4  ;;  %v1215_v14 = vadd.f32 %v4199_v16, %v4331_v53 }
 0x2e4   : > { %v4461_v52 = vsel %vm1305_vm2, %v1250_v62, 0.0  ;;  %v4467_v37 = vsel %vm1810_vm9, %v1250_v62, -1e+10  ;;  %vm1813_vm9 = vmand %vm1780_vm7, %vm1788_vm4  ;;  %v1321_v8 = vsel %vm1305_vm2, %v1220_v35, 0.0 }
 0x2e5   : > { %v3111_v49 = vpop.f32.mrb[38].mxu0  ;;  %1358 = vadd.xlane.f32.xlu0 %v1316_v24  ;;  %v4480_v5 = vsel %vm1305_vm2, %v1245_v43, 0.0  ;;  %v4482_v50 = vsel %vm1809_vm11, %v1245_v43, -1e+10  ;;  %v1688_v43 = vpop.permute.xlu1 %1687  ;;  %v1319_v24 = vsel %vm1305_vm2, %v1210_v10, 0.0  ;;  %vm1769_vm11 = vcmp.ne.s32.totalorder %v4457_v3, 0 }
 0x2e6   : > { %v1260_v58 = vadd.f32 %v3111_v49, %v4199_v16  ;;  %v1254_v62 = vpop.f32.mrb[39].mxu0  ;;  %1360 = vadd.xlane.f32.xlu1 %v1317_v46  ;;  %v1691_v46 = vpop.permute.xlu0 %1690  ;;  %v1205_v49 = vadd.f32 %v4199_v16, %v4302_v56  ;;  %v4521_v56 = vsel %vm1800_vm0, %v1200_v63, -1e+10  ;;  %v1722_v22 = vshra.s32 %v1688_v43, %v4186_v9  ;;  %vm1802_vm14 = vmand %vm1769_vm11, %vm1788_vm4 }
 0x2e7   : > { %v1255_v12 = vadd.f32 %v4199_v16, %v1254_v62  ;;  %5548 = vst [vmem:[#allocation31_spill] sm:$0xff] %v4521_v56  ;;  %v1753_v63 = vand.u32 1, %v1721_v36  ;;  %vm1784_vm12 = vcmp.ne.s32.totalorder %v4486_v18, 0  ;;  %v4601_v53 = vsel %vm1802_vm14, %v1210_v10, -1e+10 }
 0x2e8   : > { %v4514_v38 = vsel %vm1305_vm2, %v1260_v58, 0.0  ;;  %v4516_v57 = vsel %vm1812_vm3, %v1260_v58, -1e+10  ;;  %v1318_v55 = vsel %vm1305_vm2, %v1205_v49, 0.0  ;;  %v1320_v48 = vsel %vm1305_vm2, %v1215_v14, 0.0 }
 0x2e9   : > { %v3114_v62 = vpop.f32.mrb[40].mxu0  ;;  %1873 = vmax.xlane.f32.xlu0 %v4506_v45  ;;  %v4525_v2 = vsel %vm1305_vm2, %v1255_v12, 0.0  ;;  %v4529_v40 = vsel %vm4493_vm15, %v1255_v12, -1e+10  ;;  %v1723_v45 = vshra.s32 %v1691_v46, %v4186_v9  ;;  %v1738_v46 = vand.u32 1, %v5551_v21  ;;  %vm1816_vm15 = vmand %vm1783_vm8, %vm1788_vm4 }
 0x2ea   : > { %v1270_v58 = vadd.f32 %v3114_v62, %v4199_v16  ;;  %v1264_v34 = vpop.f32.mrb[41].mxu0  ;;  %1875 = vmax.xlane.f32.xlu1 %v4521_v56  ;;  %v1739_v62 = vand.u32 1, %v1707_v41  ;;  %vm1785_vm7 = vcmp.ne.s32.totalorder %v1753_v63, 0  ;;  %v4588_v41 = vsel %vm4556_vm10, %v1205_v49, -1e+10 }
 0x2eb   : > { %v1265_v33 = vadd.f32 %v4199_v16, %v1264_v34  ;;  %v1755_v1 = vand.u32 1, %v1723_v45  ;;  %vm1770_vm1 = vcmp.ne.s32.totalorder %v1738_v46, 0  ;;  %vm1818_vm0 = vmand %vm1785_vm7, %vm1788_vm4  ;;  %vm1532_vm7 = vcmp.eq.s32.totalorder %v4178_v6, %v4104_v26 }
 0x2ec   : > { %v4546_v43 = vsel %vm1305_vm2, %v1270_v58, 0.0  ;;  %v4552_v36 = vsel %vm1814_vm6, %v1270_v58, -1e+10  ;;  %vm1817_vm6 = vmand %vm1784_vm12, %vm1788_vm4  ;;  %vm1771_vm8 = vcmp.ne.s32.totalorder %v1739_v62, 0  ;;  %vm1535_vm14 = vcmp.eq.s32.totalorder %v4178_v6, %v4110_v29 }
 0x2ed   : > { %v3117_v34 = vpop.f32.mrb[42].mxu0  ;;  %1362 = vadd.xlane.f32.xlu0 %v1318_v55  ;;  %v4563_v15 = vsel %vm1305_vm2, %v1265_v33, 0.0  ;;  %v4565_v12 = vsel %vm1813_vm9, %v1265_v33, -1e+10  ;;  %v1754_v33 = vand.u32 1, %v1722_v22  ;;  %vm1787_vm5 = vcmp.ne.s32.totalorder %v1755_v1, 0  ;;  %vm1803_vm9 = vmand %vm1770_vm1, %vm1788_vm4 }
 0x2ee   : > { %v1280_v58 = vadd.f32 %v3117_v34, %v4199_v16  ;;  %v1274_v55 = vpop.f32.mrb[43].mxu0  ;;  %1364 = vadd.xlane.f32.xlu1 %v1319_v24  ;;  %vm1820_vm11 = vmand %vm1787_vm5, %vm1788_vm4  ;;  %v4641_v62 = vsel %vm1803_vm9, %v1215_v14, -1e+10  ;;  %vm1536_vm1 = vcmp.eq.s32.totalorder %v4178_v6, %v4112_v30 }
 0x2ef   : > { %v1275_v9 = vadd.f32 %v4199_v16, %v1274_v55  ;;  %vm1786_vm3 = vcmp.ne.s32.totalorder %v1754_v33, 0  ;;  %vm1804_vm12 = vmand %vm1771_vm8, %vm1788_vm4 }
 0x2f0   : > { %v1333_v27 = vsel %vm1305_vm2, %v1280_v58, 0.0  ;;  %v4596_v45 = vsel %vm1816_vm15, %v1280_v58, -1e+10  ;;  %vm1819_vm10 = vmand %vm1786_vm3, %vm1788_vm4  ;;  %v4650_v33 = vsel %vm1804_vm12, %v1220_v35, -1e+10  ;;  %vm1531_vm4 = vcmp.eq.s32.totalorder %v4178_v6, %v4102_v23 }
 0x2f1   : > { %v3120_v22 = vpop.f32.mrb[44].mxu0  ;;  %1877 = vmax.xlane.f32.xlu0 %v4588_v41  ;;  %v1332_v49 = vsel %vm1305_vm2, %v1275_v9, 0.0  ;;  %v4607_v3 = vsel %vm4576_vm13, %v1275_v9, -1e+10  ;;  %vm1533_vm13 = vcmp.eq.s32.totalorder %v4178_v6, %v4106_v59  ;;  %vm1534_vm15 = vcmp.eq.s32.totalorder %v4178_v6, %v4108_v39 }
 0x2f2   : > { %v1290_v24 = vadd.f32 %v3120_v22, %v4199_v16  ;;  %v1284_v34 = vpop.f32.mrb[45].mxu0  ;;  %1879 = vmax.xlane.f32.xlu1 %v4601_v53  ;;  %vm1537_vm3 = vcmp.eq.s32.totalorder %v4178_v6, %v4114_v31 }
 0x2f3   : > { %v1285_v10 = vadd.f32 %v4199_v16, %v1284_v34 }
 0x2f4   : > { %v1335_v56 = vsel %vm1305_vm2, %v1290_v24, 0.0  ;;  %v4625_v21 = vsel %vm1818_vm0, %v1290_v24, -1e+10 }
 0x2f5   : > { %v3123_v46 = vpop.f32.mrb[46].mxu0  ;;  %1366 = vadd.xlane.f32.xlu0 %v1320_v48  ;;  %v1334_v63 = vsel %vm1305_vm2, %v1285_v10, 0.0  ;;  %v4631_v58 = vsel %vm1817_vm6, %v1285_v10, -1e+10 }
 0x2f6   : > { %v1300_v55 = vadd.f32 %v3123_v46, %v4199_v16  ;;  %v1294_v9 = vpop.f32.mrb[47].mxu0  ;;  %1368 = vadd.xlane.f32.xlu1 %v1321_v8 }
 0x2f7   : > { %v1295_v18 = vadd.f32 %v4199_v16, %v1294_v9 }
 0x2f8   : > { %v1337_v22 = vsel %vm1305_vm2, %v1300_v55, 0.0  ;;  %v4647_v24 = vsel %vm1820_vm11, %v1300_v55, -1e+10 }
 0x2f9   : > { %1881 = vmax.xlane.f32.xlu0 %v4641_v62  ;;  %v1336_v16 = vsel %vm1305_vm2, %v1295_v18, 0.0  ;;  %v4654_v34 = vsel %vm1819_vm10, %v1295_v18, -1e+10  ;;  %vm1530_vm2 = vcmp.eq.s32.totalorder %v4178_v6, %v4116_v32 }
 0x2fa   : > { %1883 = vmax.xlane.f32.xlu1 %v4650_v33 }
 0x2fd   : > { %1370 = vadd.xlane.f32.xlu0 %v4392_v42 }
 0x2fe   : > { %1372 = vadd.xlane.f32.xlu1 %v4373_v4 }
 0x301   : > { %1885 = vmax.xlane.f32.xlu0 %v4394_v60 }
 0x302   : > { %1887 = vmax.xlane.f32.xlu1 %v4378_v51 }
 0x305   : > { %1374 = vadd.xlane.f32.xlu0 %v4437_v11 }
 0x306   : > { %1376 = vadd.xlane.f32.xlu1 %v4426_v13 }
 0x309   : > { %1889 = vmax.xlane.f32.xlu0 %v4441_v0 }
 0x30a   : > { %1891 = vmax.xlane.f32.xlu1 %v4428_v44 }
 0x30d   : > { %1378 = vadd.xlane.f32.xlu0 %v4480_v5 }
 0x30e   : > { %1380 = vadd.xlane.f32.xlu1 %v4461_v52 }
 0x311   : > { %1893 = vmax.xlane.f32.xlu0 %v4482_v50 }
 0x312   : > { %1895 = vmax.xlane.f32.xlu1 %v4467_v37 }
 0x315   : > { %1382 = vadd.xlane.f32.xlu0 %v4525_v2 }
 0x316   : > { %1384 = vadd.xlane.f32.xlu1 %v4514_v38 }
 0x319   : > { %1897 = vmax.xlane.f32.xlu0 %v4529_v40 }
 0x31a   : > { %1899 = vmax.xlane.f32.xlu1 %v4516_v57 }
 0x31d   : > { %1386 = vadd.xlane.f32.xlu0 %v4563_v15 }
 0x31e   : > { %1388 = vadd.xlane.f32.xlu1 %v4546_v43 }
 0x321   : > { %1901 = vmax.xlane.f32.xlu0 %v4565_v12 }
 0x322   : > { %1903 = vmax.xlane.f32.xlu1 %v4552_v36 }
 0x325   : > { %1390 = vadd.xlane.f32.xlu0 %v1332_v49 }
 0x326   : > { %1392 = vadd.xlane.f32.xlu1 %v1333_v27 }
 0x329   : > { %1905 = vmax.xlane.f32.xlu0 %v4607_v3 }
 0x32a   : > { %1907 = vmax.xlane.f32.xlu1 %v4596_v45 }
 0x32d   : > { %1394 = vadd.xlane.f32.xlu0 %v1334_v63 }
 0x32e   : > { %1396 = vadd.xlane.f32.xlu1 %v1335_v56 }
 0x331   : > { %1909 = vmax.xlane.f32.xlu0 %v4631_v58 }
 0x332   : > { %1911 = vmax.xlane.f32.xlu1 %v4625_v21 }
 0x335   : > { %1398 = vadd.xlane.f32.xlu0 %v1336_v16 }
 0x336   : > { %1400 = vadd.xlane.f32.xlu1 %v1337_v22 }
 0x339   : > { %1913 = vmax.xlane.f32.xlu0 %v4654_v34 }
 0x33a   : > { %1915 = vmax.xlane.f32.xlu1 %v4647_v24 }
 0x34a   : > { %v4683_v4 = vpop.xlane.xlu0 %1340 }
 0x34b   : > { %v1854_v42 = vpop.xlane.xlu1 %1853 }
 0x34c   : > { %v1917_v13 = vsub.f32 %v4215_v54, %v1854_v42 }
 0x34e   : > { %v1856_v1 = vpop.xlane.xlu0 %1855  ;;  %v2173_v11 = vsel %vm1530_vm2, %v1917_v13, 0.0  ;;  %v1949_v15 = vmul.f32 1.442695, %v1917_v13 }
 0x34f   : > { %v1918_v52 = vsub.f32 %v4225_v20, %v1856_v1  ;;  %v4689_v5 = vpop.xlane.xlu1 %1344  ;;  %2205 = vadd.xlane.f32.xlu0 %v2173_v11 }
 0x350   : > { %3370 = vpow2.f32 %v1949_v15 }
 0x351   : > { %v2174_v38 = vsel %vm1531_vm4, %v1918_v52, 0.0  ;;  %v1951_v27 = vmul.f32 1.442695, %v1918_v52 }
 0x352   : > { %2207 = vadd.xlane.f32.xlu1 %v2174_v38  ;;  %v4693_v2 = vpop.xlane.xlu0 %1338 }
 0x353   : > { %v1860_v43 = vpop.xlane.xlu1 %1859  ;;  %3372 = vpow2.f32 %v1951_v27 }
 0x354   : > { %v4696_v54 = vsub.f32 %v4241_v17, %v1860_v43 }
 0x356   : > { %v1858_v32 = vpop.xlane.xlu0 %1857  ;;  %v2176_v20 = vsel %vm1533_vm13, %v4696_v54, 0.0  ;;  %v1955_v39 = vmul.f32 1.442695, %v4696_v54 }
 0x357   : > { %v4702_v14 = vsub.f32 %v4246_v25, %v1858_v32  ;;  %2211 = vadd.xlane.f32.xlu1 %v2176_v20  ;;  %v4704_v23 = vpop.xlane.xlu1 %1342  ;;  %v5554_v20 = vld [vmem:[#allocation29_spill] sm:$0xff] }
 0x359   : > { %v2175_v17 = vsel %vm1532_vm7, %v4702_v14, 0.0 }
 0x35a   : > { %2209 = vadd.xlane.f32.xlu0 %v2175_v17  ;;  %v4709_v35 = vpop.xlane.xlu0 %1346  ;;  %v3371_v63 = vpop.eup %3370 }
 0x35b   : > { %v4711_v59 = vpop.xlane.xlu1 %1348  ;;  %v2301_v30 = vmul.f32 %v3371_v63, %v1917_v13 }
 0x35e   : > { %v1862_v49 = vpop.xlane.xlu0 %1861 }
 0x35f   : > { %v4714_v25 = vsub.f32 %v4281_v47, %v1862_v49  ;;  %v1864_v48 = vpop.xlane.xlu1 %1863  ;;  %v1953_v47 = vmul.f32 1.442695, %v4702_v14 }
 0x360   : > { %v4719_v26 = vsub.f32 %v4291_v28, %v1864_v48  ;;  %v3373_v28 = vpop.eup %3372  ;;  %v5556_v48 = vld [vmem:[#allocation6_spill] sm:$0xff] }
 0x361   : > { %v2177_v10 = vsel %vm1534_vm15, %v4714_v25, 0.0  ;;  %3374 = vpow2.f32 %v1953_v47  ;;  %v2302_v11 = vmul.f32 %v3373_v28, %v1918_v52  ;;  %v1957_v17 = vmul.f32 1.442695, %v4714_v25  ;;  %v5555_v52 = vld [vmem:[#allocation5_spill] sm:$0xff] }
 0x362   : > { %2213 = vadd.xlane.f32.xlu0 %v2177_v10  ;;  %v4724_v8 = vpop.xlane.xlu0 %1350  ;;  %v2178_v56 = vsel %vm1535_vm14, %v4719_v26, 0.0  ;;  %3376 = vpow2.f32 %v1955_v39  ;;  %v1959_v1 = vmul.f32 1.442695, %v4719_v26  ;;  %vm1538_vm0 = vcmp.eq.s32.totalorder %v4178_v6, %v5555_v52 }
 0x363   : > { %2215 = vadd.xlane.f32.xlu1 %v2178_v56  ;;  %v4728_v46 = vpop.xlane.xlu1 %1352  ;;  %vm1539_vm5 = vcmp.eq.s32.totalorder %v4178_v6, %v5556_v48  ;;  %v5560_v48 = vld [vmem:[#allocation7_spill] sm:$0xff] }
 0x364   : > { %3378 = vpow2.f32 %v1959_v1  ;;  %vm1540_vm8 = vcmp.eq.s32.totalorder %v4178_v6, %v5560_v48 }
 0x365   : > { %3380 = vpow2.f32 %v1957_v17 }
 0x366   : > { %2013 = vadd.xlane.f32.xlu0 %v3371_v63  ;;  %v1866_v55 = vpop.xlane.xlu0 %1865 }
 0x367   : > { %v4732_v29 = vsub.f32 %v4342_v61, %v1866_v55  ;;  %2015 = vadd.xlane.f32.xlu1 %v3373_v28  ;;  %v1868_v9 = vpop.xlane.xlu1 %1867  ;;  %v5557_v28 = vld [vmem:[#allocation31_spill] sm:$0xff] }
 0x368   : > { %v4737_v18 = vsub.f32 %v4352_v7, %v1868_v9 }
 0x369   : > { %v2179_v22 = vsel %vm1536_vm1, %v4732_v29, 0.0 }
 0x36a   : > { %2217 = vadd.xlane.f32.xlu0 %v2179_v22  ;;  %v4742_v16 = vpop.xlane.xlu0 %1354  ;;  %v2180_v61 = vsel %vm1537_vm3, %v4737_v18, 0.0  ;;  %v1963_v49 = vmul.f32 1.442695, %v4737_v18 }
 0x36b   : > { %2219 = vadd.xlane.f32.xlu1 %v2180_v61  ;;  %v4745_v42 = vpop.xlane.xlu1 %1356  ;;  %v3375_v31 = vpop.eup %3374 }
 0x36c   : > { %v3377_v32 = vpop.eup %3376  ;;  %3382 = vpow2.f32 %v1963_v49  ;;  %v2303_v1 = vmul.f32 %v3375_v31, %v4702_v14 }
 0x36d   : > { %v2304_v39 = vmul.f32 %v3377_v32, %v4696_v54 }
 0x36e   : > { %2333 = vadd.xlane.f32.xlu0 %v2301_v30  ;;  %v1870_v7 = vpop.xlane.xlu0 %1869  ;;  %v3379_v63 = vpop.eup %3378  ;;  %v5558_v30 = vld [vmem:[#allocation8_spill] sm:$0xff] }
 0x36f   : > { %2335 = vadd.xlane.f32.xlu1 %v2302_v11  ;;  %v1872_v38 = vpop.xlane.xlu1 %1871  ;;  %v4749_v43 = vsub.f32 %v4419_v19, %v1870_v7  ;;  %vm1541_vm6 = vcmp.eq.s32.totalorder %v4178_v6, %v5558_v30 }
 0x370   : > { %v4752_v15 = vsub.f32 %v5554_v20, %v1872_v38  ;;  %v3381_v38 = vpop.eup %3380 }
 0x371   : > { %v2181_v19 = vsel %vm1538_vm0, %v4749_v43, 0.0 }
 0x372   : > { %2017 = vadd.xlane.f32.xlu0 %v3375_v31  ;;  %v4754_v27 = vpop.xlane.xlu0 %1358  ;;  %v2182_v56 = vsel %vm1539_vm5, %v4752_v15, 0.0  ;;  %v1967_v61 = vmul.f32 1.442695, %v4752_v15  ;;  %v1961_v31 = vmul.f32 1.442695, %v4732_v29 }
 0x373   : > { %2019 = vadd.xlane.f32.xlu1 %v3377_v32  ;;  %v4757_v13 = vpop.xlane.xlu1 %1360  ;;  %v5559_v32 = vld [vmem:[#allocation30_spill] sm:$0xff] }
 0x374   : > { %3384 = vpow2.f32 %v1967_v61 }
 0x375   : > { %3386 = vpow2.f32 %v1961_v31  ;;  %v5563_v31 = vld [vmem:[#allocation12_spill] sm:$0xff] }
 0x376   : > { %2221 = vadd.xlane.f32.xlu0 %v2181_v19  ;;  %v1874_v10 = vpop.xlane.xlu0 %1873  ;;  %v3383_v17 = vpop.eup %3382  ;;  %vm1545_vm10 = vcmp.eq.s32.totalorder %v4178_v6, %v5563_v31 }
 0x377   : > { %2223 = vadd.xlane.f32.xlu1 %v2182_v56  ;;  %v1876_v47 = vpop.xlane.xlu1 %1875  ;;  %v4780_v20 = vsub.f32 %v5559_v32, %v1874_v10  ;;  %v5561_v56 = vld [vmem:[#allocation10_spill] sm:$0xff]  ;;  %v2305_v32 = vmul.f32 %v3381_v38, %v4714_v25  ;;  %v1965_v25 = vmul.f32 1.442695, %v4749_v43  ;;  %v2308_v31 = vmul.f32 %v3383_v17, %v4737_v18 }
 0x378   : > { %v4768_v55 = vsub.f32 %v5557_v28, %v1876_v47  ;;  %vm1543_vm9 = vcmp.eq.s32.totalorder %v4178_v6, %v5561_v56  ;;  %v2306_v28 = vmul.f32 %v3379_v63, %v4719_v26 }
 0x379   : > { %v2183_v10 = vsel %vm1540_vm8, %v4780_v20, 0.0 }
 0x37a   : > { %2339 = vadd.xlane.f32.xlu0 %v2304_v39  ;;  %v4770_v9 = vpop.xlane.xlu0 %1362  ;;  %v2184_v54 = vsel %vm1541_vm6, %v4768_v55, 0.0  ;;  %v1971_v19 = vmul.f32 1.442695, %v4768_v55 }
 0x37b   : > { %2023 = vadd.xlane.f32.xlu1 %v3379_v63  ;;  %v4772_v22 = vpop.xlane.xlu1 %1364 }
 0x37c   : > { %3388 = vpow2.f32 %v1971_v19 }
 0x37e   : > { %2337 = vadd.xlane.f32.xlu0 %v2303_v1  ;;  %v1878_v11 = vpop.xlane.xlu0 %1877  ;;  %v4798_v61 = vpop.eup %3384 }
 0x37f   : > { %2227 = vadd.xlane.f32.xlu1 %v2184_v54  ;;  %v1880_v7 = vpop.xlane.xlu1 %1879  ;;  %v3387_v19 = vpop.eup %3386  ;;  %v4815_v56 = vsub.f32 %v4588_v41, %v1878_v11 }
 0x380   : > { %v4783_v52 = vsub.f32 %v4601_v53, %v1880_v7 }
 0x382   : > { %2021 = vadd.xlane.f32.xlu0 %v3381_v38  ;;  %v4785_v14 = vpop.xlane.xlu0 %1366  ;;  %v2186_v47 = vsel %vm1543_vm9, %v4783_v52, 0.0  ;;  %v1975_v7 = vmul.f32 1.442695, %v4783_v52 }
 0x383   : > { %2027 = vadd.xlane.f32.xlu1 %v3383_v17  ;;  %v4788_v49 = vpop.xlane.xlu1 %1368 }
 0x384   : > { %3390 = vpow2.f32 %v1975_v7 }
 0x386   : > { %2225 = vadd.xlane.f32.xlu0 %v2183_v10  ;;  %v1882_v53 = vpop.xlane.xlu0 %1881  ;;  %v4817_v10 = vpop.eup %3388 }
 0x387   : > { %2231 = vadd.xlane.f32.xlu1 %v2186_v47  ;;  %v1884_v39 = vpop.xlane.xlu1 %1883 }
 0x388   : > { %v4801_v1 = vsub.f32 %v4650_v33, %v1884_v39  ;;  %v5565_v39 = vld [vmem:[#allocation9_spill] sm:$0xff] }
 0x389   : > { %vm1542_vm11 = vcmp.eq.s32.totalorder %v4178_v6, %v5565_v39 }
 0x38a   : > { %2343 = vadd.xlane.f32.xlu0 %v2306_v28  ;;  %v4803_v30 = vpop.xlane.xlu0 %1370  ;;  %v2188_v26 = vsel %vm1545_vm10, %v4801_v1, 0.0  ;;  %v1979_v28 = vmul.f32 1.442695, %v4801_v1  ;;  %v2185_v11 = vsel %vm1542_vm11, %v4815_v56, 0.0 }
 0x38b   : > { %2031 = vadd.xlane.f32.xlu1 %v4798_v61  ;;  %v4806_v54 = vpop.xlane.xlu1 %1372 }
 0x38c   : > { %5562 = vst [vmem:[#allocation29_spill] sm:$0xff] %v4806_v54 }
 0x38e   : > { %2341 = vadd.xlane.f32.xlu0 %v2305_v32  ;;  %v1886_v63 = vpop.xlane.xlu0 %1885 }
 0x38f   : > { %2235 = vadd.xlane.f32.xlu1 %v2188_v26  ;;  %v1888_v33 = vpop.xlane.xlu1 %1887  ;;  %v4832_v26 = vpop.eup %3390 }
 0x390   : > { %v1934_v48 = vsub.f32 %v4378_v51, %v1888_v33  ;;  %v5566_v51 = vld [vmem:[#allocation14_spill] sm:$0xff] }
 0x391   : > { %vm1547_vm12 = vcmp.eq.s32.totalorder %v4178_v6, %v5566_v51  ;;  %v1933_v51 = vsub.f32 %v4394_v60, %v1886_v63  ;;  %v1969_v63 = vmul.f32 1.442695, %v4780_v20 }
 0x392   : > { %v1983_v47 = vmul.f32 1.442695, %v1934_v48  ;;  %2025 = vadd.xlane.f32.xlu0 %v3387_v19  ;;  %v4828_v41 = vpop.xlane.xlu0 %1374  ;;  %v2190_v7 = vsel %vm1547_vm12, %v1934_v48, 0.0  ;;  %vm2461_vm12 = vcmp.eq.s32.totalorder %v4178_v6, 0 }
 0x393   : > { %2035 = vadd.xlane.f32.xlu1 %v4817_v10  ;;  %v4821_v38 = vpop.xlane.xlu1 %1376  ;;  %5567 = vst [vmem:[#allocation6_spill] sm:$0xff] %v4828_v41 }
 0x394   : > { %5564 = vst [vmem:[#allocation5_spill] sm:$0xff] %v4821_v38  ;;  %3392 = vpow2.f32 %v1983_v47 }
 0x395   : > { %3394 = vpow2.f32 %v1965_v25  ;;  %v2307_v25 = vmul.f32 %v3387_v19, %v4732_v29 }
 0x396   : > { %2229 = vadd.xlane.f32.xlu0 %v2185_v11  ;;  %3396 = vpow2.f32 %v1979_v28  ;;  %v1890_v47 = vpop.xlane.xlu0 %1889  ;;  %v5569_v11 = vld [vmem:[#allocation16_spill] sm:$0xff] }
 0x397   : > { %2239 = vadd.xlane.f32.xlu1 %v2190_v7  ;;  %v1892_v32 = vpop.xlane.xlu1 %1891  ;;  %vm1549_vm2 = vcmp.eq.s32.totalorder %v4178_v6, %v5569_v11  ;;  %v1981_v7 = vmul.f32 1.442695, %v1933_v51 }
 0x398   : > { %v4835_v33 = vsub.f32 %v4428_v44, %v1892_v32 }
 0x399   : > { %3398 = vpow2.f32 %v1981_v7  ;;  %v1935_v7 = vsub.f32 %v4441_v0, %v1890_v47 }
 0x39a   : > { %2347 = vadd.xlane.f32.xlu0 %v2308_v31  ;;  %v2192_v18 = vsel %vm1549_vm2, %v4835_v33, 0.0  ;;  %v4848_v31 = vsub.f32 %v4641_v62, %v1882_v53  ;;  %v5573_v62 = vld [vmem:[#allocation18_spill] sm:$0xff]  ;;  %3400 = vpow2.f32 %v1969_v63  ;;  %vm2494_vm2 = vcmp.eq.s32.totalorder %v4178_v6, 1 }
 0x39b   : > { %2039 = vadd.xlane.f32.xlu1 %v4832_v26  ;;  %v4838_v39 = vpop.xlane.xlu1 %1380  ;;  %vm1551_vm13 = vcmp.eq.s32.totalorder %v4178_v6, %v5573_v62 }
 0x39c   : > { %5568 = vst [vmem:[#allocation31_spill] sm:$0xff] %v4838_v39  ;;  %v4850_v39 = vpop.xlane.xlu0 %1378 }
 0x39d   : > { %5570 = vst [vmem:[#allocation8_spill] sm:$0xff] %v4850_v39 }
 0x39e   : > { %v3393_v28 = vpop.eup %3392  ;;  %2345 = vadd.xlane.f32.xlu0 %v2307_v25 }
 0x39f   : > { %2243 = vadd.xlane.f32.xlu1 %v2192_v18  ;;  %v1896_v44 = vpop.xlane.xlu1 %1895  ;;  %v4845_v17 = vmul.f32 %v3393_v28, %v1934_v48  ;;  %v3395_v32 = vpop.eup %3394  ;;  %v5572_v48 = vld [vmem:[#allocation11_spill] sm:$0xff]  ;;  %v1987_v18 = vmul.f32 1.442695, %v4835_v33 }
 0x3a0   : > { %v4852_v60 = vpop.eup %3396  ;;  %v4855_v29 = vsub.f32 %v4467_v37, %v1896_v44  ;;  %vm1544_vm4 = vcmp.eq.s32.totalorder %v4178_v6, %v5572_v48  ;;  %v1894_v25 = vpop.xlane.xlu0 %1893  ;;  %v2310_v44 = vmul.f32 %v4798_v61, %v4752_v15  ;;  %v2309_v62 = vmul.f32 %v3395_v32, %v4749_v43 }
 0x3a1   : > { %v2187_v53 = vsel %vm1544_vm4, %v4848_v31, 0.0  ;;  %3402 = vpow2.f32 %v1987_v18  ;;  %v1985_v15 = vmul.f32 1.442695, %v1935_v7  ;;  %v1973_v43 = vmul.f32 1.442695, %v4815_v56 }
 0x3a2   : > { %2029 = vadd.xlane.f32.xlu0 %v3395_v32  ;;  %v2194_v37 = vsel %vm1551_vm13, %v4855_v29, 0.0  ;;  %v5577_v32 = vld [vmem:[#allocation13_spill] sm:$0xff]  ;;  %vm2527_vm4 = vcmp.eq.s32.totalorder %v4178_v6, 2 }
 0x3a3   : > { %2043 = vadd.xlane.f32.xlu1 %v4852_v60  ;;  %v4859_v19 = vpop.xlane.xlu1 %1384  ;;  %vm1546_vm15 = vcmp.eq.s32.totalorder %v4178_v6, %v5577_v32  ;;  %3404 = vpow2.f32 %v1985_v15 }
 0x3a4   : > { %5571 = vst [vmem:[#allocation30_spill] sm:$0xff] %v4859_v19  ;;  %v4877_v63 = vpop.xlane.xlu0 %1382  ;;  %v4881_v19 = vpop.eup %3398  ;;  %3406 = vpow2.f32 %v1973_v43 }
 0x3a5   : > { %5575 = vst [vmem:[#allocation7_spill] sm:$0xff] %v4877_v63  ;;  %v3401_v61 = vpop.eup %3400  ;;  %v2317_v0 = vmul.f32 %v4881_v19, %v1933_v51 }
 0x3a6   : > { %2233 = vadd.xlane.f32.xlu0 %v2187_v53  ;;  %v5574_v53 = vld [vmem:[#allocation20_spill] sm:$0xff]  ;;  %v2311_v15 = vmul.f32 %v3401_v61, %v4780_v20 }
 0x3a7   : > { %2247 = vadd.xlane.f32.xlu1 %v2194_v37  ;;  %v1900_v11 = vpop.xlane.xlu1 %1899  ;;  %vm1553_vm7 = vcmp.eq.s32.totalorder %v4178_v6, %v5574_v53  ;;  %v2312_v53 = vmul.f32 %v4817_v10, %v4768_v55 }
 0x3a8   : > { %v4871_v48 = vsub.f32 %v4516_v57, %v1900_v11  ;;  %v1898_v47 = vpop.xlane.xlu0 %1897  ;;  %v2189_v11 = vsel %vm1546_vm15, %v1933_v51, 0.0 }
 0x3aa   : > { %2351 = vadd.xlane.f32.xlu0 %v2310_v44  ;;  %v2196_v57 = vsel %vm1553_vm7, %v4871_v48, 0.0 }
 0x3ab   : > { %2047 = vadd.xlane.f32.xlu1 %v3393_v28  ;;  %v4879_v37 = vpop.xlane.xlu1 %1388  ;;  %v3403_v18 = vpop.eup %3402 }
 0x3ac   : > { %5576 = vst [vmem:[#allocation10_spill] sm:$0xff] %v4879_v37 }
 0x3ad   : > { %v4904_v32 = vpop.eup %3404 }
 0x3ae   : > { %2349 = vadd.xlane.f32.xlu0 %v2309_v62  ;;  %v1991_v62 = vmul.f32 1.442695, %v4855_v29 }
 0x3af   : > { %2251 = vadd.xlane.f32.xlu1 %v2196_v57  ;;  %v1904_v28 = vpop.xlane.xlu1 %1903  ;;  %v5578_v57 = vld [vmem:[#allocation22_spill] sm:$0xff] }
 0x3b0   : > { %v4889_v44 = vsub.f32 %v4552_v36, %v1904_v28  ;;  %vm1555_vm14 = vcmp.eq.s32.totalorder %v4178_v6, %v5578_v57  ;;  %v1937_v36 = vsub.f32 %v4482_v50, %v1894_v25  ;;  %3408 = vpow2.f32 %v1991_v62  ;;  %v5581_v25 = vld [vmem:[#allocation15_spill] sm:$0xff] }
 0x3b1   : > { %v2320_v28 = vmul.f32 %v3403_v18, %v4835_v33  ;;  %v1977_v57 = vmul.f32 1.442695, %v4848_v31  ;;  %vm1548_vm1 = vcmp.eq.s32.totalorder %v4178_v6, %v5581_v25  ;;  %v1995_v62 = vmul.f32 1.442695, %v4871_v48 }
 0x3b2   : > { %2033 = vadd.xlane.f32.xlu0 %v3401_v61  ;;  %v2198_v51 = vsel %vm1555_vm14, %v4889_v44, 0.0  ;;  %v1989_v10 = vmul.f32 1.442695, %v1937_v36  ;;  %v2191_v33 = vsel %vm1548_vm1, %v1935_v7, 0.0 }
 0x3b3   : > { %2365 = vadd.xlane.f32.xlu1 %v2317_v0  ;;  %v4896_v0 = vpop.xlane.xlu0 %1386  ;;  %v4901_v43 = vpop.xlane.xlu1 %1392 }
 0x3b4   : > { %5579 = vst [vmem:[#allocation12_spill] sm:$0xff] %v4896_v0  ;;  %5580 = vst [vmem:[#allocation9_spill] sm:$0xff] %v4901_v43  ;;  %3410 = vpow2.f32 %v1989_v10 }
 0x3b5   : > { %3412 = vpow2.f32 %v1977_v57 }
 0x3b6   : > { %2237 = vadd.xlane.f32.xlu0 %v2189_v11  ;;  %v3407_v11 = vpop.eup %3406  ;;  %3414 = vpow2.f32 %v1995_v62  ;;  %v2316_v62 = vmul.f32 %v4852_v60, %v4801_v1 }
 0x3b7   : > { %2051 = vadd.xlane.f32.xlu1 %v3403_v18  ;;  %v1902_v55 = vpop.xlane.xlu0 %1901  ;;  %v1908_v50 = vpop.xlane.xlu1 %1907 }
 0x3b8   : > { %v4913_v18 = vsub.f32 %v4596_v45, %v1908_v50  ;;  %v2313_v45 = vmul.f32 %v3407_v11, %v4815_v56 }
 0x3ba   : > { %2355 = vadd.xlane.f32.xlu0 %v2312_v53  ;;  %v2319_v53 = vmul.f32 %v4904_v32, %v1935_v7  ;;  %v3409_v61 = vpop.eup %3408  ;;  %v1939_v7 = vsub.f32 %v4529_v40, %v1898_v47  ;;  %v5586_v40 = vld [vmem:[#allocation17_spill] sm:$0xff] }
 0x3bb   : > { %2255 = vadd.xlane.f32.xlu1 %v2198_v51  ;;  %v4910_v20 = vpop.xlane.xlu0 %1390  ;;  %v2314_v51 = vmul.f32 %v4832_v26, %v4783_v52  ;;  %v2322_v57 = vmul.f32 %v3409_v61, %v4855_v29  ;;  %vm1550_vm0 = vcmp.eq.s32.totalorder %v4178_v6, %v5586_v40 }
 0x3bc   : > { %5582 = vst [vmem:[#allocation14_spill] sm:$0xff] %v4910_v20  ;;  %v1993_v52 = vmul.f32 1.442695, %v1939_v7  ;;  %v2193_v56 = vsel %vm1550_vm0, %v1937_v36, 0.0 }
 0x3be   : > { %2353 = vadd.xlane.f32.xlu0 %v2311_v15  ;;  %v5583_v15 = vld [vmem:[#allocation24_spill] sm:$0xff]  ;;  %v4926_v50 = vpop.eup %3410  ;;  %3416 = vpow2.f32 %v1993_v52 }
 0x3bf   : > { %2371 = vadd.xlane.f32.xlu1 %v2320_v28  ;;  %vm1557_vm3 = vcmp.eq.s32.totalorder %v4178_v6, %v5583_v15  ;;  %v1906_v10 = vpop.xlane.xlu0 %1905  ;;  %v3413_v26 = vpop.eup %3412  ;;  %v5587_v15 = vld [vmem:[#allocation26_spill] sm:$0xff] }
 0x3c0   : > { %v2200_v28 = vsel %vm1557_vm3, %v4913_v18, 0.0  ;;  %v3415_v47 = vpop.eup %3414  ;;  %vm1559_vm5 = vcmp.eq.s32.totalorder %v4178_v6, %v5587_v15 }
 0x3c1   : > { %v2324_v52 = vmul.f32 %v3415_v47, %v4871_v48 }
 0x3c2   : > { %2037 = vadd.xlane.f32.xlu0 %v3407_v11 }
 0x3c3   : > { %2369 = vadd.xlane.f32.xlu1 %v2319_v53  ;;  %v4923_v53 = vpop.xlane.xlu1 %1396  ;;  %v4928_v25 = vpop.xlane.xlu0 %1394 }
 0x3c4   : > { %5584 = vst [vmem:[#allocation16_spill] sm:$0xff] %v4923_v53  ;;  %5585 = vst [vmem:[#allocation11_spill] sm:$0xff] %v4928_v25 }
 0x3c6   : > { %2241 = vadd.xlane.f32.xlu0 %v2191_v33  ;;  %v2321_v33 = vmul.f32 %v4926_v50, %v1937_v36  ;;  %v1941_v36 = vsub.f32 %v4565_v12, %v1902_v55  ;;  %v5590_v55 = vld [vmem:[#allocation19_spill] sm:$0xff] }
 0x3c7   : > { %2055 = vadd.xlane.f32.xlu1 %v3409_v61  ;;  %v1910_v11 = vpop.xlane.xlu0 %1909  ;;  %v1999_v61 = vmul.f32 1.442695, %v4889_v44  ;;  %vm1552_vm6 = vcmp.eq.s32.totalorder %v4178_v6, %v5590_v55 }
 0x3c8   : > { %v1997_v1 = vmul.f32 1.442695, %v1941_v36 }
 0x3c9   : > { %3418 = vpow2.f32 %v1999_v61  ;;  %v5591_v61 = vld [vmem:[#allocation28_spill] sm:$0xff] }
 0x3ca   : > { %2359 = vadd.xlane.f32.xlu0 %v2314_v51  ;;  %v1912_v51 = vpop.xlane.xlu1 %1911  ;;  %3420 = vpow2.f32 %v1997_v1  ;;  %vm1561_vm8 = vcmp.eq.s32.totalorder %v4178_v6, %v5591_v61 }
 0x3cb   : > { %2259 = vadd.xlane.f32.xlu1 %v2200_v28  ;;  %v4934_v29 = vsub.f32 %v4625_v21, %v1912_v51 }
 0x3cd   : > { %v2202_v28 = vsel %vm1559_vm5, %v4934_v29, 0.0 }
 0x3ce   : > { %2357 = vadd.xlane.f32.xlu0 %v2313_v45  ;;  %v4943_v21 = vpop.xlane.xlu1 %1400  ;;  %v2315_v45 = vmul.f32 %v3413_v26, %v4848_v31  ;;  %v2195_v31 = vsel %vm1552_vm6, %v1939_v7, 0.0 }
 0x3cf   : > { %2375 = vadd.xlane.f32.xlu1 %v2322_v57  ;;  %5588 = vst [vmem:[#allocation18_spill] sm:$0xff] %v4943_v21  ;;  %v4946_v57 = vpop.xlane.xlu0 %1398 }
 0x3d0   : > { %5589 = vst [vmem:[#allocation20_spill] sm:$0xff] %v4946_v57 }
 0x3d2   : > { %2041 = vadd.xlane.f32.xlu0 %v3413_v26  ;;  %v1916_v51 = vpop.xlane.xlu1 %1915 }
 0x3d3   : > { %2373 = vadd.xlane.f32.xlu1 %v2321_v33  ;;  %v4949_v33 = vpop.eup %3416  ;;  %v4953_v12 = vpop.xlane.xlu0 %1913  ;;  %v4958_v48 = vsub.f32 %v4647_v24, %v1916_v51  ;;  %v2007_v51 = vmul.f32 1.442695, %v4934_v29 }
 0x3d4   : > { %v2323_v60 = vmul.f32 %v4949_v33, %v1939_v7  ;;  %v3419_v26 = vpop.eup %3418 }
 0x3d5   : > { %v2204_v7 = vsel %vm1561_vm8, %v4958_v48, 0.0 }
 0x3d6   : > { %2245 = vadd.xlane.f32.xlu0 %v2193_v56 }
 0x3d7   : > { %2059 = vadd.xlane.f32.xlu1 %v3415_v47  ;;  %v2003_v47 = vmul.f32 1.442695, %v4913_v18 }
 0x3d9   : > { %3422 = vpow2.f32 %v2003_v47 }
 0x3da   : > { %2363 = vadd.xlane.f32.xlu0 %v2316_v62 }
 0x3db   : > { %2263 = vadd.xlane.f32.xlu1 %v2202_v28  ;;  %v2326_v28 = vmul.f32 %v3419_v26, %v4889_v44  ;;  %v1945_v44 = vsub.f32 %v4631_v58, %v1910_v11 }
 0x3dc   : > { %v4962_v56 = vpop.xlane.xlu0 %2205 }
 0x3de   : > { %2361 = vadd.xlane.f32.xlu0 %v2315_v45  ;;  %v4975_v45 = vpop.eup %3420 }
 0x3df   : > { %2379 = vadd.xlane.f32.xlu1 %v2324_v52  ;;  %v4960_v40 = vpop.xlane.xlu1 %2207  ;;  %v2325_v1 = vmul.f32 %v4975_v45, %v1941_v36 }
 0x3e2   : > { %2045 = vadd.xlane.f32.xlu0 %v4881_v19  ;;  %v1943_v19 = vsub.f32 %v4607_v3, %v1906_v10  ;;  %v5592_v10 = vld [vmem:[#allocation21_spill] sm:$0xff] }
 0x3e3   : > { %2377 = vadd.xlane.f32.xlu1 %v2323_v60  ;;  %vm1554_vm9 = vcmp.eq.s32.totalorder %v4178_v6, %v5592_v10  ;;  %v3423_v55 = vpop.eup %3422 }
 0x3e4   : > { %v2001_v24 = vmul.f32 1.442695, %v1943_v19  ;;  %v4972_v15 = vpop.xlane.xlu1 %2211  ;;  %v2197_v52 = vsel %vm1554_vm9, %v1941_v36, 0.0  ;;  %v2005_v36 = vmul.f32 1.442695, %v1945_v44  ;;  %v2328_v11 = vmul.f32 %v3423_v55, %v4913_v18 }
 0x3e5   : > { %v1947_v18 = vsub.f32 %v4654_v34, %v4953_v12 }
 0x3e6   : > { %2249 = vadd.xlane.f32.xlu0 %v2195_v31  ;;  %3424 = vpow2.f32 %v2001_v24 }
 0x3e7   : > { %2063 = vadd.xlane.f32.xlu1 %v3419_v26  ;;  %v4970_v62 = vpop.xlane.xlu0 %2209  ;;  %v5593_v26 = vld [vmem:[#allocation23_spill] sm:$0xff] }
 0x3e8   : > { %vm1556_vm10 = vcmp.eq.s32.totalorder %v4178_v6, %v5593_v26 }
 0x3e9   : > { %v2199_v58 = vsel %vm1556_vm10, %v1943_v19, 0.0 }
 0x3ea   : > { %2367 = vadd.xlane.f32.xlu0 %v4845_v17 }
 0x3eb   : > { %2267 = vadd.xlane.f32.xlu1 %v2204_v7 }
 0x3ee   : > { %2049 = vadd.xlane.f32.xlu0 %v4904_v32 }
 0x3ef   : > { %2383 = vadd.xlane.f32.xlu1 %v2326_v28  ;;  %v4978_v3 = vpop.xlane.xlu0 %2213 }
 0x3f0   : > { %v4982_v17 = vpop.xlane.xlu1 %2215  ;;  %v3425_v61 = vpop.eup %3424 }
 0x3f2   : > { %2253 = vadd.xlane.f32.xlu0 %v2197_v52  ;;  %v5594_v52 = vld [vmem:[#allocation25_spill] sm:$0xff] }
 0x3f3   : > { %2381 = vadd.xlane.f32.xlu1 %v2325_v1  ;;  %v2014_v60 = vpop.xlane.xlu0 %2013  ;;  %vm1558_vm11 = vcmp.eq.s32.totalorder %v4178_v6, %v5594_v52 }
 0x3f4   : > { %3426 = vlog2.f32 %v2014_v60  ;;  %v4987_v32 = vpop.xlane.xlu1 %2015 }
 0x3f5   : > { %3428 = vrcp.f32 %v2014_v60 }
 0x3f6   : > { %2053 = vadd.xlane.f32.xlu0 %v4926_v50  ;;  %3430 = vpow2.f32 %v2007_v51  ;;  %v2327_v50 = vmul.f32 %v3425_v61, %v1943_v19  ;;  %v2011_v51 = vmul.f32 1.442695, %v4958_v48 }
 0x3f7   : > { %2067 = vadd.xlane.f32.xlu1 %v3423_v55  ;;  %v4990_v31 = vpop.xlane.xlu0 %2217  ;;  %3432 = vpow2.f32 %v2005_v36 }
 0x3f8   : > { %v4994_v47 = vpop.xlane.xlu1 %2219 }
 0x3fa   : > { %2257 = vadd.xlane.f32.xlu0 %v2199_v58 }
 0x3fb   : > { %2387 = vadd.xlane.f32.xlu1 %v2328_v11  ;;  %v2334_v7 = vpop.xlane.xlu0 %2333  ;;  %v2009_v11 = vmul.f32 1.442695, %v1947_v18 }
 0x3fc   : > { %v4997_v24 = vpop.xlane.xlu1 %2335 }
 0x3fe   : > { %v3427_v28 = vpop.eup %3426  ;;  %2057 = vadd.xlane.f32.xlu0 %v4949_v33  ;;  %v2201_v33 = vsel %vm1558_vm11, %v1945_v44, 0.0 }
 0x3ff   : > { %v3429_v10 = vpop.eup %3428  ;;  %v2078_v1 = vmul.f32 0.6931472, %v3427_v28  ;;  %2385 = vadd.xlane.f32.xlu1 %v2327_v50  ;;  %v5002_v60 = vpop.xlane.xlu0 %2017 }
 0x400   : > { %v2397_v55 = vmul.f32 %v3429_v10, %v2334_v7  ;;  %v2020_v26 = vpop.xlane.xlu1 %2019  ;;  %v3431_v36 = vpop.eup %3430 }
 0x401   : > { %v2269_v19 = vsub.f32 %v4962_v56, %v2078_v1  ;;  %3434 = vlog2.f32 %v2020_v26  ;;  %v2330_v50 = vmul.f32 %v3431_v36, %v4934_v29  ;;  %v3433_v10 = vpop.eup %3432 }
 0x402   : > { %2261 = vadd.xlane.f32.xlu0 %v2201_v33  ;;  %v2429_v58 = vsub.f32 %v2078_v1, %v2397_v55  ;;  %3436 = vrcp.f32 %v2020_v26  ;;  %v5595_v1 = vld [vmem:[#allocation27_spill] sm:$0xff]  ;;  %v2329_v26 = vmul.f32 %v3433_v10, %v1945_v44 }
 0x403   : > { %2071 = vadd.xlane.f32.xlu1 %v3431_v36  ;;  %v5011_v34 = vpop.xlane.xlu0 %2221  ;;  %v2462_v12 = vsel %vm2461_vm12, %v2269_v19, 0.0  ;;  %3438 = vpow2.f32 %v2011_v51  ;;  %vm1560_vm13 = vcmp.eq.s32.totalorder %v4178_v6, %v5595_v1 }
 0x404   : > { %v5015_v7 = vpop.xlane.xlu1 %2223  ;;  %v2495_v56 = vsel %vm2494_vm2, %v4693_v2, %v2462_v12  ;;  %3440 = vpow2.f32 %v2009_v11  ;;  %v2203_v55 = vsel %vm1560_vm13, %v1947_v18, 0.0 }
 0x405   : > { %v5023_v28 = vsel %vm2527_vm4, %v2429_v58, %v2495_v56  ;;  %3442 = vlog2.f32 %v4987_v32 }
 0x406   : > { %2061 = vadd.xlane.f32.xlu0 %v4975_v45  ;;  %3444 = vlog2.f32 %v5002_v60 }
 0x407   : > { %2391 = vadd.xlane.f32.xlu1 %v2330_v50  ;;  %v2340_v52 = vpop.xlane.xlu0 %2339  ;;  %3446 = vrcp.f32 %v4987_v32 }
 0x408   : > { %v5028_v51 = vpop.xlane.xlu1 %2023  ;;  %3448 = vrcp.f32 %v5002_v60 }
 0x40a   : > { %2265 = vadd.xlane.f32.xlu0 %v2203_v55 }
 0x40b   : > { %2389 = vadd.xlane.f32.xlu1 %v2329_v26  ;;  %v5030_v2 = vpop.xlane.xlu0 %2337  ;;  %v3435_v29 = vpop.eup %3434 }
 0x40c   : > { %v5032_v19 = vpop.xlane.xlu1 %2227  ;;  %v3437_v33 = vpop.eup %3436  ;;  %v2084_v36 = vmul.f32 0.6931472, %v3435_v29 }
 0x40d   : > { %v3439_v45 = vpop.eup %3438  ;;  %v2400_v58 = vmul.f32 %v3437_v33, %v2340_v52 }
 0x40e   : > { %2065 = vadd.xlane.f32.xlu0 %v3425_v61  ;;  %v2272_v12 = vsub.f32 %v4972_v15, %v2084_v36  ;;  %v2332_v44 = vmul.f32 %v3439_v45, %v4958_v48  ;;  %v3441_v55 = vpop.eup %3440 }
 0x40f   : > { %2075 = vadd.xlane.f32.xlu1 %v3439_v45  ;;  %v2022_v11 = vpop.xlane.xlu0 %2021  ;;  %v2432_v50 = vsub.f32 %v2084_v36, %v2400_v58  ;;  %v2331_v29 = vmul.f32 %v3441_v55, %v1947_v18  ;;  %v3443_v57 = vpop.eup %3442 }
 0x410   : > { %v5035_v56 = vpop.xlane.xlu1 %2027  ;;  %v2465_v1 = vsel %vm2461_vm12, %v2272_v12, 0.0  ;;  %3450 = vlog2.f32 %v2022_v11  ;;  %v2080_v25 = vmul.f32 0.6931472, %v3443_v57  ;;  %v3445_v20 = vpop.eup %3444 }
 0x411   : > { %v2498_v26 = vsel %vm2494_vm2, %v4689_v5, %v2465_v1  ;;  %3452 = vlog2.f32 %v5028_v51  ;;  %v2082_v32 = vmul.f32 0.6931472, %v3445_v20  ;;  %v3447_v39 = vpop.eup %3446 }
 0x412   : > { %2069 = vadd.xlane.f32.xlu0 %v3433_v10  ;;  %v5047_v15 = vsel %vm2527_vm4, %v2432_v50, %v2498_v26  ;;  %v2270_v0 = vsub.f32 %v4960_v40, %v2080_v25  ;;  %3454 = vrcp.f32 %v2022_v11  ;;  %v2398_v57 = vmul.f32 %v3447_v39, %v4997_v24 }
 0x413   : > { %2395 = vadd.xlane.f32.xlu1 %v2332_v44  ;;  %v5043_v61 = vpop.xlane.xlu0 %2225  ;;  %v2271_v38 = vsub.f32 %v4970_v62, %v2082_v32 }
 0x414   : > { %v5049_v52 = vpop.xlane.xlu1 %2231  ;;  %v2463_v40 = vsel %vm2461_vm12, %v2270_v0, 0.0  ;;  %v2430_v24 = vsub.f32 %v2080_v25, %v2398_v57 }
 0x415   : > { %v2496_v39 = vsel %vm2494_vm2, %v4683_v4, %v2463_v40  ;;  %v2464_v0 = vsel %vm2461_vm12, %v2271_v38, 0.0 }
 0x416   : > { %2073 = vadd.xlane.f32.xlu0 %v3441_v55  ;;  %v2497_v4 = vsel %vm2494_vm2, %v4704_v23, %v2464_v0 }
 0x417   : > { %2393 = vadd.xlane.f32.xlu1 %v2331_v29  ;;  %v5051_v48 = vpop.xlane.xlu0 %2343 }
 0x418   : > { %v5053_v33 = vpop.xlane.xlu1 %2031 }
 0x41b   : > { %v2342_v10 = vpop.xlane.xlu0 %2341 }
 0x41c   : > { %v5055_v36 = vpop.xlane.xlu1 %2235 }
 0x41f   : > { %v2026_v5 = vpop.xlane.xlu0 %2025 }
 0x420   : > { %v5057_v45 = vpop.xlane.xlu1 %2035  ;;  %3456 = vlog2.f32 %v2026_v5 }
 0x421   : > { %3458 = vrcp.f32 %v5028_v51 }
 0x422   : > { %3460 = vlog2.f32 %v5035_v56 }
 0x423   : > { %v5059_v58 = vpop.xlane.xlu0 %2229  ;;  %3462 = vrcp.f32 %v2026_v5 }
 0x424   : > { %v5061_v12 = vpop.xlane.xlu1 %2239 }
 0x427   : > { %v5063_v50 = vpop.xlane.xlu0 %2347 }
 0x428   : > { %v5065_v44 = vpop.xlane.xlu1 %2039 }
 0x42b   : > { %v5068_v18 = vpop.xlane.xlu0 %2345 }
 0x42c   : > { %v5070_v1 = vpop.xlane.xlu1 %2243 }
 0x42d   : > { %5596 = vst [vmem:[#allocation13_spill] sm:$0xff] %v5070_v1 }
 0x42f   : > { %v2030_v55 = vpop.xlane.xlu0 %2029 }
 0x430   : > { %v5073_v26 = vpop.xlane.xlu1 %2043  ;;  %3464 = vlog2.f32 %v2030_v55 }
 0x431   : > { %3466 = vrcp.f32 %v5035_v56 }
 0x432   : > { %3468 = vlog2.f32 %v5053_v33 }
 0x433   : > { %v5076_v29 = vpop.xlane.xlu0 %2233  ;;  %3470 = vrcp.f32 %v2030_v55 }
 0x434   : > { %v5078_v21 = vpop.xlane.xlu1 %2247 }
 0x435   : > { %5597 = vst [vmem:[#allocation22_spill] sm:$0xff] %v5078_v21  ;;  %v3449_v21 = vpop.eup %3448 }
 0x436   : > { %v3451_v1 = vpop.eup %3450  ;;  %v2399_v20 = vmul.f32 %v3449_v21, %v5030_v2 }
 0x437   : > { %v5081_v53 = vpop.xlane.xlu0 %2351  ;;  %v2086_v62 = vmul.f32 0.6931472, %v3451_v1  ;;  %v3453_v21 = vpop.eup %3452 }
 0x438   : > { %v5083_v43 = vpop.xlane.xlu1 %2047  ;;  %v2431_v51 = vsub.f32 %v2082_v32, %v2399_v20  ;;  %v3455_v2 = vpop.eup %3454  ;;  %v2088_v5 = vmul.f32 0.6931472, %v3453_v21 }
 0x439   : > { %v2273_v25 = vsub.f32 %v4978_v3, %v2086_v62  ;;  %v3457_v38 = vpop.eup %3456  ;;  %v2401_v57 = vmul.f32 %v3455_v2, %v2342_v10 }
 0x43a   : > { %v2530_v32 = vsel %vm2527_vm4, %v2431_v51, %v2497_v4  ;;  %v2090_v20 = vmul.f32 0.6931472, %v3457_v38  ;;  %v3459_v3 = vpop.eup %3458 }
 0x43b   : > { %v5085_v37 = vpop.xlane.xlu0 %2349  ;;  %v2466_v23 = vsel %vm2461_vm12, %v2273_v25, 0.0  ;;  %v3461_v10 = vpop.eup %3460  ;;  %v2402_v0 = vmul.f32 %v3459_v3, %v5051_v48  ;;  %v2433_v21 = vsub.f32 %v2086_v62, %v2401_v57 }
 0x43c   : > { %v5089_v63 = vpop.xlane.xlu1 %2251  ;;  %v3463_v56 = vpop.eup %3462  ;;  %v2275_v2 = vsub.f32 %v4990_v31, %v2090_v20  ;;  %v2092_v62 = vmul.f32 0.6931472, %v3461_v10 }
 0x43d   : > { %5598 = vst [vmem:[#allocation15_spill] sm:$0xff] %v5089_v63  ;;  %v2434_v48 = vsub.f32 %v2088_v5, %v2402_v0  ;;  %v2403_v25 = vmul.f32 %v3463_v56, %v5068_v18 }
 0x43e   : > { %v2468_v57 = vsel %vm2461_vm12, %v2275_v2, 0.0 }
 0x43f   : > { %v5091_v60 = vpop.xlane.xlu0 %2033  ;;  %v2435_v3 = vsub.f32 %v2090_v20, %v2403_v25 }
 0x440   : > { %v5095_v41 = vpop.xlane.xlu1 %2365  ;;  %3472 = vlog2.f32 %v5091_v60 }
 0x441   : > { %3474 = vrcp.f32 %v5053_v33  ;;  %v2276_v33 = vsub.f32 %v4994_v47, %v2092_v62 }
 0x442   : > { %3476 = vlog2.f32 %v5057_v45 }
 0x443   : > { %2560 = vxpose.xlu0.b32.start [1/16] (narrow) %v5023_v28, 8  ;;  %v5102_v11 = vpop.xlane.xlu0 %2237  ;;  %v2529_v28 = vsel %vm2527_vm4, %v2430_v24, %v2496_v39  ;;  %v2274_v24 = vsub.f32 %v4982_v17, %v2088_v5  ;;  %v3465_v17 = vpop.eup %3464  ;;  %3478 = vrcp.f32 %v5091_v60  ;;  %v2501_v60 = vsel %vm2494_vm2, %v4724_v8, %v2468_v57 }
 0x444   : > { %v5108_v63 = vpop.xlane.xlu1 %2051  ;;  %v3467_v5 = vpop.eup %3466  ;;  %v2469_v2 = vsel %vm2461_vm12, %v2276_v33, 0.0 }
 0x445   : > { %v2467_v55 = vsel %vm2461_vm12, %v2274_v24, 0.0 }
 0x446   : > { %v2500_v18 = vsel %vm2494_vm2, %v4711_v59, %v2467_v55 }
 0x447   : > { %2561 = vxpose.xlu0.b32.cont [2/16] (narrow) %v2529_v28, 8  ;;  %v5114_v54 = vpop.xlane.xlu0 %2355  ;;  %v2499_v28 = vsel %vm2494_vm2, %v4709_v35, %v2466_v23  ;;  %v2094_v35 = vmul.f32 0.6931472, %v3465_v17  ;;  %v2404_v23 = vmul.f32 %v3467_v5, %v5063_v50  ;;  %v2533_v24 = vsel %vm2527_vm4, %v2434_v48, %v2500_v18 }
 0x448   : > { %v5120_v1 = vpop.xlane.xlu1 %2255 }
 0x449   : > { %v2277_v59 = vsub.f32 %v5011_v34, %v2094_v35  ;;  %v2436_v50 = vsub.f32 %v2092_v62, %v2404_v23  ;;  %v2502_v62 = vsel %vm2494_vm2, %v4728_v46, %v2469_v2 }
 0x44b   : > { %2562 = vxpose.xlu0.b32.cont [3/16] (narrow) %v2530_v32, 8  ;;  %v5125_v40 = vpop.xlane.xlu0 %2353  ;;  %v3469_v32 = vpop.eup %3468  ;;  %v2470_v55 = vsel %vm2461_vm12, %v2277_v59, 0.0  ;;  %v2535_v57 = vsel %vm2527_vm4, %v2436_v50, %v2502_v62 }
 0x44c   : > { %v5128_v39 = vpop.xlane.xlu1 %2371  ;;  %v3471_v10 = vpop.eup %3470  ;;  %v2096_v56 = vmul.f32 0.6931472, %v3469_v32  ;;  %v2503_v32 = vsel %vm2494_vm2, %v4742_v16, %v2470_v55 }
 0x44d   : > { %v3473_v47 = vpop.eup %3472  ;;  %v2405_v20 = vmul.f32 %v3471_v10, %v5085_v37 }
 0x44e   : > { %v2098_v8 = vmul.f32 0.6931472, %v3473_v47  ;;  %v3475_v48 = vpop.eup %3474  ;;  %v2278_v37 = vsub.f32 %v5015_v7, %v2096_v56 }
 0x44f   : > { %2563 = vxpose.xlu0.b32.cont [4/16] (narrow) %v5047_v15, 8  ;;  %v2038_v51 = vpop.xlane.xlu0 %2037  ;;  %v2532_v15 = vsel %vm2527_vm4, %v2433_v21, %v2499_v28  ;;  %v2534_v28 = vsel %vm2527_vm4, %v2435_v3, %v2501_v60  ;;  %v3477_v25 = vpop.eup %3476 }
 0x450   : > { %v5140_v4 = vpop.xlane.xlu1 %2369  ;;  %3480 = vlog2.f32 %v2038_v51  ;;  %v3479_v5 = vpop.eup %3478  ;;  %v2279_v7 = vsub.f32 %v5043_v61, %v2098_v8  ;;  %v2100_v33 = vmul.f32 0.6931472, %v3477_v25 }
 0x451   : > { %3482 = vrcp.f32 %v5057_v45  ;;  %v2406_v45 = vmul.f32 %v3475_v48, %v5081_v53  ;;  %v2471_v53 = vsel %vm2461_vm12, %v2278_v37, 0.0  ;;  %v2407_v23 = vmul.f32 %v3479_v5, %v5125_v40 }
 0x452   : > { %3484 = vlog2.f32 %v5065_v44  ;;  %v2472_v10 = vsel %vm2461_vm12, %v2279_v7, 0.0  ;;  %v2504_v40 = vsel %vm2494_vm2, %v4745_v42, %v2471_v53 }
 0x453   : > { %2564 = vxpose.xlu0.b32.cont [5/16] (narrow) %v2532_v15, 8  ;;  %v5148_v38 = vpop.xlane.xlu0 %2241  ;;  %3486 = vrcp.f32 %v2038_v51  ;;  %v2437_v15 = vsub.f32 %v2094_v35, %v2405_v20  ;;  %v2438_v35 = vsub.f32 %v2096_v56, %v2406_v45  ;;  %v2439_v56 = vsub.f32 %v2098_v8, %v2407_v23 }
 0x454   : > { %v5151_v31 = vpop.xlane.xlu1 %2055  ;;  %v2505_v2 = vsel %vm2494_vm2, %v4754_v27, %v2472_v10 }
 0x455   : > { %v2536_v3 = vsel %vm2527_vm4, %v2437_v15, %v2503_v32  ;;  %v2537_v50 = vsel %vm2527_vm4, %v2438_v35, %v2504_v40 }
 0x457   : > { %2565 = vxpose.xlu0.b32.cont [6/16] (narrow) %v2533_v24, 8  ;;  %v5163_v0 = vpop.xlane.xlu0 %2359 }
 0x458   : > { %v5169_v21 = vpop.xlane.xlu1 %2259 }
 0x45a   : > { %v3481_v46 = vpop.eup %3480 }
 0x45b   : > { %2566 = vxpose.xlu0.b32.cont [7/16] (narrow) %v2534_v28, 8  ;;  %v2358_v17 = vpop.xlane.xlu0 %2357  ;;  %v2102_v61 = vmul.f32 0.6931472, %v3481_v46  ;;  %v3483_v60 = vpop.eup %3482 }
 0x45c   : > { %v5178_v34 = vpop.xlane.xlu1 %2375  ;;  %v3485_v59 = vpop.eup %3484  ;;  %v2408_v47 = vmul.f32 %v3483_v60, %v5114_v54  ;;  %v2538_v54 = vsel %vm2527_vm4, %v2439_v56, %v2505_v2 }
 0x45d   : > { %v3487_v20 = vpop.eup %3486  ;;  %v2281_v55 = vsub.f32 %v5059_v58, %v2102_v61  ;;  %v2104_v42 = vmul.f32 0.6931472, %v3485_v59 }
 0x45e   : > { %v2409_v62 = vmul.f32 %v3487_v20, %v2358_v17 }
 0x45f   : > { %2567 = vxpose.xlu0.b32.cont [8/16] (narrow) %v2535_v57, 8  ;;  %v2042_v18 = vpop.xlane.xlu0 %2041  ;;  %v2474_v45 = vsel %vm2461_vm12, %v2281_v55, 0.0  ;;  %v2282_v17 = vsub.f32 %v5049_v52, %v2104_v42 }
 0x460   : > { %3488 = vlog2.f32 %v2042_v18  ;;  %v5193_v51 = vpop.xlane.xlu1 %2373  ;;  %v2507_v53 = vsel %vm2494_vm2, %v4770_v9, %v2474_v45 }
 0x461   : > { %3490 = vrcp.f32 %v5065_v44  ;;  %v2280_v44 = vsub.f32 %v5032_v19, %v2100_v33  ;;  %v2440_v19 = vsub.f32 %v2100_v33, %v2408_v47 }
 0x462   : > { %3492 = vlog2.f32 %v5073_v26 }
 0x463   : > { %2568 = vxpose.xlu0.b32.cont [9/16] (narrow) %v2536_v3, 8  ;;  %v5201_v16 = vpop.xlane.xlu0 %2245  ;;  %3494 = vrcp.f32 %v2042_v18  ;;  %v2473_v8 = vsel %vm2461_vm12, %v2280_v44, 0.0  ;;  %v2441_v18 = vsub.f32 %v2102_v61, %v2409_v62 }
 0x464   : > { %v5204_v24 = vpop.xlane.xlu1 %2059  ;;  %3496 = vrcp.f32 %v5073_v26  ;;  %v2506_v57 = vsel %vm2494_vm2, %v4757_v13, %v2473_v8 }
 0x465   : > { %3498 = vlog2.f32 %v5083_v43  ;;  %v2539_v32 = vsel %vm2527_vm4, %v2440_v19, %v2506_v57  ;;  %v2540_v3 = vsel %vm2527_vm4, %v2441_v18, %v2507_v53 }
 0x467   : > { %2569 = vxpose.xlu0.b32.cont [10/16] (narrow) %v2537_v50, 8  ;;  %v2364_v28 = vpop.xlane.xlu0 %2363 }
 0x468   : > { %v5219_v48 = vpop.xlane.xlu1 %2263 }
 0x46a   : > { %v3489_v37 = vpop.eup %3488 }
 0x46b   : > { %2570 = vxpose.xlu0.b32.cont [11/16] (narrow) %v2538_v54, 8  ;;  %v2362_v25 = vpop.xlane.xlu0 %2361  ;;  %v2106_v27 = vmul.f32 0.6931472, %v3489_v37  ;;  %v3491_v15 = vpop.eup %3490 }
 0x46c   : > { %v5227_v58 = vpop.xlane.xlu1 %2379  ;;  %v3493_v5 = vpop.eup %3492  ;;  %v2410_v26 = vmul.f32 %v3491_v15, %v5163_v0  ;;  %v2475_v0 = vsel %vm2461_vm12, %v2282_v17, 0.0 }
 0x46d   : > { %v3495_v7 = vpop.eup %3494  ;;  %v2283_v52 = vsub.f32 %v5076_v29, %v2106_v27  ;;  %v2108_v13 = vmul.f32 0.6931472, %v3493_v5 }
 0x46e   : > { %v2442_v33 = vsub.f32 %v2104_v42, %v2410_v26  ;;  %v2411_v23 = vmul.f32 %v3495_v7, %v2362_v25  ;;  %v3497_v10 = vpop.eup %3496 }
 0x46f   : > { %2571 = vxpose.xlu0.b32.cont [12/16] (narrow) %v2539_v32, 8  ;;  %v2046_v46 = vpop.xlane.xlu0 %2045  ;;  %v2476_v29 = vsel %vm2461_vm12, %v2283_v52, 0.0  ;;  %v2284_v60 = vsub.f32 %v5055_v36, %v2108_v13  ;;  %v3499_v40 = vpop.eup %3498  ;;  %v2412_v59 = vmul.f32 %v3497_v10, %v2364_v28 }
 0x470   : > { %3500 = vlog2.f32 %v2046_v46  ;;  %v5242_v35 = vpop.xlane.xlu1 %2377  ;;  %v2443_v44 = vsub.f32 %v2106_v27, %v2411_v23  ;;  %v2509_v50 = vsel %vm2494_vm2, %v4785_v14, %v2476_v29  ;;  %v2112_v2 = vmul.f32 0.6931472, %v3499_v40 }
 0x471   : > { %3502 = vrcp.f32 %v2046_v46  ;;  %v2477_v36 = vsel %vm2461_vm12, %v2284_v60, 0.0  ;;  %v5599_v46 = vld [vmem:[#allocation29_spill] sm:$0xff] }
 0x472   : > { %3504 = vrcp.f32 %v5083_v43  ;;  %v2508_v43 = vsel %vm2494_vm2, %v4772_v22, %v2475_v0  ;;  %v2444_v22 = vsub.f32 %v2108_v13, %v2412_v59  ;;  %v2542_v28 = vsel %vm2527_vm4, %v2443_v44, %v2509_v50  ;;  %v5600_v0 = vld [vmem:[#allocation13_spill] sm:$0xff] }
 0x473   : > { %2572 = vxpose.xlu0.b32.cont [13/16] (narrow) %v2540_v3, 8  ;;  %v5249_v61 = vpop.xlane.xlu0 %2249  ;;  %3506 = vlog2.f32 %v5108_v63  ;;  %v2541_v47 = vsel %vm2527_vm4, %v2442_v33, %v2508_v43  ;;  %v2510_v8 = vsel %vm2494_vm2, %v4788_v49, %v2477_v36  ;;  %v2286_v27 = vsub.f32 %v5061_v12, %v2112_v2  ;;  %v5601_v36 = vld [vmem:[#allocation6_spill] sm:$0xff] }
 0x474   : > { %v5251_v9 = vpop.xlane.xlu1 %2063  ;;  %3508 = vrcp.f32 %v5108_v63  ;;  %v2543_v63 = vsel %vm2527_vm4, %v2444_v22, %v2510_v8 }
 0x475   : > { %v2479_v26 = vsel %vm2461_vm12, %v2286_v27, 0.0 }
 0x477   : > { %2573 = vxpose.xlu0.b32.cont [14/16] (narrow) %v2541_v47, 8  ;;  %v2368_v56 = vpop.xlane.xlu0 %2367 }
 0x478   : > { %v5265_v20 = vpop.xlane.xlu1 %2267 }
 0x47a   : > { %v3501_v55 = vpop.eup %3500 }
 0x47b   : > { %v3503_v42 = vpop.eup %3502  ;;  %v2110_v37 = vmul.f32 0.6931472, %v3501_v55  ;;  %2574 = vxpose.xlu0.b32.cont [15/16] (narrow) %v2542_v28, 8  ;;  %v2050_v19 = vpop.xlane.xlu0 %2049 }
 0x47c   : > { %v3505_v62 = vpop.eup %3504  ;;  %v2413_v14 = vmul.f32 %v3503_v42, %v5095_v41  ;;  %3510 = vlog2.f32 %v2050_v19  ;;  %v5273_v54 = vpop.xlane.xlu1 %2383 }
 0x47d   : > { %v2285_v25 = vsub.f32 %v5102_v11, %v2110_v37  ;;  %v2414_v45 = vmul.f32 %v3505_v62, %v2368_v56  ;;  %3512 = vrcp.f32 %v2050_v19  ;;  %v3507_v15 = vpop.eup %3506  ;;  %v5603_v19 = vld [vmem:[#allocation22_spill] sm:$0xff] }
 0x47e   : > { %3514 = vlog2.f32 %v5151_v31  ;;  %v2445_v41 = vsub.f32 %v2110_v37, %v2413_v14  ;;  %v2116_v18 = vmul.f32 0.6931472, %v3507_v15  ;;  %v3509_v53 = vpop.eup %3508 }
 0x47f   : > { %2575 = vxpose.xlu0.b32.end [16/16] (narrow) %v2543_v63, 8  ;;  %v5283_v17 = vpop.xlane.xlu0 %2253  ;;  %v2478_v57 = vsel %vm2461_vm12, %v2285_v25, 0.0  ;;  %v2446_v11 = vsub.f32 %v2112_v2, %v2414_v45  ;;  %3516 = vrcp.f32 %v5151_v31  ;;  %v2416_v40 = vmul.f32 %v3509_v53, %v5128_v39 }
 0x480   : > { %v5287_v49 = vpop.xlane.xlu1 %2381  ;;  %v2511_v12 = vsel %vm2494_vm2, %v4803_v30, %v2478_v57  ;;  %3518 = vlog2.f32 %v5204_v24  ;;  %v2512_v30 = vsel %vm2494_vm2, %v5599_v46, %v2479_v26  ;;  %v2288_v33 = vsub.f32 %v5600_v0, %v2116_v18 }
 0x481   : > { %v2544_v5 = vsel %vm2527_vm4, %v2445_v41, %v2511_v12  ;;  %v2545_v52 = vsel %vm2527_vm4, %v2446_v11, %v2512_v30  ;;  %v2448_v37 = vsub.f32 %v2116_v18, %v2416_v40  ;;  %v5606_v30 = vld [vmem:[#allocation31_spill] sm:$0xff] }
 0x482   : > { %2592 = vxpose.xlu1.b32.start [1/16] (narrow) %v2544_v5, 8  ;;  %v2481_v59 = vsel %vm2461_vm12, %v2288_v33, 0.0 }
 0x483   : > { %v2054_v32 = vpop.xlane.xlu0 %2053 }
 0x484   : > { %3520 = vlog2.f32 %v2054_v32  ;;  %v5298_v7 = vpop.xlane.xlu1 %2067 }
 0x485   : > { %3522 = vrcp.f32 %v2054_v32  ;;  %v5605_v32 = vld [vmem:[#allocation15_spill] sm:$0xff] }
 0x486   : > { %v3511_v13 = vpop.eup %3510  ;;  %2593 = vxpose.xlu1.b32.cont [2/16] (narrow) %v2545_v52, 8  ;;  %3524 = vrcp.f32 %v5204_v24  ;;  %v5602_v24 = vld [vmem:[#allocation5_spill] sm:$0xff] }
 0x487   : > { %v3513_v31 = vpop.eup %3512  ;;  %v2114_v23 = vmul.f32 0.6931472, %v3511_v13  ;;  %v5306_v3 = vpop.xlane.xlu0 %2257  ;;  %v2514_v28 = vsel %vm2494_vm2, %v5602_v24, %v2481_v59 }
 0x488   : > { %v3515_v29 = vpop.eup %3514  ;;  %v2415_v10 = vmul.f32 %v3513_v31, %v5140_v4  ;;  %v5309_v60 = vpop.xlane.xlu1 %2387  ;;  %v2547_v63 = vsel %vm2527_vm4, %v2448_v37, %v2514_v28 }
 0x489   : > { %v2287_v43 = vsub.f32 %v5148_v38, %v2114_v23  ;;  %v2120_v44 = vmul.f32 0.6931472, %v3515_v29  ;;  %v3517_v2 = vpop.eup %3516 }
 0x48a   : > { %v2447_v47 = vsub.f32 %v2114_v23, %v2415_v10  ;;  %v3519_v39 = vpop.eup %3518  ;;  %v2418_v15 = vmul.f32 %v3517_v2, %v5178_v34 }
 0x48b   : > { %v2058_v56 = vpop.xlane.xlu0 %2057  ;;  %v2480_v50 = vsel %vm2461_vm12, %v2287_v43, 0.0  ;;  %v2290_v62 = vsub.f32 %v5603_v19, %v2120_v44  ;;  %v2124_v41 = vmul.f32 0.6931472, %v3519_v39 }
 0x48c   : > { %3526 = vlog2.f32 %v2058_v56  ;;  %v5318_v4 = vpop.xlane.xlu1 %2385  ;;  %v2513_v38 = vsel %vm2494_vm2, %v5601_v36, %v2480_v50  ;;  %v2450_v13 = vsub.f32 %v2120_v44, %v2418_v15 }
 0x48d   : > { %3528 = vrcp.f32 %v2058_v56  ;;  %v2546_v55 = vsel %vm2527_vm4, %v2447_v47, %v2513_v38  ;;  %v2292_v46 = vsub.f32 %v5605_v32, %v2124_v41 }
 0x48e   : > { %v3521_v22 = vpop.eup %3520  ;;  %3530 = vlog2.f32 %v5251_v9  ;;  %2594 = vxpose.xlu1.b32.cont [3/16] (narrow) %v2546_v55, 8 }
 0x48f   : > { %v3523_v42 = vpop.eup %3522  ;;  %v2118_v14 = vmul.f32 0.6931472, %v3521_v22  ;;  %v5330_v8 = vpop.xlane.xlu0 %2261  ;;  %3532 = vlog2.f32 %v5298_v7  ;;  %v2485_v40 = vsel %vm2461_vm12, %v2292_v46, 0.0 }
 0x490   : > { %v2417_v25 = vmul.f32 %v3523_v42, %v5193_v51  ;;  %v5334_v45 = vpop.xlane.xlu1 %2071  ;;  %v2483_v51 = vsel %vm2461_vm12, %v2290_v62, 0.0  ;;  %v3525_v26 = vpop.eup %3524 }
 0x491   : > { %v2289_v27 = vsub.f32 %v5201_v16, %v2118_v14  ;;  %v5604_v16 = vld [vmem:[#allocation8_spill] sm:$0xff]  ;;  %v2516_v53 = vsel %vm2494_vm2, %v5606_v30, %v2483_v51  ;;  %v2420_v43 = vmul.f32 %v3525_v26, %v5227_v58  ;;  %v5610_v51 = vld [vmem:[#allocation10_spill] sm:$0xff] }
 0x492   : > { %2595 = vxpose.xlu1.b32.cont [4/16] (narrow) %v2547_v63, 8  ;;  %v2449_v57 = vsub.f32 %v2118_v14, %v2417_v25 }
 0x493   : > { %v2062_v12 = vpop.xlane.xlu0 %2061  ;;  %v2482_v11 = vsel %vm2461_vm12, %v2289_v27, 0.0  ;;  %v2452_v55 = vsub.f32 %v2124_v41, %v2420_v43  ;;  %v5609_v41 = vld [vmem:[#allocation12_spill] sm:$0xff] }
 0x494   : > { %3534 = vlog2.f32 %v2062_v12  ;;  %v2515_v5 = vsel %vm2494_vm2, %v5604_v16, %v2482_v11  ;;  %v5354_v33 = vpop.xlane.xlu1 %2391 }
 0x495   : > { %3536 = vrcp.f32 %v2062_v12  ;;  %v2548_v34 = vsel %vm2527_vm4, %v2449_v57, %v2515_v5 }
 0x496   : > { %v3527_v18 = vpop.eup %3526  ;;  %3538 = vrcp.f32 %v5251_v9  ;;  %2596 = vxpose.xlu1.b32.cont [5/16] (narrow) %v2548_v34, 8  ;;  %v2549_v9 = vsel %vm2527_vm4, %v2450_v13, %v2516_v53 }
 0x497   : > { %v3529_v52 = vpop.eup %3528  ;;  %v2122_v0 = vmul.f32 0.6931472, %v3527_v18  ;;  %v5356_v31 = vpop.xlane.xlu0 %2265  ;;  %3540 = vrcp.f32 %v5298_v7  ;;  %v5608_v7 = vld [vmem:[#allocation30_spill] sm:$0xff] }
 0x498   : > { %v3531_v23 = vpop.eup %3530  ;;  %v2419_v29 = vmul.f32 %v3529_v52, %v5242_v35  ;;  %v5607_v35 = vld [vmem:[#allocation7_spill] sm:$0xff]  ;;  %v5371_v2 = vpop.xlane.xlu1 %2389  ;;  %v2518_v38 = vsel %vm2494_vm2, %v5608_v7, %v2485_v40  ;;  %v5612_v40 = vld [vmem:[#allocation9_spill] sm:$0xff] }
 0x499   : > { %v2291_v10 = vsub.f32 %v5249_v61, %v2122_v0  ;;  %v2128_v59 = vmul.f32 0.6931472, %v3531_v23  ;;  %v3533_v50 = vpop.eup %3532  ;;  %v2551_v62 = vsel %vm2527_vm4, %v2452_v55, %v2518_v38  ;;  %v5613_v7 = vld [vmem:[#allocation11_spill] sm:$0xff] }
 0x49a   : > { %2597 = vxpose.xlu1.b32.cont [6/16] (narrow) %v2549_v9, 8  ;;  %v2451_v44 = vsub.f32 %v2122_v0, %v2419_v29  ;;  %v2132_v14 = vmul.f32 0.6931472, %v3533_v50  ;;  %v5611_v29 = vld [vmem:[#allocation14_spill] sm:$0xff] }
 0x49b   : > { %v2066_v47 = vpop.xlane.xlu0 %2065  ;;  %v2484_v56 = vsel %vm2461_vm12, %v2291_v10, 0.0  ;;  %v2294_v22 = vsub.f32 %v5120_v1, %v2128_v59 }
 0x49c   : > { %3542 = vlog2.f32 %v2066_v47  ;;  %v2517_v61 = vsel %vm2494_vm2, %v5607_v35, %v2484_v56  ;;  %v2076_v63 = vpop.xlane.xlu1 %2075  ;;  %v2296_v11 = vsub.f32 %v5169_v21, %v2132_v14 }
 0x49d   : > { %3544 = vrcp.f32 %v2066_v47  ;;  %v2550_v58 = vsel %vm2527_vm4, %v2451_v44, %v2517_v61 }
 0x49e   : > { %v3535_v36 = vpop.eup %3534  ;;  %3546 = vlog2.f32 %v5334_v45  ;;  %2598 = vxpose.xlu1.b32.cont [7/16] (narrow) %v2550_v58, 8  ;;  %v2489_v53 = vsel %vm2461_vm12, %v2296_v11, 0.0 }
 0x49f   : > { %v3537_v39 = vpop.eup %3536  ;;  %v2126_v24 = vmul.f32 0.6931472, %v3535_v36  ;;  %v2070_v28 = vpop.xlane.xlu0 %2069 }
 0x4a0   : > { %v3539_v42 = vpop.eup %3538  ;;  %v2421_v37 = vmul.f32 %v3537_v39, %v5287_v49  ;;  %3548 = vlog2.f32 %v2070_v28  ;;  %v2487_v49 = vsel %vm2461_vm12, %v2294_v22, 0.0  ;;  %v2396_v50 = vpop.xlane.xlu1 %2395 }
 0x4a1   : > { %v2293_v19 = vsub.f32 %v5283_v17, %v2126_v24  ;;  %3550 = vrcp.f32 %v2070_v28  ;;  %v2422_v25 = vmul.f32 %v3539_v42, %v5273_v54  ;;  %v3541_v57 = vpop.eup %3540  ;;  %v2520_v16 = vsel %vm2494_vm2, %v5610_v51, %v2487_v49 }
 0x4a2   : > { %2599 = vxpose.xlu1.b32.cont [8/16] (narrow) %v2551_v62, 8  ;;  %v2453_v27 = vsub.f32 %v2126_v24, %v2421_v37  ;;  %v2424_v21 = vmul.f32 %v3541_v57, %v5309_v60 }
 0x4a3   : > { %v2074_v15 = vpop.xlane.xlu0 %2073  ;;  %v2486_v1 = vsel %vm2461_vm12, %v2293_v19, 0.0  ;;  %v2454_v26 = vsub.f32 %v2128_v59, %v2422_v25  ;;  %v2522_v59 = vsel %vm2494_vm2, %v5612_v40, %v2489_v53 }
 0x4a4   : > { %3552 = vlog2.f32 %v2074_v15  ;;  %v2519_v17 = vsel %vm2494_vm2, %v5609_v41, %v2486_v1  ;;  %v2456_v43 = vsub.f32 %v2132_v14, %v2424_v21  ;;  %v2394_v28 = vpop.xlane.xlu1 %2393  ;;  %v5616_v41 = vld [vmem:[#allocation18_spill] sm:$0xff] }
 0x4a5   : > { %3554 = vrcp.f32 %v5334_v45  ;;  %v2552_v54 = vsel %vm2527_vm4, %v2453_v27, %v2519_v17  ;;  %v2553_v46 = vsel %vm2527_vm4, %v2454_v26, %v2520_v16  ;;  %v5615_v27 = vld [vmem:[#allocation20_spill] sm:$0xff] }
 0x4a6   : > { %v3543_v12 = vpop.eup %3542  ;;  %3556 = vlog2.f32 %v2076_v63  ;;  %2600 = vxpose.xlu1.b32.cont [9/16] (narrow) %v2552_v54, 8  ;;  %v2555_v58 = vsel %vm2527_vm4, %v2456_v43, %v2522_v59 }
 0x4a7   : > { %v3545_v5 = vpop.eup %3544  ;;  %v2130_v34 = vmul.f32 0.6931472, %v3543_v12  ;;  %3558 = vrcp.f32 %v2074_v15 }
 0x4a8   : > { %v3547_v18 = vpop.eup %3546  ;;  %v2423_v32 = vmul.f32 %v3545_v5, %v5318_v4  ;;  %3560 = vrcp.f32 %v2076_v63 }
 0x4a9   : > { %v2295_v45 = vsub.f32 %v5306_v3, %v2130_v34  ;;  %v2136_v52 = vmul.f32 0.6931472, %v3547_v18 }
 0x4aa   : > { %v3549_v30 = vpop.eup %3548  ;;  %2601 = vxpose.xlu1.b32.cont [10/16] (narrow) %v2553_v46, 8  ;;  %v2455_v13 = vsub.f32 %v2130_v34, %v2423_v32 }
 0x4ab   : > { %v2134_v0 = vmul.f32 0.6931472, %v3549_v30  ;;  %v2488_v23 = vsel %vm2461_vm12, %v2295_v45, 0.0  ;;  %v3551_v4 = vpop.eup %3550  ;;  %v2298_v47 = vsub.f32 %v5219_v48, %v2136_v52 }
 0x4ac   : > { %v2521_v3 = vsel %vm2494_vm2, %v5611_v29, %v2488_v23  ;;  %v2425_v56 = vmul.f32 %v3551_v4, %v5371_v2 }
 0x4ad   : > { %v2297_v10 = vsub.f32 %v5330_v8, %v2134_v0  ;;  %v2554_v60 = vsel %vm2527_vm4, %v2455_v13, %v2521_v3  ;;  %v2491_v55 = vsel %vm2461_vm12, %v2298_v47, 0.0 }
 0x4ae   : > { %v3553_v9 = vpop.eup %3552  ;;  %2602 = vxpose.xlu1.b32.cont [11/16] (narrow) %v2554_v60, 8  ;;  %v2457_v39 = vsub.f32 %v2134_v0, %v2425_v56 }
 0x4af   : > { %v3555_v44 = vpop.eup %3554  ;;  %v2138_v35 = vmul.f32 0.6931472, %v3553_v9  ;;  %v2490_v8 = vsel %vm2461_vm12, %v2297_v10, 0.0 }
 0x4b0   : > { %v3557_v61 = vpop.eup %3556  ;;  %v2426_v36 = vmul.f32 %v3555_v44, %v5354_v33  ;;  %v2523_v38 = vsel %vm2494_vm2, %v5613_v7, %v2490_v8  ;;  %v5614_v33 = vld [vmem:[#allocation16_spill] sm:$0xff] }
 0x4b1   : > { %v2140_v48 = vmul.f32 0.6931472, %v3557_v61  ;;  %v2299_v2 = vsub.f32 %v5356_v31, %v2138_v35  ;;  %v3559_v22 = vpop.eup %3558  ;;  %v2556_v24 = vsel %vm2527_vm4, %v2457_v39, %v2523_v38  ;;  %v2524_v42 = vsel %vm2494_vm2, %v5614_v33, %v2491_v55 }
 0x4b2   : > { %2603 = vxpose.xlu1.b32.cont [12/16] (narrow) %v2555_v58, 8  ;;  %v2458_v37 = vsub.f32 %v2136_v52, %v2426_v36  ;;  %v2427_v62 = vmul.f32 %v3559_v22, %v2394_v28  ;;  %v3561_v14 = vpop.eup %3560 }
 0x4b3   : > { %v2300_v19 = vsub.f32 %v5265_v20, %v2140_v48  ;;  %v2492_v31 = vsel %vm2461_vm12, %v2299_v2, 0.0  ;;  %v2428_v15 = vmul.f32 %v3561_v14, %v2396_v50 }
 0x4b4   : > { %v2557_v25 = vsel %vm2527_vm4, %v2458_v37, %v2524_v42  ;;  %v2525_v63 = vsel %vm2494_vm2, %v5615_v27, %v2492_v31  ;;  %v2459_v1 = vsub.f32 %v2138_v35, %v2427_v62 }
 0x4b5   : > { %v2493_v49 = vsel %vm2461_vm12, %v2300_v19, 0.0  ;;  %v2460_v57 = vsub.f32 %v2140_v48, %v2428_v15 }
 0x4b6   : > { %2604 = vxpose.xlu1.b32.cont [13/16] (narrow) %v2556_v24, 8  ;;  %v2558_v20 = vsel %vm2527_vm4, %v2459_v1, %v2525_v63  ;;  %v2526_v17 = vsel %vm2494_vm2, %v5616_v41, %v2493_v49 }
 0x4b7   : > { %v2559_v54 = vsel %vm2527_vm4, %v2460_v57, %v2526_v17 }
 0x4ba   : > { %2605 = vxpose.xlu1.b32.cont [14/16] (narrow) %v2557_v25, 8 }
 0x4be   : > { %2606 = vxpose.xlu1.b32.cont [15/16] (narrow) %v2558_v20, 8 }
 0x4c2   : > { %2607 = vxpose.xlu1.b32.end [16/16] (narrow) %v2559_v54, 8 }
 0x4c3   : > { %v2576_v12 = vpop.trf.xlu0 }
 0x4c4   : > { %2624 = vst [vmem:[%s358_s23] sm:$0xff] %v2576_v12 }
 0x506   : > { %v2608_v11 = vpop.trf.xlu1 }
 0x507   : > { %2625 = vst [vmem:[%s358_s23 + $0x8] sm:$0xff] %v2608_v11 }
 0x508   : > { %3575 = shalt.err (!%p3572_p3)
}
 0x509   : > { %s3576_s17 = scalar_lea.hbm %s5459_s22, 256  ;;  %s3580_s27 = scalar_lea.hbm %s5508_s9, 512 }
 0x50a   : > { %p3577_p4 = scmp.ne.s32.totalorder %s5459_s22, %s3576_s17  ;;  %p3581_p9 = scmp.lt.u32.totalorder %s5459_s22, %s5508_s9 }
 0x50b   : > { %p3582_p10 = scmp.lt.u32.totalorder %s3580_s27, %s3576_s17  ;;  %p3584_p12 = scmp.lt.u32.totalorder %s3576_s17, %s5459_s22 }
 0x50c   : > { %p3578_p7 = pnand %p3577_p4, %p3716_p5 }
 0x50d   : > { %p3583_p11 = por %p3582_p10, %p3581_p9 }
 0x50e   : > { %p3579_p8 = pneg %p3578_p7 }
 0x50f   : > { %p3585_p13 = por %p3584_p12, %p3583_p11 }
 0x511   : > { %p3586_p0 = pnand %p3585_p13, %p3579_p8 }
 0x513   : > { %3589 = shalt.err (!%p3586_p0)
}
 0x514   : > { %3200 = dma.vmem_to_hbm [thread:$0]  (%p3716_p5), %s5454_s26, 256, %s5459_s22, %s2627_s24  }
 0x515 PF: > { %p3206_p1 = scmp.ge.s32.totalorder %s3624_s12, 2  ;;  %s2653_s14 = sand.u32 1, %s3612_s30  }
 0x516   : > { %s2654_s29 = scalar_lea.sflag [#allocation3], %s2653_s14 }
 0x517   : > { %p3203_p2 = pnand %p3206_p1, %p3720_p6 }
 0x519   : > { %3607 = dma.done.wait (!%p3203_p2), %s2654_s29, 256  }
 0x51a   : > { %3609 = vsyncadd (!%p3203_p2), %s2654_s29, 4294967040  ;;  %p19_p3 = scmp.ge.s32.totalorder %s3703_s15, 4   ;;  %s5617_s30 = smov %s3616_s10 }
 0x51b   : > { %s5618_s10 = smov %s3620_s11  ;;  %s5619_s11 = smov %s3714_s18 }
 0x51c   : > { %s5620_s12 = smov %s3703_s15  ;;  %21 = sbr.rel (!%p19_p3) target bundleno = 3 (0x3), region = 97 }
 0x523   :  { %2659 = vsyncpa [#allocation3], 1 }
 0x524   :  { %2661 = vsyncpa [#allocation3 + $0x1], 1 }

</bundles_post_ra>
